<compile_context>
chip_gen: v5e
topology: v5e:2x2
jax: 0.10.0
libtpu: 0.0.40
codegen_flags: <defaults>
</compile_context>

<pallas_src>
import functools

import jax
import jax.numpy as jnp
import numpy as np
from jax.experimental import pallas as pl
from jax.experimental.pallas import tpu as pltpu


# Static network geometry (from the PyTorch module).
_CIN, _CIN_PAD = 7, 8
_H0, _W0 = 10, 10                    # input spatial
_C1, _H1, _W1 = 16, 8, 8             # after conv1 (3x3, VALID, stride 1)
_C2, _H2, _W2 = 32, 7, 7             # after conv2 (2x2)
_C3, _H3, _W3 = 64, 6, 6             # after conv3 (2x2)
_HID = 256
_NA, _NC = 8, 1
_NHEAD = 16                          # actor(8) + critic(1), zero-padded to 16


# ------------------------------ fused kernel -------------------------------

def _ppo_fused_kernel(x_ref, c1w_ref, c1b_ref, c2w_ref, c2b_ref,
                      c3w_ref, c3b_ref, lw_ref, lb_ref, hw_ref, hb_ref,
                      out_ref, a1_ref, a2_ref, a3_ref, *, bb):
    """One batch block (bb rows, bb % 8 == 0).  All activations h-major."""
    f32 = jnp.float32

    def conv_layer(src_ref, dst_ref, w_ref, b_ref, kh, h_out):
        # dst[(ho,b), :] = relu( sum_di src[(ho+di,b), :] @ w[di] + bias )
        # In h-major layout the (ho+di, b) rows for all (ho, b) form the
        # contiguous, 8-aligned slab src[di*bb : (di+h_out)*bb, :].
        acc = jnp.dot(src_ref[0:h_out * bb, :], w_ref[0],
                      preferred_element_type=f32)
        for di in range(1, kh):
            acc = acc + jnp.dot(src_ref[di * bb:(di + h_out) * bb, :],
                                w_ref[di], preferred_element_type=f32)
        dst_ref[...] = jnp.maximum(acc + b_ref[...], 0.0)

    # conv1: [10*Bb, 80] -> [8*Bb, 128]
    conv_layer(x_ref, a1_ref, c1w_ref, c1b_ref, kh=3, h_out=_H1)
    # conv2: [8*Bb, 128] -> [7*Bb, 224]
    conv_layer(a1_ref, a2_ref, c2w_ref, c2b_ref, kh=2, h_out=_H2)
    # conv3: [7*Bb, 224] -> [6*Bb, 384]
    conv_layer(a2_ref, a3_ref, c3w_ref, c3b_ref, kh=2, h_out=_H3)

    # Linear 2304 -> 256 (+ReLU): contract (h3, w3, c).  h3 lives on a3 rows,
    # (w3, c) on its lanes, so accumulate 6 dots of [Bb,384] x [384,256].
    kdim = _W3 * _C3                                            # 384
    h_acc = jnp.dot(a3_ref[0:bb, :], lw_ref[0:kdim, :],
                    preferred_element_type=f32)
    for h3 in range(1, _H3):
        h_acc = h_acc + jnp.dot(a3_ref[h3 * bb:(h3 + 1) * bb, :],
                                lw_ref[h3 * kdim:(h3 + 1) * kdim, :],
                                preferred_element_type=f32)
    h = jnp.maximum(h_acc + lb_ref[...], 0.0)                   # [Bb, 256]

    # Fused actor/critic heads: one [Bb,256] @ [256,16] matmul straight from
    # the vreg-resident hidden activations (no h scratch round trip).
    r = jnp.dot(h, hw_ref[...], preferred_element_type=f32) + hb_ref[...]

    # Masked softmax over lanes 0..7 (actor); lane 8 passes through (critic).
    lane = jax.lax.broadcasted_iota(jnp.int32, r.shape, 1)
    is_actor = lane < _NA
    masked = jnp.where(is_actor, r, jnp.float32(-1e30))
    m = jnp.max(masked, axis=-1, keepdims=True)
    e = jnp.exp(masked - m)
    s = jnp.sum(e, axis=-1, keepdims=True)
    # Exact divide: the [Bb,16] softmax is tiny, not worth approx reciprocal.
    out_ref[...] = jnp.where(is_actor, e / s, r).astype(out_ref.dtype)


# ------------------------------ pallas wrapper ------------------------------

def _cdiv(a, b):
    return -(-a // b)


@functools.partial(jax.jit, static_argnames=("block_batch",))
def ppo_forward(x_nchw, prep, *, block_batch=8):
    """actor, critic = PPO(x); x is NCHW [B, 7, 10, 10] like the torch module.

    block_batch: batch rows per grid step (multiple of 8).  Use 64-256 for
    rollout-sized batches (v7x megacore + bounded VMEM); 8 is fine for tests.
    """
    assert block_batch % 8 == 0
    B = x_nchw.shape[0]
    Bb = block_batch
    nblk = _cdiv(B, Bb)
    Bp = nblk * Bb

    # Tiny input packing (XLA glue):
    # NCHW -> NHWC -> pad Cin 7->8, batch B->Bp -> per-block h-major
    # [nblk, H0*Bb, W0*Cpad] with row = h*Bb + b, lane = w*Cpad + c.
    x = jnp.transpose(x_nchw, (0, 2, 3, 1)).astype(jnp.float32)
    x = jnp.pad(x, ((0, Bp - B), (0, 0), (0, 0), (0, _CIN_PAD - _CIN)))
    x = x.reshape(nblk, Bb, _H0, _W0, _CIN_PAD).transpose(0, 2, 1, 3, 4)
    x_mat = x.reshape(nblk, _H0 * Bb, _W0 * _CIN_PAD)

    weights = (prep["c1w"], prep["c1b"], prep["c2w"], prep["c2b"],
               prep["c3w"], prep["c3b"], prep["lw"], prep["lb"],
               prep["hw"], prep["hb"])

    def full_spec(arr):
        # Whole weight resident in VMEM; constant block index across the grid
        # => Pallas does not re-DMA it per step.
        nd = arr.ndim
        return pl.BlockSpec(arr.shape, lambda i, _nd=nd: (0,) * _nd)

    in_specs = [pl.BlockSpec((None, _H0 * Bb, _W0 * _CIN_PAD),
                             lambda i: (i, 0, 0))]          # batch block of x
    in_specs += [full_spec(w) for w in weights]
    out_spec = pl.BlockSpec((Bb, _NHEAD), lambda i: (i, 0))

    kernel = functools.partial(_ppo_fused_kernel, bb=Bb)

    flops_per_elem = 2 * (_H1 * _W1 * _C1 * _CIN_PAD * 9
                          + _H2 * _W2 * _C2 * _C1 * 4
                          + _H3 * _W3 * _C3 * _C2 * 4
                          + _H3 * _W3 * _C3 * _HID
                          + _HID * _NHEAD)
    weight_bytes = int(sum(int(np.prod(w.shape)) for w in weights)) * 4
    cost = pl.CostEstimate(
        flops=flops_per_elem * Bp,
        transcendentals=_NHEAD * Bp,
        bytes_accessed=weight_bytes + x_mat.size * 4 + Bp * _NHEAD * 4,
    )

    out = pl.pallas_call(
        kernel,
        out_shape=jax.ShapeDtypeStruct((Bp, _NHEAD), jnp.float32),
        grid_spec=pltpu.PrefetchScalarGridSpec(
            num_scalar_prefetch=0,
            grid=(nblk,),
            in_specs=in_specs,
            out_specs=out_spec,
            scratch_shapes=[
                pltpu.VMEM((_H1 * Bb, _W1 * _C1), jnp.float32),  # a1 [8Bb,128]
                pltpu.VMEM((_H2 * Bb, _W2 * _C2), jnp.float32),  # a2 [7Bb,224]
                pltpu.VMEM((_H3 * Bb, _W3 * _C3), jnp.float32),  # a3 [6Bb,384]
            ],
        ),
        compiler_params=pltpu.CompilerParams(
            dimension_semantics=("parallel",)),
        cost_estimate=cost,
    )(x_mat, *weights)

    actor = out[:B, 0:_NA]
    critic = out[:B, _NA:_NA + _NC]
    return actor, critic


# ----------------------- one-time parameter preparation ---------------------

def prepare_params(p):
    """Repack torch-layout params into the matmul-friendly layouts the fused
    kernel consumes.  Runs once, OUTSIDE jit (no per-step transposes)."""

    def banded(w_oihw, w_in, cin_pad):
        # [kh, w_in*cin_pad, w_out*co]: folds the (kw, wo) im2col structure of
        # a stride-1 VALID conv into a banded block matrix, one slab per kh.
        w = np.asarray(w_oihw, np.float32)
        co, ci, kh, kw = w.shape
        wo = w_in - kw + 1
        bw = np.zeros((kh, w_in * cin_pad, wo * co), np.float32)
        for di in range(kh):
            for dj in range(kw):
                blk = w[:, :, di, dj].T                      # [ci, co]
                for o in range(wo):
                    r0 = (o + dj) * cin_pad
                    bw[di, r0:r0 + ci, o * co:(o + 1) * co] = blk
        return jnp.asarray(bw)

    def tiled_bias(b, wo):
        return jnp.asarray(np.tile(np.asarray(b, np.float32), wo)[None, :])

    prep = {
        "c1w": banded(p["conv1_w"], _W0, _CIN_PAD),          # [3,  80, 128]
        "c1b": tiled_bias(p["conv1_b"], _W1),                # [1, 128]
        "c2w": banded(p["conv2_w"], _W1, _C1),               # [2, 128, 224]
        "c2b": tiled_bias(p["conv2_b"], _W2),                # [1, 224]
        "c3w": banded(p["conv3_w"], _W2, _C2),               # [2, 224, 384]
        "c3b": tiled_bias(p["conv3_b"], _W3),                # [1, 384]
    }
    # Linear weight: torch flattens NCHW, i.e. column index = c*36 + h3*6 + w3.
    # Re-order rows to (h3, w3, c) to match the kernel's a3 layout.
    lw = np.asarray(p["lin_w"], np.float32)                  # [256, 2304]
    lwp = lw.reshape(_HID, _C3, _H3, _W3).transpose(2, 3, 1, 0).reshape(
        _H3 * _W3 * _C3, _HID)
    prep["lw"] = jnp.asarray(np.ascontiguousarray(lwp))      # [2304, 256]
    prep["lb"] = jnp.asarray(np.asarray(p["lin_b"], np.float32)[None, :])
    # Fused actor/critic head: lanes 0..7 actor, lane 8 critic, rest zero.
    hw = np.zeros((_HID, _NHEAD), np.float32)
    hw[:, 0:_NA] = np.asarray(p["actor_w"], np.float32).T
    hw[:, _NA:_NA + _NC] = np.asarray(p["critic_w"], np.float32).T
    hb = np.zeros((1, _NHEAD), np.float32)
    hb[0, 0:_NA] = np.asarray(p["actor_b"], np.float32)
    hb[0, _NA:_NA + _NC] = np.asarray(p["critic_b"], np.float32)
    prep["hw"] = jnp.asarray(hw)
    prep["hb"] = jnp.asarray(hb)
    return prep


# ------------------------- deterministic parameters -------------------------

def init_params(key):
    def uniform(k, shape, bound):
        return jax.random.uniform(k, shape, jnp.float32, -bound, bound)

    ks = jax.random.split(key, 12)

    def conv_init(kw_, kb_, co, ci, kh, kw):
        bound = 1.0 / float(ci * kh * kw) ** 0.5
        return uniform(kw_, (co, ci, kh, kw), bound), uniform(kb_, (co,), bound)

    def lin_init(kw_, kb_, out, inp):
        bound = 1.0 / float(inp) ** 0.5
        return uniform(kw_, (out, inp), bound), uniform(kb_, (out,), bound)

    p = {}
    p["conv1_w"], p["conv1_b"] = conv_init(ks[0], ks[1], 16, 7, 3, 3)
    p["conv2_w"], p["conv2_b"] = conv_init(ks[2], ks[3], 32, 16, 2, 2)
    p["conv3_w"], p["conv3_b"] = conv_init(ks[4], ks[5], 64, 32, 2, 2)
    p["lin_w"], p["lin_b"] = lin_init(ks[6], ks[7], 256, 2304)
    p["actor_w"], p["actor_b"] = lin_init(ks[8], ks[9], 8, 256)
    p["critic_w"], p["critic_b"] = lin_init(ks[10], ks[11], 1, 256)
    return p


# ------------------------------ pure-JAX reference --------------------------

def ppo_reference(x, p):
    y = x
    for name in ("conv1", "conv2", "conv3"):
        y = jax.lax.conv_general_dilated(
            y, p[name + "_w"], (1, 1), "VALID",
            dimension_numbers=("NCHW", "OIHW", "NCHW"))
        y = jnp.maximum(y + p[name + "_b"][None, :, None, None], 0.0)
    flat = y.reshape(y.shape[0], -1)
    h = jnp.maximum(flat @ p["lin_w"].T + p["lin_b"], 0.0)
    actor = jax.nn.softmax(h @ p["actor_w"].T + p["actor_b"], axis=-1)
    critic = h @ p["critic_w"].T + p["critic_b"]
    return actor, critic


if __name__ == "__main__":
    key = jax.random.PRNGKey(0)
    pkey, xkey = jax.random.split(key)
    params = init_params(pkey)
    prep = prepare_params(params)                 # one-time repack, outside jit

    # Input consistent with the module: 10x10 spatial -> 6x6, 64*6*6 = 2304.
    x = jax.random.normal(xkey, (2, 7, 10, 10), jnp.float32)

    actor, critic = jax.block_until_ready(ppo_forward(x, prep))
    actor_ref, critic_ref = ppo_reference(x, params)

    assert actor.shape == (2, 8) and critic.shape == (2, 1)
    assert jnp.allclose(jnp.sum(actor, axis=-1), 1.0, atol=1e-5)
    assert jnp.allclose(actor, actor_ref, atol=1e-4, rtol=1e-4)
    assert jnp.allclose(critic, critic_ref, atol=1e-3, rtol=1e-3)
    print("KERNEL_OK")
</pallas_src>

<mosaic_0001>
module attributes {stable_mosaic.version = 11 : i64} {
  func.func @_ppo_fused_kernel(%arg0: i32, %arg1: memref<1x80x80xf32, #tpu.memory_space<vmem>>, %arg2: memref<3x80x128xf32, #tpu.memory_space<vmem>>, %arg3: memref<1x128xf32, #tpu.memory_space<vmem>>, %arg4: memref<2x128x224xf32, #tpu.memory_space<vmem>>, %arg5: memref<1x224xf32, #tpu.memory_space<vmem>>, %arg6: memref<2x224x384xf32, #tpu.memory_space<vmem>>, %arg7: memref<1x384xf32, #tpu.memory_space<vmem>>, %arg8: memref<2304x256xf32, #tpu.memory_space<vmem>>, %arg9: memref<1x256xf32, #tpu.memory_space<vmem>>, %arg10: memref<256x16xf32, #tpu.memory_space<vmem>>, %arg11: memref<1x16xf32, #tpu.memory_space<vmem>>, %arg12: memref<8x16xf32, #tpu.memory_space<vmem>>, %arg13: memref<64x128xf32, #tpu.memory_space<vmem>>, %arg14: memref<56x224xf32, #tpu.memory_space<vmem>>, %arg15: memref<48x384xf32, #tpu.memory_space<vmem>>) attributes {dimension_semantics = [#tpu.dimension_semantics<parallel>], iteration_bounds = array<i64: 1>, scalar_prefetch = 0 : i64, scratch_operands = 3 : i64, tpu.core_type = #tpu.core_type<tc>, window_params = [{transform_indices = @transform_0, window_bounds = array<i64: 1, 80, 80>}, {pipeline_mode = #tpu.pipeline_mode<synchronous>, transform_indices = @transform_1, window_bounds = array<i64: 3, 80, 128>}, {pipeline_mode = #tpu.pipeline_mode<synchronous>, transform_indices = @transform_2, window_bounds = array<i64: 1, 128>}, {pipeline_mode = #tpu.pipeline_mode<synchronous>, transform_indices = @transform_3, window_bounds = array<i64: 2, 128, 224>}, {pipeline_mode = #tpu.pipeline_mode<synchronous>, transform_indices = @transform_4, window_bounds = array<i64: 1, 224>}, {pipeline_mode = #tpu.pipeline_mode<synchronous>, transform_indices = @transform_5, window_bounds = array<i64: 2, 224, 384>}, {pipeline_mode = #tpu.pipeline_mode<synchronous>, transform_indices = @transform_6, window_bounds = array<i64: 1, 384>}, {pipeline_mode = #tpu.pipeline_mode<synchronous>, transform_indices = @transform_7, window_bounds = array<i64: 2304, 256>}, {pipeline_mode = #tpu.pipeline_mode<synchronous>, transform_indices = @transform_8, window_bounds = array<i64: 1, 256>}, {pipeline_mode = #tpu.pipeline_mode<synchronous>, transform_indices = @transform_9, window_bounds = array<i64: 256, 16>}, {pipeline_mode = #tpu.pipeline_mode<synchronous>, transform_indices = @transform_10, window_bounds = array<i64: 1, 16>}, {transform_indices = @transform_11, window_bounds = array<i64: 8, 16>}]} {
    %c0 = arith.constant 0 : index
    %c0_0 = arith.constant 0 : index
    %c0_1 = arith.constant 0 : index
    %0 = vector.load %arg1[%c0, %c0_0, %c0_1] : memref<1x80x80xf32, #tpu.memory_space<vmem>>, vector<1x64x80xf32>
    %1 = vector.shape_cast %0 : vector<1x64x80xf32> to vector<64x80xf32>
    %c0_2 = arith.constant 0 : index
    %c0_3 = arith.constant 0 : index
    %c0_4 = arith.constant 0 : index
    %2 = vector.load %arg2[%c0_2, %c0_3, %c0_4] : memref<3x80x128xf32, #tpu.memory_space<vmem>>, vector<1x80x128xf32>
    %3 = vector.shape_cast %2 : vector<1x80x128xf32> to vector<80x128xf32>
    %cst = arith.constant dense<0.000000e+00> : vector<64x128xf32>
    %4 = tpu.matmul %1, %3, %cst {dimension_numbers = #tpu.dot_dimension_numbers<[1], [0], [0], [1], [0, 0, 1, 1], [], []>} : vector<64x80xf32>, vector<80x128xf32>, vector<64x128xf32> -> vector<64x128xf32>
    %c0_5 = arith.constant 0 : index
    %c8 = arith.constant 8 : index
    %c0_6 = arith.constant 0 : index
    %5 = vector.load %arg1[%c0_5, %c8, %c0_6] : memref<1x80x80xf32, #tpu.memory_space<vmem>>, vector<1x64x80xf32>
    %6 = vector.shape_cast %5 : vector<1x64x80xf32> to vector<64x80xf32>
    %c1 = arith.constant 1 : index
    %c0_7 = arith.constant 0 : index
    %c0_8 = arith.constant 0 : index
    %7 = vector.load %arg2[%c1, %c0_7, %c0_8] : memref<3x80x128xf32, #tpu.memory_space<vmem>>, vector<1x80x128xf32>
    %8 = vector.shape_cast %7 : vector<1x80x128xf32> to vector<80x128xf32>
    %cst_9 = arith.constant dense<0.000000e+00> : vector<64x128xf32>
    %9 = tpu.matmul %6, %8, %cst_9 {dimension_numbers = #tpu.dot_dimension_numbers<[1], [0], [0], [1], [0, 0, 1, 1], [], []>} : vector<64x80xf32>, vector<80x128xf32>, vector<64x128xf32> -> vector<64x128xf32>
    %10 = arith.addf %4, %9 : vector<64x128xf32>
    %c0_10 = arith.constant 0 : index
    %c16 = arith.constant 16 : index
    %c0_11 = arith.constant 0 : index
    %11 = vector.load %arg1[%c0_10, %c16, %c0_11] : memref<1x80x80xf32, #tpu.memory_space<vmem>>, vector<1x64x80xf32>
    %12 = vector.shape_cast %11 : vector<1x64x80xf32> to vector<64x80xf32>
    %c2 = arith.constant 2 : index
    %c0_12 = arith.constant 0 : index
    %c0_13 = arith.constant 0 : index
    %13 = vector.load %arg2[%c2, %c0_12, %c0_13] : memref<3x80x128xf32, #tpu.memory_space<vmem>>, vector<1x80x128xf32>
    %14 = vector.shape_cast %13 : vector<1x80x128xf32> to vector<80x128xf32>
    %cst_14 = arith.constant dense<0.000000e+00> : vector<64x128xf32>
    %15 = tpu.matmul %12, %14, %cst_14 {dimension_numbers = #tpu.dot_dimension_numbers<[1], [0], [0], [1], [0, 0, 1, 1], [], []>} : vector<64x80xf32>, vector<80x128xf32>, vector<64x128xf32> -> vector<64x128xf32>
    %16 = arith.addf %10, %15 : vector<64x128xf32>
    %c0_15 = arith.constant 0 : index
    %c0_16 = arith.constant 0 : index
    %17 = vector.load %arg3[%c0_15, %c0_16] : memref<1x128xf32, #tpu.memory_space<vmem>>, vector<1x128xf32>
    %18 = vector.broadcast %17 : vector<1x128xf32> to vector<64x128xf32>
    %19 = arith.addf %16, %18 : vector<64x128xf32>
    %cst_17 = arith.constant 0.000000e+00 : f32
    %20 = vector.broadcast %cst_17 : f32 to vector<64x128xf32>
    %21 = arith.maximumf %19, %20 : vector<64x128xf32>
    %c0_18 = arith.constant 0 : index
    %c0_19 = arith.constant 0 : index
    %22 = vector.load %arg13[%c0_18, %c0_19] : memref<64x128xf32, #tpu.memory_space<vmem>>, vector<64x128xf32>
    tpu.vector_store %arg13[%c0_18, %c0_19], %21 {strides = array<i32>} : memref<64x128xf32, #tpu.memory_space<vmem>>, vector<64x128xf32>,
    %c0_20 = arith.constant 0 : index
    %c0_21 = arith.constant 0 : index
    %23 = vector.load %arg13[%c0_20, %c0_21] : memref<64x128xf32, #tpu.memory_space<vmem>>, vector<56x128xf32>
    %c0_22 = arith.constant 0 : index
    %c0_23 = arith.constant 0 : index
    %c0_24 = arith.constant 0 : index
    %24 = vector.load %arg4[%c0_22, %c0_23, %c0_24] : memref<2x128x224xf32, #tpu.memory_space<vmem>>, vector<1x128x224xf32>
    %25 = vector.shape_cast %24 : vector<1x128x224xf32> to vector<128x224xf32>
    %cst_25 = arith.constant dense<0.000000e+00> : vector<56x224xf32>
    %26 = tpu.matmul %23, %25, %cst_25 {dimension_numbers = #tpu.dot_dimension_numbers<[1], [0], [0], [1], [0, 0, 1, 1], [], []>} : vector<56x128xf32>, vector<128x224xf32>, vector<56x224xf32> -> vector<56x224xf32>
    %c8_26 = arith.constant 8 : index
    %c0_27 = arith.constant 0 : index
    %27 = vector.load %arg13[%c8_26, %c0_27] : memref<64x128xf32, #tpu.memory_space<vmem>>, vector<56x128xf32>
    %c1_28 = arith.constant 1 : index
    %c0_29 = arith.constant 0 : index
    %c0_30 = arith.constant 0 : index
    %28 = vector.load %arg4[%c1_28, %c0_29, %c0_30] : memref<2x128x224xf32, #tpu.memory_space<vmem>>, vector<1x128x224xf32>
    %29 = vector.shape_cast %28 : vector<1x128x224xf32> to vector<128x224xf32>
    %cst_31 = arith.constant dense<0.000000e+00> : vector<56x224xf32>
    %30 = tpu.matmul %27, %29, %cst_31 {dimension_numbers = #tpu.dot_dimension_numbers<[1], [0], [0], [1], [0, 0, 1, 1], [], []>} : vector<56x128xf32>, vector<128x224xf32>, vector<56x224xf32> -> vector<56x224xf32>
    %31 = arith.addf %26, %30 : vector<56x224xf32>
    %c0_32 = arith.constant 0 : index
    %c0_33 = arith.constant 0 : index
    %32 = vector.load %arg5[%c0_32, %c0_33] : memref<1x224xf32, #tpu.memory_space<vmem>>, vector<1x224xf32>
    %33 = vector.broadcast %32 : vector<1x224xf32> to vector<56x224xf32>
    %34 = arith.addf %31, %33 : vector<56x224xf32>
    %cst_34 = arith.constant 0.000000e+00 : f32
    %35 = vector.broadcast %cst_34 : f32 to vector<56x224xf32>
    %36 = arith.maximumf %34, %35 : vector<56x224xf32>
    %c0_35 = arith.constant 0 : index
    %c0_36 = arith.constant 0 : index
    %37 = vector.load %arg14[%c0_35, %c0_36] : memref<56x224xf32, #tpu.memory_space<vmem>>, vector<56x224xf32>
    tpu.vector_store %arg14[%c0_35, %c0_36], %36 {strides = array<i32>} : memref<56x224xf32, #tpu.memory_space<vmem>>, vector<56x224xf32>,
    %c0_37 = arith.constant 0 : index
    %c0_38 = arith.constant 0 : index
    %38 = vector.load %arg14[%c0_37, %c0_38] : memref<56x224xf32, #tpu.memory_space<vmem>>, vector<48x224xf32>
    %c0_39 = arith.constant 0 : index
    %c0_40 = arith.constant 0 : index
    %c0_41 = arith.constant 0 : index
    %39 = vector.load %arg6[%c0_39, %c0_40, %c0_41] : memref<2x224x384xf32, #tpu.memory_space<vmem>>, vector<1x224x384xf32>
    %40 = vector.shape_cast %39 : vector<1x224x384xf32> to vector<224x384xf32>
    %cst_42 = arith.constant dense<0.000000e+00> : vector<48x384xf32>
    %41 = tpu.matmul %38, %40, %cst_42 {dimension_numbers = #tpu.dot_dimension_numbers<[1], [0], [0], [1], [0, 0, 1, 1], [], []>} : vector<48x224xf32>, vector<224x384xf32>, vector<48x384xf32> -> vector<48x384xf32>
    %c8_43 = arith.constant 8 : index
    %c0_44 = arith.constant 0 : index
    %42 = vector.load %arg14[%c8_43, %c0_44] : memref<56x224xf32, #tpu.memory_space<vmem>>, vector<48x224xf32>
    %c1_45 = arith.constant 1 : index
    %c0_46 = arith.constant 0 : index
    %c0_47 = arith.constant 0 : index
    %43 = vector.load %arg6[%c1_45, %c0_46, %c0_47] : memref<2x224x384xf32, #tpu.memory_space<vmem>>, vector<1x224x384xf32>
    %44 = vector.shape_cast %43 : vector<1x224x384xf32> to vector<224x384xf32>
    %cst_48 = arith.constant dense<0.000000e+00> : vector<48x384xf32>
    %45 = tpu.matmul %42, %44, %cst_48 {dimension_numbers = #tpu.dot_dimension_numbers<[1], [0], [0], [1], [0, 0, 1, 1], [], []>} : vector<48x224xf32>, vector<224x384xf32>, vector<48x384xf32> -> vector<48x384xf32>
    %46 = arith.addf %41, %45 : vector<48x384xf32>
    %c0_49 = arith.constant 0 : index
    %c0_50 = arith.constant 0 : index
    %47 = vector.load %arg7[%c0_49, %c0_50] : memref<1x384xf32, #tpu.memory_space<vmem>>, vector<1x384xf32>
    %48 = vector.broadcast %47 : vector<1x384xf32> to vector<48x384xf32>
    %49 = arith.addf %46, %48 : vector<48x384xf32>
    %cst_51 = arith.constant 0.000000e+00 : f32
    %50 = vector.broadcast %cst_51 : f32 to vector<48x384xf32>
    %51 = arith.maximumf %49, %50 : vector<48x384xf32>
    %c0_52 = arith.constant 0 : index
    %c0_53 = arith.constant 0 : index
    %52 = vector.load %arg15[%c0_52, %c0_53] : memref<48x384xf32, #tpu.memory_space<vmem>>, vector<48x384xf32>
    tpu.vector_store %arg15[%c0_52, %c0_53], %51 {strides = array<i32>} : memref<48x384xf32, #tpu.memory_space<vmem>>, vector<48x384xf32>,
    %c0_54 = arith.constant 0 : index
    %c0_55 = arith.constant 0 : index
    %53 = vector.load %arg15[%c0_54, %c0_55] : memref<48x384xf32, #tpu.memory_space<vmem>>, vector<8x384xf32>
    %c0_56 = arith.constant 0 : index
    %c0_57 = arith.constant 0 : index
    %54 = vector.load %arg8[%c0_56, %c0_57] : memref<2304x256xf32, #tpu.memory_space<vmem>>, vector<384x256xf32>
    %cst_58 = arith.constant dense<0.000000e+00> : vector<8x256xf32>
    %55 = tpu.matmul %53, %54, %cst_58 {dimension_numbers = #tpu.dot_dimension_numbers<[1], [0], [0], [1], [0, 0, 1, 1], [], []>} : vector<8x384xf32>, vector<384x256xf32>, vector<8x256xf32> -> vector<8x256xf32>
    %c8_59 = arith.constant 8 : index
    %c0_60 = arith.constant 0 : index
    %56 = vector.load %arg15[%c8_59, %c0_60] : memref<48x384xf32, #tpu.memory_space<vmem>>, vector<8x384xf32>
    %c384 = arith.constant 384 : index
    %c0_61 = arith.constant 0 : index
    %57 = vector.load %arg8[%c384, %c0_61] : memref<2304x256xf32, #tpu.memory_space<vmem>>, vector<384x256xf32>
    %cst_62 = arith.constant dense<0.000000e+00> : vector<8x256xf32>
    %58 = tpu.matmul %56, %57, %cst_62 {dimension_numbers = #tpu.dot_dimension_numbers<[1], [0], [0], [1], [0, 0, 1, 1], [], []>} : vector<8x384xf32>, vector<384x256xf32>, vector<8x256xf32> -> vector<8x256xf32>
    %59 = arith.addf %55, %58 : vector<8x256xf32>
    %c16_63 = arith.constant 16 : index
    %c0_64 = arith.constant 0 : index
    %60 = vector.load %arg15[%c16_63, %c0_64] : memref<48x384xf32, #tpu.memory_space<vmem>>, vector<8x384xf32>
    %c768 = arith.constant 768 : index
    %c0_65 = arith.constant 0 : index
    %61 = vector.load %arg8[%c768, %c0_65] : memref<2304x256xf32, #tpu.memory_space<vmem>>, vector<384x256xf32>
    %cst_66 = arith.constant dense<0.000000e+00> : vector<8x256xf32>
    %62 = tpu.matmul %60, %61, %cst_66 {dimension_numbers = #tpu.dot_dimension_numbers<[1], [0], [0], [1], [0, 0, 1, 1], [], []>} : vector<8x384xf32>, vector<384x256xf32>, vector<8x256xf32> -> vector<8x256xf32>
    %63 = arith.addf %59, %62 : vector<8x256xf32>
    %c24 = arith.constant 24 : index
    %c0_67 = arith.constant 0 : index
    %64 = vector.load %arg15[%c24, %c0_67] : memref<48x384xf32, #tpu.memory_space<vmem>>, vector<8x384xf32>
    %c1152 = arith.constant 1152 : index
    %c0_68 = arith.constant 0 : index
    %65 = vector.load %arg8[%c1152, %c0_68] : memref<2304x256xf32, #tpu.memory_space<vmem>>, vector<384x256xf32>
    %cst_69 = arith.constant dense<0.000000e+00> : vector<8x256xf32>
    %66 = tpu.matmul %64, %65, %cst_69 {dimension_numbers = #tpu.dot_dimension_numbers<[1], [0], [0], [1], [0, 0, 1, 1], [], []>} : vector<8x384xf32>, vector<384x256xf32>, vector<8x256xf32> -> vector<8x256xf32>
    %67 = arith.addf %63, %66 : vector<8x256xf32>
    %c32 = arith.constant 32 : index
    %c0_70 = arith.constant 0 : index
    %68 = vector.load %arg15[%c32, %c0_70] : memref<48x384xf32, #tpu.memory_space<vmem>>, vector<8x384xf32>
    %c1536 = arith.constant 1536 : index
    %c0_71 = arith.constant 0 : index
    %69 = vector.load %arg8[%c1536, %c0_71] : memref<2304x256xf32, #tpu.memory_space<vmem>>, vector<384x256xf32>
    %cst_72 = arith.constant dense<0.000000e+00> : vector<8x256xf32>
    %70 = tpu.matmul %68, %69, %cst_72 {dimension_numbers = #tpu.dot_dimension_numbers<[1], [0], [0], [1], [0, 0, 1, 1], [], []>} : vector<8x384xf32>, vector<384x256xf32>, vector<8x256xf32> -> vector<8x256xf32>
    %71 = arith.addf %67, %70 : vector<8x256xf32>
    %c40 = arith.constant 40 : index
    %c0_73 = arith.constant 0 : index
    %72 = vector.load %arg15[%c40, %c0_73] : memref<48x384xf32, #tpu.memory_space<vmem>>, vector<8x384xf32>
    %c1920 = arith.constant 1920 : index
    %c0_74 = arith.constant 0 : index
    %73 = vector.load %arg8[%c1920, %c0_74] : memref<2304x256xf32, #tpu.memory_space<vmem>>, vector<384x256xf32>
    %cst_75 = arith.constant dense<0.000000e+00> : vector<8x256xf32>
    %74 = tpu.matmul %72, %73, %cst_75 {dimension_numbers = #tpu.dot_dimension_numbers<[1], [0], [0], [1], [0, 0, 1, 1], [], []>} : vector<8x384xf32>, vector<384x256xf32>, vector<8x256xf32> -> vector<8x256xf32>
    %75 = arith.addf %71, %74 : vector<8x256xf32>
    %c0_76 = arith.constant 0 : index
    %c0_77 = arith.constant 0 : index
    %76 = vector.load %arg9[%c0_76, %c0_77] : memref<1x256xf32, #tpu.memory_space<vmem>>, vector<1x256xf32>
    %77 = vector.broadcast %76 : vector<1x256xf32> to vector<8x256xf32>
    %78 = arith.addf %75, %77 : vector<8x256xf32>
    %cst_78 = arith.constant 0.000000e+00 : f32
    %79 = vector.broadcast %cst_78 : f32 to vector<8x256xf32>
    %80 = arith.maximumf %78, %79 : vector<8x256xf32>
    %c0_79 = arith.constant 0 : index
    %c0_80 = arith.constant 0 : index
    %81 = vector.load %arg10[%c0_79, %c0_80] : memref<256x16xf32, #tpu.memory_space<vmem>>, vector<256x16xf32>
    %cst_81 = arith.constant dense<0.000000e+00> : vector<8x16xf32>
    %82 = tpu.matmul %80, %81, %cst_81 {dimension_numbers = #tpu.dot_dimension_numbers<[1], [0], [0], [1], [0, 0, 1, 1], [], []>} : vector<8x256xf32>, vector<256x16xf32>, vector<8x16xf32> -> vector<8x16xf32>
    %c0_82 = arith.constant 0 : index
    %c0_83 = arith.constant 0 : index
    %83 = vector.load %arg11[%c0_82, %c0_83] : memref<1x16xf32, #tpu.memory_space<vmem>>, vector<1x16xf32>
    %84 = vector.broadcast %83 : vector<1x16xf32> to vector<8x16xf32>
    %85 = arith.addf %82, %84 : vector<8x16xf32>
    %86 = tpu.iota {dimensions = array<i32: 1>} : vector<8x16xi32>
    %c8_i32 = arith.constant 8 : i32
    %87 = vector.broadcast %c8_i32 : i32 to vector<8x16xi32>
    %88 = arith.cmpi slt, %86, %87 : vector<8x16xi32>
    %cst_84 = arith.constant -1.000000e+30 : f32
    %89 = vector.broadcast %cst_84 : f32 to vector<8x16xf32>
    %90 = arith.select %88, %85, %89 : vector<8x16xi1>, vector<8x16xf32>
    %cst_85 = arith.constant dense<0xFF800000> : vector<8xf32>
    %91 = vector.multi_reduction <maximumf>, %90, %cst_85 [1] : vector<8x16xf32> to vector<8xf32>
    %92 = vector.shape_cast %91 : vector<8xf32> to vector<8x1xf32>
    %93 = vector.broadcast %92 : vector<8x1xf32> to vector<8x16xf32>
    %94 = arith.subf %90, %93 : vector<8x16xf32>
    %95 = math.exp %94 : vector<8x16xf32>
    %cst_86 = arith.constant dense<0.000000e+00> : vector<8xf32>
    %96 = vector.multi_reduction <add>, %95, %cst_86 [1] : vector<8x16xf32> to vector<8xf32>
    %97 = vector.shape_cast %96 : vector<8xf32> to vector<8x1xf32>
    %98 = vector.broadcast %97 : vector<8x1xf32> to vector<8x16xf32>
    %99 = arith.divf %95, %98 : vector<8x16xf32>
    %100 = arith.select %88, %99, %85 : vector<8x16xi1>, vector<8x16xf32>
    %c0_87 = arith.constant 0 : index
    %c0_88 = arith.constant 0 : index
    %101 = vector.load %arg12[%c0_87, %c0_88] : memref<8x16xf32, #tpu.memory_space<vmem>>, vector<8x16xf32>
    tpu.vector_store %arg12[%c0_87, %c0_88], %100 {strides = array<i32>} : memref<8x16xf32, #tpu.memory_space<vmem>>, vector<8x16xf32>,
    return
  }
  func.func @transform_0(%arg0: i32) -> (i32, i32, i32) {
    %c0_i32 = arith.constant 0 : i32
    %c0_i32_0 = arith.constant 0 : i32
    %c0_i32_1 = arith.constant 0 : i32
    return %arg0, %c0_i32, %c0_i32_0 : i32, i32, i32
  }
  func.func @transform_1(%arg0: i32) -> (i32, i32, i32) {
    %c0_i32 = arith.constant 0 : i32
    %c0_i32_0 = arith.constant 0 : i32
    %c0_i32_1 = arith.constant 0 : i32
    %c0_i32_2 = arith.constant 0 : i32
    return %c0_i32, %c0_i32_0, %c0_i32_1 : i32, i32, i32
  }
  func.func @transform_2(%arg0: i32) -> (i32, i32) {
    %c0_i32 = arith.constant 0 : i32
    %c0_i32_0 = arith.constant 0 : i32
    %c0_i32_1 = arith.constant 0 : i32
    return %c0_i32, %c0_i32_0 : i32, i32
  }
  func.func @transform_3(%arg0: i32) -> (i32, i32, i32) {
    %c0_i32 = arith.constant 0 : i32
    %c0_i32_0 = arith.constant 0 : i32
    %c0_i32_1 = arith.constant 0 : i32
    %c0_i32_2 = arith.constant 0 : i32
    return %c0_i32, %c0_i32_0, %c0_i32_1 : i32, i32, i32
  }
  func.func @transform_4(%arg0: i32) -> (i32, i32) {
    %c0_i32 = arith.constant 0 : i32
    %c0_i32_0 = arith.constant 0 : i32
    %c0_i32_1 = arith.constant 0 : i32
    return %c0_i32, %c0_i32_0 : i32, i32
  }
  func.func @transform_5(%arg0: i32) -> (i32, i32, i32) {
    %c0_i32 = arith.constant 0 : i32
    %c0_i32_0 = arith.constant 0 : i32
    %c0_i32_1 = arith.constant 0 : i32
    %c0_i32_2 = arith.constant 0 : i32
    return %c0_i32, %c0_i32_0, %c0_i32_1 : i32, i32, i32
  }
  func.func @transform_6(%arg0: i32) -> (i32, i32) {
    %c0_i32 = arith.constant 0 : i32
    %c0_i32_0 = arith.constant 0 : i32
    %c0_i32_1 = arith.constant 0 : i32
    return %c0_i32, %c0_i32_0 : i32, i32
  }
  func.func @transform_7(%arg0: i32) -> (i32, i32) {
    %c0_i32 = arith.constant 0 : i32
    %c0_i32_0 = arith.constant 0 : i32
    %c0_i32_1 = arith.constant 0 : i32
    return %c0_i32, %c0_i32_0 : i32, i32
  }
  func.func @transform_8(%arg0: i32) -> (i32, i32) {
    %c0_i32 = arith.constant 0 : i32
    %c0_i32_0 = arith.constant 0 : i32
    %c0_i32_1 = arith.constant 0 : i32
    return %c0_i32, %c0_i32_0 : i32, i32
  }
  func.func @transform_9(%arg0: i32) -> (i32, i32) {
    %c0_i32 = arith.constant 0 : i32
    %c0_i32_0 = arith.constant 0 : i32
    %c0_i32_1 = arith.constant 0 : i32
    return %c0_i32, %c0_i32_0 : i32, i32
  }
  func.func @transform_10(%arg0: i32) -> (i32, i32) {
    %c0_i32 = arith.constant 0 : i32
    %c0_i32_0 = arith.constant 0 : i32
    %c0_i32_1 = arith.constant 0 : i32
    return %c0_i32, %c0_i32_0 : i32, i32
  }
  func.func @transform_11(%arg0: i32) -> (i32, i32) {
    %c0_i32 = arith.constant 0 : i32
    %c0_i32_0 = arith.constant 0 : i32
    return %arg0, %c0_i32 : i32, i32
  }
}

</mosaic_0001>

<bundles_post_ra>
// kernel: ppo_forward.1
= control target key start
LH: loop header
LB: loop body
LE: loop exit
PB: predicated region body
PF: predicated region fallthrough
CT: control target
= control target key end

     0   :  { %16 = vsyncpa [#allocation6], 0  ;;  %s2871_s20 = smov [#allocation5]   ;;  %s2872_s22 = smov 384   ;;  %s5516_s0 = inlined_call_operand.vmem [shape: f32[1,80,80], index: 0, kind: input, shape index: {}]   ;;  %s5517_s1 = inlined_call_operand.vmem [shape: f32[3,80,128], index: 1, kind: input, shape index: {}]   ;;  %s5518_s2 = inlined_call_operand.vmem [shape: f32[1,128], index: 2, kind: input, shape index: {}]   ;;  %s5519_s3 = inlined_call_operand.vmem [shape: f32[2,128,224], index: 3, kind: input, shape index: {}]   ;;  %s5520_s4 = inlined_call_operand.vmem [shape: f32[1,224], index: 4, kind: input, shape index: {}]   ;;  %s5521_s5 = inlined_call_operand.hbm [shape: f32[2,224,384], index: 5, kind: input, shape index: {}]   ;;  %s5522_s6 = inlined_call_operand.vmem [shape: f32[1,384], index: 6, kind: input, shape index: {}]   ;;  %s5523_s7 = inlined_call_operand.vmem [shape: f32[2304,256], index: 7, kind: input, shape index: {}]   ;;  %s5524_s8 = inlined_call_operand.vmem [shape: f32[1,256], index: 8, kind: input, shape index: {}]   ;;  %s5525_s9 = inlined_call_operand.vmem [shape: f32[256,16], index: 9, kind: input, shape index: {}]   ;;  %s5526_s10 = inlined_call_operand.vmem [shape: f32[1,16], index: 10, kind: input, shape index: {}]   ;;  %s5527_s11 = inlined_call_operand.vmem [shape: f32[8,16], index: 11, kind: output, shape index: {}]  }
   0x1   :  { %s31_s19 = sshll.u32 %s5521_s5, 4  ;;  %s33_s21 = sshll.u32 %s2871_s20, 4  ;;  %s32_s19 = int_to_ptr.hbm [resolvable:$true] %s31_s19  ;;  %s34_s21 = int_to_ptr.vmem [resolvable:$true] %s33_s21 }
   0x2   :  { %s2873_s23 = smov 24  }
   0x3   :  { %39 = dma.hbm_to_vmem [thread:$0]  %s32_s19, 21504, %s34_s21, [#allocation6], %s2872_s22, %s2872_s22, %s2873_s23  }
   0x4   :  { %2869 = dma.done.wait [#allocation6], 21504  }
   0x5   :  { %2870 = vsyncadd [#allocation6], 4294945792  ;;  %v2759_v0 = vld [vmem:[%s5517_s1 + $0xe8] sm:$0xff]  ;;  %v2758_v1 = vld [vmem:[%s5517_s1 + $0xe0] sm:$0xff]  ;;  %vm84_vm0 = vcmask 654336   ;;  %vm580_vm1 = vcmask 785408  }
   0x6   :  { %v2733_v2 = vld [vmem:[%s5517_s1 + $0x98] sm:$0xff]  ;;  %243 = vmatpush.msra.mxu2 %v2759_v0  ;;  %v71_v3 = vld [vmem:[%s5517_s1 + $0x48] sm:$0xff]  ;;  %v2732_v4 = vld [vmem:[%s5517_s1 + $0x90] sm:$0xff]  ;;  %vm2692_vm3 = vcmask 130048  }
   0x7   :  { %115 = vmatpush.msra.mxu0 %v2733_v2  ;;  %159 = vmatpush.msra.mxu1 %v71_v3  ;;  %v2757_v5 = vld [vmem:[%s5517_s1 + $0xd8] sm:$0xff]  ;;  %v70_v6 = vld [vmem:[%s5517_s1 + $0x40] sm:$0xff]  ;;  %v2731_v7 = vld [vmem:[%s5517_s1 + $0x88] sm:$0xff] }
   0x8   :  { %244 = vmatpush.msra.mxu2 %v2758_v1  ;;  %v69_v8 = vld [vmem:[%s5517_s1 + $0x38] sm:$0xff]  ;;  %v2756_v9 = vld [vmem:[%s5517_s1 + $0xd0] sm:$0xff]  ;;  %v2730_v10 = vld [vmem:[%s5517_s1 + $0x80] sm:$0xff] }
   0x9   :  { %116 = vmatpush.msra.mxu0 %v2732_v4  ;;  %160 = vmatpush.msra.mxu1 %v70_v6  ;;  %v68_v11 = vld [vmem:[%s5517_s1 + $0x30] sm:$0xff]  ;;  %v2755_v12 = vld [vmem:[%s5517_s1 + $0xc8] sm:$0xff]  ;;  %v2729_v13 = vld [vmem:[%s5517_s1 + $0x78] sm:$0xff] }
   0xa   :  { %245 = vmatpush.msra.mxu2 %v2757_v5  ;;  %v67_v14 = vld [vmem:[%s5517_s1 + $0x28] sm:$0xff]  ;;  %v2754_v15 = vld [vmem:[%s5517_s1 + $0xc0] sm:$0xff]  ;;  %v2728_v16 = vld [vmem:[%s5517_s1 + $0x70] sm:$0xff] }
   0xb   :  { %117 = vmatpush.msra.mxu0 %v2731_v7  ;;  %161 = vmatpush.msra.mxu1 %v69_v8  ;;  %v66_v17 = vld [vmem:[%s5517_s1 + $0x20] sm:$0xff]  ;;  %v2753_v18 = vld [vmem:[%s5517_s1 + $0xb8] sm:$0xff]  ;;  %v2727_v19 = vld [vmem:[%s5517_s1 + $0x68] sm:$0xff] }
   0xc   :  { %246 = vmatpush.msra.mxu2 %v2756_v9  ;;  %v2752_v20 = vld [vmem:[%s5517_s1 + $0xb0] sm:$0xff]  ;;  %v65_v21 = vld [vmem:[%s5517_s1 + $0x18] sm:$0xff]  ;;  %v2726_v22 = vld [vmem:[%s5517_s1 + $0x60] sm:$0xff] }
   0xd   :  { %118 = vmatpush.msra.mxu0 %v2730_v10  ;;  %162 = vmatpush.msra.mxu1 %v68_v11  ;;  %v64_v23 = vld [vmem:[%s5517_s1 + $0x10] sm:$0xff]  ;;  %v2751_v24 = vld [vmem:[%s5517_s1 + $0xa8] sm:$0xff]  ;;  %v2725_v25 = vld [vmem:[%s5517_s1 + $0x58] sm:$0xff] }
   0xe   :  { %247 = vmatpush.msra.mxu2 %v2755_v12  ;;  %v63_v26 = vld [vmem:[%s5517_s1 + $0x8] sm:$0xff]  ;;  %v2750_v27 = vld [vmem:[%s5517_s1 + $0xa0] sm:$0xff]  ;;  %v2724_v28 = vld [vmem:[%s5517_s1 + $0x50] sm:$0xff] }
   0xf   :  { %119 = vmatpush.msra.mxu0 %v2729_v13  ;;  %163 = vmatpush.msra.mxu1 %v67_v14  ;;  %v194_v29 = vld [vmem:[%s5516_s0 + $0x10] sm:$0xff]  ;;  %v62_v30 = vld [vmem:[%s5517_s1] sm:$0xff]  ;;  %v55_v31 = vld [vmem:[%s5516_s0 + $0x8] sm:$0xff] }
  0x10   :  { %248 = vmatpush.msra.mxu2 %v2754_v15  ;;  %v54_v32 = vld [vmem:[%s5516_s0] sm:$0xff]  ;;  %v195_v33 = vld [vmem:[%s5516_s0 + $0x18] sm:$0xff]  ;;  %v3054_v35 = vld [vmem:[%s5516_s0 + $0x28] sm:$0xff] }
  0x11   :  { %120 = vmatpush.msra.mxu0 %v2728_v16  ;;  %164 = vmatpush.msra.mxu1 %v66_v17  ;;  %v196_v34 = vld [vmem:[%s5516_s0 + $0x20] sm:$0xff]  ;;  %v351_v36 = vld [vmem:[%s5519_s3 + $0xf0] sm:$0xff]  ;;  %v352_v37 = vld [vmem:[%s5519_s3 + $0xf8] sm:$0xff] }
  0x12   :  { %249 = vmatpush.msra.mxu2 %v2753_v18  ;;  %v349_v38 = vld [vmem:[%s5519_s3 + $0xe0] sm:$0xff]  ;;  %v350_v39 = vld [vmem:[%s5519_s3 + $0xe8] sm:$0xff]  ;;  %v347_v40 = vld [vmem:[%s5519_s3 + $0xd0] sm:$0xff] }
  0x13   :  { %121 = vmatpush.msra.mxu0 %v2727_v19  ;;  %165 = vmatpush.msra.mxu1 %v65_v21  ;;  %v348_v41 = vld [vmem:[%s5519_s3 + $0xd8] sm:$0xff]  ;;  %v2798_v42 = vld [vmem:[%s5519_s3 + $0x1f0] sm:$0xff]  ;;  %v345_v45 = vld [vmem:[%s5519_s3 + $0xc0] sm:$0xff] }
  0x14   :  { %250 = vmatpush.msra.mxu2 %v2752_v20  ;;  %v3084_v43 = vld [vmem:[%s5516_s0 + $0x30] sm:$0xff]  ;;  %v2799_v44 = vld [vmem:[%s5519_s3 + $0x1f8] sm:$0xff]  ;;  %393 = vmatpush.msra.mxu3 %v2798_v42  ;;  %v2796_v46 = vld [vmem:[%s5519_s3 + $0x1e0] sm:$0xff] }
  0x15   :  { %122 = vmatpush.msra.mxu0 %v2726_v22  ;;  %166 = vmatpush.msra.mxu1 %v64_v23  ;;  %v2797_v47 = vld [vmem:[%s5519_s3 + $0x1e8] sm:$0xff]  ;;  %v343_v49 = vld [vmem:[%s5519_s3 + $0xb0] sm:$0xff]  ;;  %v2795_v51 = vld [vmem:[%s5519_s3 + $0x1d8] sm:$0xff] }
  0x16   :  { %251 = vmatpush.msra.mxu2 %v2751_v24  ;;  %v346_v48 = vld [vmem:[%s5519_s3 + $0xc8] sm:$0xff]  ;;  %394 = vmatpush.msra.mxu3 %v2796_v46  ;;  %v2794_v50 = vld [vmem:[%s5519_s3 + $0x1d0] sm:$0xff]  ;;  %v344_v52 = vld [vmem:[%s5519_s3 + $0xb8] sm:$0xff] }
  0x17   :  { %123 = vmatpush.msra.mxu0 %v2725_v25  ;;  %167 = vmatpush.msra.mxu1 %v63_v26  ;;  %v341_v53 = vld [vmem:[%s5519_s3 + $0xa0] sm:$0xff]  ;;  %v2793_v55 = vld [vmem:[%s5519_s3 + $0x1c8] sm:$0xff]  ;;  %v339_v57 = vld [vmem:[%s5519_s3 + $0x90] sm:$0xff] }
  0x18   :  { %252 = vmatpush.msra.mxu2 %v2750_v27  ;;  %v2792_v54 = vld [vmem:[%s5519_s3 + $0x1c0] sm:$0xff]  ;;  %v342_v56 = vld [vmem:[%s5519_s3 + $0xa8] sm:$0xff]  ;;  %395 = vmatpush.msra.mxu3 %v2794_v50  ;;  %v2790_v58 = vld [vmem:[%s5519_s3 + $0x1b0] sm:$0xff] }
  0x19   :  { %124 = vmatpush.msra.mxu0 %v2724_v28  ;;  %2760 = vmatmul.msk.f32.vlgmr.msra.gmra.mxu2 %vm84_vm0, %v194_v29  ;;  %v2791_v59 = vld [vmem:[%s5519_s3 + $0x1b8] sm:$0xff]  ;;  %v337_v61 = vld [vmem:[%s5519_s3 + $0x80] sm:$0xff]  ;;  %v335_v63 = vld [vmem:[%s5519_s3 + $0x70] sm:$0xff] }
  0x1a   :  { %168 = vmatpush.msra.mxu1 %v62_v30  ;;  %2734 = vmatmul.msk.f32.vlgmr.msra.gmra.mxu0 %vm84_vm0, %v55_v31  ;;  %v199_v60 = vld [vmem:[%s5516_s0 + $0x38] sm:$0xff]  ;;  %v2788_v0 = vld [vmem:[%s5519_s3 + $0x1a0] sm:$0xff]  ;;  %v2789_v1 = vld [vmem:[%s5519_s3 + $0x1a8] sm:$0xff] }
  0x1b   :  { %2742 = vmatmul.msk.f32.vlgmr.msra.gmra.mxu1 %vm84_vm0, %v54_v32  ;;  %507 = vmatpush.msrb.mxu2 %v352_v37  ;;  %v340_v62 = vld [vmem:[%s5519_s3 + $0x98] sm:$0xff]  ;;  %v338_v2 = vld [vmem:[%s5519_s3 + $0x88] sm:$0xff]  ;;  %v333_v3 = vld [vmem:[%s5519_s3 + $0x60] sm:$0xff] }
  0x1c   :  { %469 = vmatpush.msrb.mxu1 %v351_v36  ;;  %431 = vmatpush.msrb.mxu0 %v2799_v44  ;;  %v2786_v4 = vld [vmem:[%s5519_s3 + $0x190] sm:$0xff]  ;;  %v2787_v5 = vld [vmem:[%s5519_s3 + $0x198] sm:$0xff]  ;;  %v200_v8 = vld [vmem:[%s5516_s0 + $0x40] sm:$0xff] }
  0x1d   :  { %508 = vmatpush.msrb.mxu2 %v350_v39  ;;  %396 = vmatpush.msra.mxu3 %v2792_v54  ;;  %v336_v6 = vld [vmem:[%s5519_s3 + $0x78] sm:$0xff]  ;;  %v331_v7 = vld [vmem:[%s5519_s3 + $0x50] sm:$0xff]  ;;  %v334_v9 = vld [vmem:[%s5519_s3 + $0x68] sm:$0xff] }
  0x1e   :  { %470 = vmatpush.msrb.mxu1 %v349_v38  ;;  %432 = vmatpush.msrb.mxu0 %v2797_v47  ;;  %v332_v10 = vld [vmem:[%s5519_s3 + $0x58] sm:$0xff]  ;;  %v201_v11 = vld [vmem:[%s5516_s0 + $0x48] sm:$0xff]  ;;  %v2784_v12 = vld [vmem:[%s5519_s3 + $0x180] sm:$0xff] }
  0x1f   :  { %509 = vmatpush.msrb.mxu2 %v348_v41  ;;  %397 = vmatpush.msra.mxu3 %v2790_v58  ;;  %v2785_v13 = vld [vmem:[%s5519_s3 + $0x188] sm:$0xff]  ;;  %v329_v14 = vld [vmem:[%s5519_s3 + $0x40] sm:$0xff]  ;;  %v2782_v16 = vld [vmem:[%s5519_s3 + $0x170] sm:$0xff] }
  0x20   :  { %471 = vmatpush.msrb.mxu1 %v347_v40  ;;  %433 = vmatpush.msrb.mxu0 %v2795_v51  ;;  %v330_v15 = vld [vmem:[%s5519_s3 + $0x48] sm:$0xff]  ;;  %v2783_v17 = vld [vmem:[%s5519_s3 + $0x178] sm:$0xff]  ;;  %v327_v18 = vld [vmem:[%s5519_s3 + $0x30] sm:$0xff] }
  0x21   :  { %2761 = vmatmul.msk.f32.gmra.mxu2 %vm84_vm0, %v195_v33  ;;  %398 = vmatpush.msra.mxu3 %v2788_v0  ;;  %v328_v19 = vld [vmem:[%s5519_s3 + $0x38] sm:$0xff]  ;;  %v2780_v20 = vld [vmem:[%s5519_s3 + $0x160] sm:$0xff]  ;;  %v2781_v21 = vld [vmem:[%s5519_s3 + $0x168] sm:$0xff] }
  0x22   :  { %2735 = vmatmul.msk.f32.gmra.mxu0 %vm84_vm0, %v194_v29  ;;  %472 = vmatpush.msrb.mxu1 %v345_v45  ;;  %v325_v22 = vld [vmem:[%s5519_s3 + $0x20] sm:$0xff]  ;;  %v326_v23 = vld [vmem:[%s5519_s3 + $0x28] sm:$0xff]  ;;  %v2778_v24 = vld [vmem:[%s5519_s3 + $0x150] sm:$0xff] }
  0x23   :  { %2743 = vmatmul.msk.f32.gmra.mxu1 %vm84_vm0, %v55_v31  ;;  %510 = vmatpush.msrb.mxu2 %v346_v48  ;;  %v2779_v25 = vld [vmem:[%s5519_s3 + $0x158] sm:$0xff]  ;;  %v323_v26 = vld [vmem:[%s5519_s3 + $0x10] sm:$0xff]  ;;  %v2776_v28 = vld [vmem:[%s5519_s3 + $0x140] sm:$0xff] }
  0x24   :  { %473 = vmatpush.msrb.mxu1 %v343_v49  ;;  %434 = vmatpush.msrb.mxu0 %v2793_v55  ;;  %v324_v27 = vld [vmem:[%s5519_s3 + $0x18] sm:$0xff]  ;;  %v321_v30 = vld [vmem:[%s5519_s3] sm:$0xff]  ;;  %v322_v31 = vld [vmem:[%s5519_s3 + $0x8] sm:$0xff] }
  0x25   :  { %511 = vmatpush.msrb.mxu2 %v344_v52  ;;  %399 = vmatpush.msra.mxu3 %v2786_v4  ;;  %v2774_v32 = vld [vmem:[%s5519_s3 + $0x130] sm:$0xff]  ;;  %v2771_v37 = vld [vmem:[%s5519_s3 + $0x118] sm:$0xff]  ;;  %v2768_v38 = vld [vmem:[%s5519_s3 + $0x100] sm:$0xff] }
  0x26   :  { %474 = vmatpush.msrb.mxu1 %v341_v53  ;;  %435 = vmatpush.msrb.mxu0 %v2791_v59  ;;  %v2770_v36 = vld [vmem:[%s5519_s3 + $0x110] sm:$0xff]  ;;  %v2769_v39 = vld [vmem:[%s5519_s3 + $0x108] sm:$0xff] }
  0x27   :  { %512 = vmatpush.msrb.mxu2 %v342_v56  ;;  %400 = vmatpush.msra.mxu3 %v2784_v12 }
  0x28   :  { %475 = vmatpush.msrb.mxu1 %v339_v57  ;;  %436 = vmatpush.msrb.mxu0 %v2789_v1 }
  0x29   :  { %2762 = vmatmul.msk.f32.gmra.mxu2 %vm84_vm0, %v196_v34  ;;  %401 = vmatpush.msra.mxu3 %v2782_v16 }
  0x2a   :  { %2736 = vmatmul.msk.f32.gmra.mxu0 %vm84_vm0, %v195_v33  ;;  %476 = vmatpush.msrb.mxu1 %v337_v61 }
  0x2b   :  { %2744 = vmatmul.msk.f32.gmra.mxu1 %vm84_vm0, %v194_v29  ;;  %513 = vmatpush.msrb.mxu2 %v340_v62  ;;  %v2777_v29 = vld [vmem:[%s5519_s3 + $0x148] sm:$0xff] }
  0x2c   :  { %477 = vmatpush.msrb.mxu1 %v335_v63  ;;  %437 = vmatpush.msrb.mxu0 %v2787_v5 }
  0x2d   :  { %514 = vmatpush.msrb.mxu2 %v338_v2  ;;  %402 = vmatpush.msra.mxu3 %v2780_v20 }
  0x2e   :  { %478 = vmatpush.msrb.mxu1 %v333_v3  ;;  %438 = vmatpush.msrb.mxu0 %v2785_v13 }
  0x2f   :  { %515 = vmatpush.msrb.mxu2 %v336_v6  ;;  %403 = vmatpush.msra.mxu3 %v2778_v24 }
  0x30   :  { %479 = vmatpush.msrb.mxu1 %v331_v7  ;;  %439 = vmatpush.msrb.mxu0 %v2783_v17 }
  0x31   :  { %2763 = vmatmul.msk.f32.gmra.mxu2 %vm84_vm0, %v3054_v35  ;;  %404 = vmatpush.msra.mxu3 %v2776_v28 }
  0x32   :  { %2737 = vmatmul.msk.f32.gmra.mxu0 %vm84_vm0, %v196_v34  ;;  %516 = vmatpush.msrb.mxu2 %v334_v9 }
  0x33   :  { %2745 = vmatmul.msk.f32.gmra.mxu1 %vm84_vm0, %v195_v33  ;;  %440 = vmatpush.msrb.mxu0 %v2781_v21  ;;  %v2775_v33 = vld [vmem:[%s5519_s3 + $0x138] sm:$0xff] }
  0x34   :  { %517 = vmatpush.msrb.mxu2 %v332_v10  ;;  %480 = vmatpush.msrb.mxu1 %v329_v14 }
  0x35   :  { %441 = vmatpush.msrb.mxu0 %v2779_v25  ;;  %405 = vmatpush.msra.mxu3 %v2774_v32 }
  0x36   :  { %518 = vmatpush.msrb.mxu2 %v330_v15  ;;  %481 = vmatpush.msrb.mxu1 %v327_v18 }
  0x37   :  { %442 = vmatpush.msrb.mxu0 %v2777_v29 }
  0x38   :  { %519 = vmatpush.msrb.mxu2 %v328_v19  ;;  %482 = vmatpush.msrb.mxu1 %v325_v22 }
  0x39   :  { %2764 = vmatmul.msk.f32.gmra.mxu2 %vm84_vm0, %v3084_v43  ;;  %443 = vmatpush.msrb.mxu0 %v2775_v33  ;;  %v738_v33 = vld [vmem:[#allocation5 + $0x408] sm:$0xff] }
  0x3a   :  { %2738 = vmatmul.msk.f32.gmra.mxu0 %vm84_vm0, %v3054_v35  ;;  %520 = vmatpush.msrb.mxu2 %v326_v23 }
  0x3b   :  { %2746 = vmatmul.msk.f32.gmra.mxu1 %vm84_vm0, %v196_v34  ;;  %v2772_v34 = vld [vmem:[%s5519_s3 + $0x120] sm:$0xff] }
  0x3c   :  { %483 = vmatpush.msrb.mxu1 %v323_v26  ;;  %521 = vmatpush.msrb.mxu2 %v324_v27 }
  0x3d   :  { %406 = vmatpush.msra.mxu3 %v2772_v34  ;;  %v739_v34 = vld [vmem:[#allocation5 + $0x410] sm:$0xff] }
  0x3e   :  { %484 = vmatpush.msrb.mxu1 %v321_v30  ;;  %522 = vmatpush.msrb.mxu2 %v322_v31 }
  0x3f   :  { %407 = vmatpush.msra.mxu3 %v2770_v36  ;;  %v735_v36 = vld [vmem:[#allocation5 + $0x3f0] sm:$0xff] }
  0x41   :  { %2765 = vmatmul.msk.f32.gmra.mxu2 %vm84_vm0, %v199_v60  ;;  %408 = vmatpush.msra.mxu3 %v2768_v38  ;;  %v737_v38 = vld [vmem:[#allocation5 + $0x400] sm:$0xff] }
  0x42   :  { %2739 = vmatmul.msk.f32.gmra.mxu0 %vm84_vm0, %v3084_v43 }
  0x43   :  { %2747 = vmatmul.msk.f32.gmra.mxu1 %vm84_vm0, %v3054_v35  ;;  %v2773_v35 = vld [vmem:[%s5519_s3 + $0x128] sm:$0xff]  ;;  %795 = vmatpush.msrb.mxu3 %v738_v33 }
  0x44   :  { %444 = vmatpush.msrb.mxu0 %v2773_v35  ;;  %v740_v35 = vld [vmem:[#allocation5 + $0x418] sm:$0xff] }
  0x45   :  { %935 = vmatpush.msra.mxu2 %v740_v35  ;;  %796 = vmatpush.msrb.mxu3 %v735_v36 }
  0x46   :  { %445 = vmatpush.msrb.mxu0 %v2771_v37  ;;  %v736_v37 = vld [vmem:[#allocation5 + $0x3f8] sm:$0xff] }
  0x47   :  { %936 = vmatpush.msra.mxu2 %v737_v38 }
  0x48   :  { %446 = vmatpush.msrb.mxu0 %v2769_v39  ;;  %v732_v39 = vld [vmem:[#allocation5 + $0x3d8] sm:$0xff] }
  0x49   :  { %2766 = vmatmul.msk.f32.gmra.mxu2 %vm84_vm0, %v200_v8  ;;  %797 = vmatpush.msrb.mxu3 %v732_v39 }
  0x4a   :  { %2740 = vmatmul.msk.f32.gmra.mxu0 %vm84_vm0, %v199_v60 }
  0x4b   :  { %2748 = vmatmul.msk.f32.gmra.mxu1 %vm84_vm0, %v3084_v43  ;;  %v3286_v43 = vld [vmem:[%s5518_s2] ss:$0 sm:$0xff]  ;;  %865 = vmatpush.msra.mxu0 %v739_v34 }
  0x4d   :  { %866 = vmatpush.msra.mxu0 %v736_v37 }
  0x51   :  { %2767 = vmatmul.msk.f32.gmra.mxu2 %vm84_vm0, %v201_v11 }
  0x52   :  { %2741 = vmatmul.msk.f32.gmra.mxu0 %vm84_vm0, %v200_v8 }
  0x53   :  { %2749 = vmatmul.msk.f32.gmra.mxu1 %vm84_vm0, %v199_v60 }
  0x97   :  { %v126_v40 = vpop.f32.mrf.mxu0 }
  0x98   :  { %v170_v41 = vpop.f32.mrf.mxu1 }
  0x99   :  { %v171_v42 = vadd.f32 %v170_v41, %v126_v40  ;;  %v733_v40 = vld [vmem:[#allocation5 + $0x3e0] sm:$0xff]  ;;  %v734_v41 = vld [vmem:[#allocation5 + $0x3e8] sm:$0xff] }
  0x9a   :  { %867 = vmatpush.msra.mxu0 %v733_v40  ;;  %937 = vmatpush.msra.mxu2 %v734_v41  ;;  %v651_v40 = vld [vmem:[#allocation5 + $0x168] sm:$0xff]  ;;  %v652_v41 = vld [vmem:[#allocation5 + $0x170] sm:$0xff] }
  0x9c   :  { %v254_v44 = vpop.f32.mrf.mxu2 }
  0x9d   :  { %v278_v45 = vadd.f32 %v254_v44, %v171_v42  ;;  %v729_v42 = vld [vmem:[#allocation5 + $0x3c0] sm:$0xff]  ;;  %v731_v44 = vld [vmem:[#allocation5 + $0x3d0] sm:$0xff] }
  0x9e   :  { %798 = vmatpush.msrb.mxu3 %v729_v42  ;;  %938 = vmatpush.msra.mxu2 %v731_v44 }
  0x9f   :  { %v290_v46 = vadd.f32 %v3286_v43, %v278_v45  ;;  %v129_v47 = vpop.f32.mrf.mxu0  ;;  %v726_v45 = vld [vmem:[#allocation5 + $0x3a8] sm:$0xff] }
  0xa0   :  { %v173_v48 = vpop.f32.mrf.mxu1  ;;  %799 = vmatpush.msrb.mxu3 %v726_v45  ;;  %v648_v45 = vld [vmem:[#allocation5 + $0x150] sm:$0xff] }
  0xa1   :  { %v174_v49 = vadd.f32 %v173_v48, %v129_v47  ;;  %v298_v50 = vmax.f32 %v290_v46, 0.0  ;;  %v727_v46 = vld [vmem:[#allocation5 + $0x3b0] sm:$0xff]  ;;  %v728_v47 = vld [vmem:[#allocation5 + $0x3b8] sm:$0xff] }
  0xa2   :  { %v775_v48 = vld [vmem:[#allocation5 + $0x530] sm:$0xff]  ;;  %939 = vmatpush.msra.mxu2 %v728_v47 }
  0xa3   :  { %485 = vmatmul.f32.vlgmr.msrb.gmra.mxu1 %v298_v50  ;;  %523 = vmatmul.f32.vlgmr.msrb.gmra.mxu2 %v298_v50  ;;  %v724_v50 = vld [vmem:[#allocation5 + $0x398] sm:$0xff] }
  0xa4   :  { %v257_v51 = vpop.f32.mrf.mxu2  ;;  %904 = vmatpush.msra.mxu1 %v775_v48 }
  0xa5   :  { %v279_v52 = vadd.f32 %v257_v51, %v174_v49  ;;  %v723_v49 = vld [vmem:[#allocation5 + $0x390] sm:$0xff]  ;;  %v725_v51 = vld [vmem:[#allocation5 + $0x3a0] sm:$0xff] }
  0xa6   :  { %800 = vmatpush.msrb.mxu3 %v723_v49  ;;  %940 = vmatpush.msra.mxu2 %v725_v51  ;;  %v645_v49 = vld [vmem:[#allocation5 + $0x138] sm:$0xff] }
  0xa7   :  { %v291_v53 = vadd.f32 %v3286_v43, %v279_v52  ;;  %v132_v54 = vpop.f32.mrf.mxu0  ;;  %v772_v52 = vld [vmem:[#allocation5 + $0x518] sm:$0xff] }
  0xa8   :  { %v176_v55 = vpop.f32.mrf.mxu1  ;;  %905 = vmatpush.msra.mxu1 %v772_v52 }
  0xa9   :  { %v299_v56 = vmax.f32 %v291_v53, 0.0  ;;  %v177_v57 = vadd.f32 %v176_v55, %v132_v54  ;;  %v720_v53 = vld [vmem:[#allocation5 + $0x378] sm:$0xff]  ;;  %v721_v54 = vld [vmem:[#allocation5 + $0x380] sm:$0xff]  ;;  %v722_v55 = vld [vmem:[#allocation5 + $0x388] sm:$0xff] }
  0xaa   :  { %801 = vmatpush.msrb.mxu3 %v720_v53  ;;  %941 = vmatpush.msra.mxu2 %v722_v55  ;;  %v642_v53 = vld [vmem:[#allocation5 + $0x120] sm:$0xff] }
  0xab   :  { %409 = vmatmul.f32.vlgmr.msra.gmra.mxu3 %v299_v56  ;;  %447 = vmatmul.f32.vlgmr.msrb.gmra.mxu0 %v299_v56 }
  0xac   :  { %488 = vmatmul.f32.gmra.mxu1 %v299_v56  ;;  %526 = vmatmul.f32.gmra.mxu2 %v299_v56  ;;  %v260_v58 = vpop.f32.mrf.mxu2  ;;  %v769_v56 = vld [vmem:[#allocation5 + $0x500] sm:$0xff] }
  0xad   :  { %v280_v59 = vadd.f32 %v260_v58, %v177_v57  ;;  %v717_v57 = vld [vmem:[#allocation5 + $0x360] sm:$0xff]  ;;  %v718_v58 = vld [vmem:[#allocation5 + $0x368] sm:$0xff]  ;;  %906 = vmatpush.msra.mxu1 %v769_v56 }
  0xae   :  { %802 = vmatpush.msrb.mxu3 %v717_v57 }
  0xaf   :  { %v292_v60 = vadd.f32 %v3286_v43, %v280_v59  ;;  %v135_v61 = vpop.f32.mrf.mxu0  ;;  %v719_v59 = vld [vmem:[#allocation5 + $0x370] sm:$0xff] }
  0xb0   :  { %v179_v62 = vpop.f32.mrf.mxu1  ;;  %942 = vmatpush.msra.mxu2 %v719_v59  ;;  %v639_v59 = vld [vmem:[#allocation5 + $0x108] sm:$0xff] }
  0xb1   :  { %v300_v63 = vmax.f32 %v292_v60, 0.0  ;;  %v180_v0 = vadd.f32 %v179_v62, %v135_v61  ;;  %v766_v60 = vld [vmem:[#allocation5 + $0x4e8] sm:$0xff]  ;;  %v715_v62 = vld [vmem:[#allocation5 + $0x350] sm:$0xff] }
  0xb2   :  { %v714_v61 = vld [vmem:[#allocation5 + $0x348] sm:$0xff]  ;;  %907 = vmatpush.msra.mxu1 %v766_v60  ;;  %v640_v60 = vld [vmem:[#allocation5 + $0x110] sm:$0xff] }
  0xb3   :  { %412 = vmatmul.f32.gmra.mxu3 %v300_v63  ;;  %450 = vmatmul.f32.gmra.mxu0 %v300_v63 }
  0xb4   :  { %491 = vmatmul.f32.gmra.mxu1 %v300_v63  ;;  %529 = vmatmul.f32.gmra.mxu2 %v300_v63  ;;  %v263_v1 = vpop.f32.mrf.mxu2  ;;  %v716_v63 = vld [vmem:[#allocation5 + $0x358] sm:$0xff] }
  0xb5   :  { %v281_v2 = vadd.f32 %v263_v1, %v180_v0  ;;  %803 = vmatpush.msrb.mxu3 %v714_v61  ;;  %v763_v0 = vld [vmem:[#allocation5 + $0x4d0] sm:$0xff]  ;;  %943 = vmatpush.msra.mxu2 %v716_v63 }
  0xb6   :  { %v711_v1 = vld [vmem:[#allocation5 + $0x330] sm:$0xff]  ;;  %908 = vmatpush.msra.mxu1 %v763_v0  ;;  %v687_v0 = vld [vmem:[#allocation5 + $0x288] sm:$0xff] }
  0xb7   :  { %v293_v3 = vadd.f32 %v3286_v43, %v281_v2  ;;  %v138_v4 = vpop.f32.mrf.mxu0  ;;  %v712_v2 = vld [vmem:[#allocation5 + $0x338] sm:$0xff]  ;;  %804 = vmatpush.msrb.mxu3 %v711_v1  ;;  %v771_v1 = vld [vmem:[#allocation5 + $0x510] sm:$0xff] }
  0xb8   :  { %v182_v5 = vpop.f32.mrf.mxu1 }
  0xb9   :  { %v301_v6 = vmax.f32 %v293_v3, 0.0  ;;  %v183_v7 = vadd.f32 %v182_v5, %v138_v4  ;;  %v713_v3 = vld [vmem:[#allocation5 + $0x340] sm:$0xff]  ;;  %v760_v4 = vld [vmem:[#allocation5 + $0x4b8] sm:$0xff] }
  0xba   :  { %944 = vmatpush.msra.mxu2 %v713_v3  ;;  %v708_v5 = vld [vmem:[#allocation5 + $0x318] sm:$0xff]  ;;  %909 = vmatpush.msra.mxu1 %v760_v4 }
  0xbb   :  { %415 = vmatmul.f32.gmra.mxu3 %v301_v6  ;;  %453 = vmatmul.f32.gmra.mxu0 %v301_v6 }
  0xbc   :  { %494 = vmatmul.f32.gmra.mxu1 %v301_v6  ;;  %532 = vmatmul.f32.gmra.mxu2 %v301_v6  ;;  %v266_v8 = vpop.f32.mrf.mxu2  ;;  %v709_v6 = vld [vmem:[#allocation5 + $0x320] sm:$0xff] }
  0xbd   :  { %v282_v9 = vadd.f32 %v266_v8, %v183_v7  ;;  %805 = vmatpush.msrb.mxu3 %v708_v5  ;;  %v710_v7 = vld [vmem:[#allocation5 + $0x328] sm:$0xff]  ;;  %v757_v8 = vld [vmem:[#allocation5 + $0x4a0] sm:$0xff]  ;;  %v637_v5 = vld [vmem:[#allocation5 + $0xf8] sm:$0xff] }
  0xbe   :  { %945 = vmatpush.msra.mxu2 %v710_v7  ;;  %910 = vmatpush.msra.mxu1 %v757_v8  ;;  %v768_v7 = vld [vmem:[#allocation5 + $0x4f8] sm:$0xff] }
  0xbf   :  { %v294_v10 = vadd.f32 %v3286_v43, %v282_v9  ;;  %v141_v11 = vpop.f32.mrf.mxu0  ;;  %v705_v9 = vld [vmem:[#allocation5 + $0x300] sm:$0xff]  ;;  %v633_v8 = vld [vmem:[#allocation5 + $0xd8] sm:$0xff] }
  0xc0   :  { %v185_v12 = vpop.f32.mrf.mxu1  ;;  %806 = vmatpush.msrb.mxu3 %v705_v9 }
  0xc1   :  { %v302_v13 = vmax.f32 %v294_v10, 0.0  ;;  %v186_v14 = vadd.f32 %v185_v12, %v141_v11  ;;  %v706_v10 = vld [vmem:[#allocation5 + $0x308] sm:$0xff]  ;;  %v707_v11 = vld [vmem:[#allocation5 + $0x310] sm:$0xff] }
  0xc2   :  { %v754_v12 = vld [vmem:[#allocation5 + $0x488] sm:$0xff]  ;;  %946 = vmatpush.msra.mxu2 %v707_v11  ;;  %v634_v11 = vld [vmem:[#allocation5 + $0xe0] sm:$0xff] }
  0xc3   :  { %418 = vmatmul.f32.gmra.mxu3 %v302_v13  ;;  %456 = vmatmul.f32.gmra.mxu0 %v302_v13 }
  0xc4   :  { %497 = vmatmul.f32.gmra.mxu1 %v302_v13  ;;  %535 = vmatmul.f32.gmra.mxu2 %v302_v13  ;;  %v269_v15 = vpop.f32.mrf.mxu2  ;;  %v702_v13 = vld [vmem:[#allocation5 + $0x2e8] sm:$0xff] }
  0xc5   :  { %v283_v16 = vadd.f32 %v269_v15, %v186_v14  ;;  %v703_v14 = vld [vmem:[#allocation5 + $0x2f0] sm:$0xff]  ;;  %911 = vmatpush.msra.mxu1 %v754_v12  ;;  %807 = vmatpush.msrb.mxu3 %v702_v13  ;;  %v704_v15 = vld [vmem:[#allocation5 + $0x2f8] sm:$0xff]  ;;  %v765_v13 = vld [vmem:[#allocation5 + $0x4e0] sm:$0xff] }
  0xc6   :  { %947 = vmatpush.msra.mxu2 %v704_v15  ;;  %v681_v12 = vld [vmem:[#allocation5 + $0x258] sm:$0xff]  ;;  %v630_v15 = vld [vmem:[#allocation5 + $0xc0] sm:$0xff] }
  0xc7   :  { %v295_v17 = vadd.f32 %v3286_v43, %v283_v16  ;;  %v144_v18 = vpop.f32.mrf.mxu0  ;;  %v751_v16 = vld [vmem:[#allocation5 + $0x470] sm:$0xff] }
  0xc8   :  { %v188_v19 = vpop.f32.mrf.mxu1  ;;  %912 = vmatpush.msra.mxu1 %v751_v16  ;;  %v631_v16 = vld [vmem:[#allocation5 + $0xc8] sm:$0xff] }
  0xc9   :  { %v303_v20 = vmax.f32 %v295_v17, 0.0  ;;  %v189_v21 = vadd.f32 %v188_v19, %v144_v18  ;;  %v699_v17 = vld [vmem:[#allocation5 + $0x2d0] sm:$0xff]  ;;  %v700_v18 = vld [vmem:[#allocation5 + $0x2d8] sm:$0xff]  ;;  %v701_v19 = vld [vmem:[#allocation5 + $0x2e0] sm:$0xff] }
  0xca   :  { %808 = vmatpush.msrb.mxu3 %v699_v17  ;;  %948 = vmatpush.msra.mxu2 %v701_v19  ;;  %v678_v19 = vld [vmem:[#allocation5 + $0x240] sm:$0xff] }
  0xcb   :  { %421 = vmatmul.f32.gmra.mxu3 %v303_v20  ;;  %459 = vmatmul.f32.gmra.mxu0 %v303_v20 }
  0xcc   :  { %500 = vmatmul.f32.gmra.mxu1 %v303_v20  ;;  %538 = vmatmul.f32.gmra.mxu2 %v303_v20  ;;  %v272_v22 = vpop.f32.mrf.mxu2  ;;  %v748_v20 = vld [vmem:[#allocation5 + $0x458] sm:$0xff] }
  0xcd   :  { %v284_v23 = vadd.f32 %v272_v22, %v189_v21  ;;  %v696_v21 = vld [vmem:[#allocation5 + $0x2b8] sm:$0xff]  ;;  %v697_v22 = vld [vmem:[#allocation5 + $0x2c0] sm:$0xff]  ;;  %913 = vmatpush.msra.mxu1 %v748_v20  ;;  %v762_v20 = vld [vmem:[#allocation5 + $0x4c8] sm:$0xff] }
  0xce   :  { %809 = vmatpush.msrb.mxu3 %v696_v21 }
  0xcf   :  { %v296_v24 = vadd.f32 %v3286_v43, %v284_v23  ;;  %v147_v25 = vpop.f32.mrf.mxu0  ;;  %v698_v23 = vld [vmem:[#allocation5 + $0x2c8] sm:$0xff] }
  0xd0   :  { %v191_v26 = vpop.f32.mrf.mxu1  ;;  %949 = vmatpush.msra.mxu2 %v698_v23  ;;  %v627_v23 = vld [vmem:[#allocation5 + $0xa8] sm:$0xff] }
  0xd1   :  { %v304_v27 = vmax.f32 %v296_v24, 0.0  ;;  %v192_v28 = vadd.f32 %v191_v26, %v147_v25  ;;  %v745_v24 = vld [vmem:[#allocation5 + $0x440] sm:$0xff]  ;;  %v694_v26 = vld [vmem:[#allocation5 + $0x2a8] sm:$0xff] }
  0xd2   :  { %v693_v25 = vld [vmem:[#allocation5 + $0x2a0] sm:$0xff]  ;;  %914 = vmatpush.msra.mxu1 %v745_v24 }
  0xd3   :  { %424 = vmatmul.f32.gmra.mxu3 %v304_v27  ;;  %462 = vmatmul.f32.gmra.mxu0 %v304_v27 }
  0xd4   :  { %503 = vmatmul.f32.gmra.mxu1 %v304_v27  ;;  %541 = vmatmul.f32.gmra.mxu2 %v304_v27  ;;  %v275_v29 = vpop.f32.mrf.mxu2  ;;  %v695_v27 = vld [vmem:[#allocation5 + $0x2b0] sm:$0xff] }
  0xd5   :  { %v285_v30 = vadd.f32 %v275_v29, %v192_v28  ;;  %810 = vmatpush.msrb.mxu3 %v693_v25  ;;  %v742_v28 = vld [vmem:[#allocation5 + $0x428] sm:$0xff]  ;;  %950 = vmatpush.msra.mxu2 %v695_v27  ;;  %v628_v27 = vld [vmem:[#allocation5 + $0xb0] sm:$0xff] }
  0xd6   :  { %915 = vmatpush.msra.mxu1 %v742_v28  ;;  %v759_v28 = vld [vmem:[#allocation5 + $0x4b0] sm:$0xff] }
  0xd7   :  { %v297_v31 = vadd.f32 %v3286_v43, %v285_v30  ;;  %v730_v43 = vld [vmem:[#allocation5 + $0x3c8] sm:$0xff]  ;;  %v545_v30 = vld [vmem:[%s5520_s4] sm:$0x3]  ;;  %1078 = vmatpush.msrb.mxu2 %v652_v41  ;;  %v756_v41 = vld [vmem:[#allocation5 + $0x498] sm:$0xff] }
  0xd8   :  { %868 = vmatpush.msra.mxu0 %v730_v43  ;;  %v3302_v38 = vperm.slane %v545_v30, 0  ;;  %1047 = vmatpush.msrb.mxu1 %v687_v0  ;;  %v654_v0 = vld [vmem:[#allocation5 + $0x180] sm:$0xff] }
  0xd9   :  { %v305_v32 = vmax.f32 %v297_v31, 0.0 }
  0xda   :  { %869 = vmatpush.msra.mxu0 %v727_v46  ;;  %v649_v46 = vld [vmem:[#allocation5 + $0x158] sm:$0xff] }
  0xdb   :  { %427 = vmatmul.f32.gmra.mxu3 %v305_v32  ;;  %465 = vmatmul.f32.gmra.mxu0 %v305_v32  ;;  %v3299_v32 = vperm.slane %v545_v30, 1 }
  0xdc   :  { %870 = vmatpush.msra.mxu0 %v724_v50  ;;  %1079 = vmatpush.msrb.mxu2 %v649_v46  ;;  %v646_v50 = vld [vmem:[#allocation5 + $0x140] sm:$0xff] }
  0xde   :  { %871 = vmatpush.msra.mxu0 %v721_v54  ;;  %1080 = vmatpush.msrb.mxu2 %v646_v50  ;;  %v643_v54 = vld [vmem:[#allocation5 + $0x128] sm:$0xff] }
  0xe0   :  { %872 = vmatpush.msra.mxu0 %v718_v58  ;;  %1081 = vmatpush.msrb.mxu2 %v643_v54  ;;  %v774_v58 = vld [vmem:[#allocation5 + $0x528] sm:$0xff] }
  0xe1   :  { %834 = vmatpush.msra.mxu3 %v774_v58 }
  0xe2   :  { %873 = vmatpush.msra.mxu0 %v715_v62  ;;  %1082 = vmatpush.msrb.mxu2 %v640_v60 }
  0xe3   :  { %835 = vmatpush.msra.mxu3 %v771_v1  ;;  %v616_v1 = vld [vmem:[#allocation5 + $0x50] sm:$0xff] }
  0xe4   :  { %874 = vmatpush.msra.mxu0 %v712_v2  ;;  %v636_v2 = vld [vmem:[#allocation5 + $0xf0] sm:$0xff]  ;;  %1083 = vmatpush.msrb.mxu2 %v637_v5 }
  0xe5   :  { %836 = vmatpush.msra.mxu3 %v768_v7  ;;  %v612_v5 = vld [vmem:[#allocation5 + $0x30] sm:$0xff] }
  0xe6   :  { %875 = vmatpush.msra.mxu0 %v709_v6  ;;  %v684_v6 = vld [vmem:[#allocation5 + $0x270] sm:$0xff]  ;;  %1084 = vmatpush.msrb.mxu2 %v634_v11  ;;  %v744_v11 = vld [vmem:[#allocation5 + $0x438] sm:$0xff] }
  0xe7   :  { %1048 = vmatpush.msrb.mxu1 %v684_v6  ;;  %837 = vmatpush.msra.mxu3 %v765_v13 }
  0xe8   :  { %876 = vmatpush.msra.mxu0 %v706_v10  ;;  %1085 = vmatpush.msrb.mxu2 %v631_v16 }
  0xe9   :  { %1049 = vmatpush.msrb.mxu1 %v681_v12  ;;  %838 = vmatpush.msra.mxu3 %v762_v20  ;;  %v609_v12 = vld [vmem:[#allocation5 + $0x18] sm:$0xff] }
  0xea   :  { %877 = vmatpush.msra.mxu0 %v703_v14  ;;  %1086 = vmatpush.msrb.mxu2 %v628_v27 }
  0xeb   :  { %1050 = vmatpush.msrb.mxu1 %v678_v19  ;;  %839 = vmatpush.msra.mxu3 %v759_v28  ;;  %v741_v19 = vld [vmem:[#allocation5 + $0x420] sm:$0xff] }
  0xec   :  { %878 = vmatpush.msra.mxu0 %v700_v18 }
  0xed   :  { %840 = vmatpush.msra.mxu3 %v756_v41 }
  0xee   :  { %879 = vmatpush.msra.mxu0 %v697_v22 }
  0xf0   :  { %880 = vmatpush.msra.mxu0 %v694_v26  ;;  %v675_v26 = vld [vmem:[#allocation5 + $0x228] sm:$0xff] }
  0xf1   :  { %1051 = vmatpush.msrb.mxu1 %v675_v26 }
  0xf2   :  { %1008 = vmatpush.msrb.mxu0 %v651_v40  ;;  %v666_v40 = vld [vmem:[#allocation5 + $0x1e0] sm:$0xff] }
  0xf4   :  { %1009 = vmatpush.msrb.mxu0 %v648_v45  ;;  %v622_v45 = vld [vmem:[#allocation5 + $0x80] sm:$0xff] }
  0xf6   :  { %1010 = vmatpush.msrb.mxu0 %v645_v49  ;;  %v753_v49 = vld [vmem:[#allocation5 + $0x480] sm:$0xff] }
  0xf7   :  { %841 = vmatpush.msra.mxu3 %v753_v49  ;;  %v641_v49 = vld [vmem:[#allocation5 + $0x118] sm:$0xff] }
  0xf8   :  { %1011 = vmatpush.msrb.mxu0 %v642_v53  ;;  %v619_v53 = vld [vmem:[#allocation5 + $0x68] sm:$0xff] }
  0xfa   :  { %1012 = vmatpush.msrb.mxu0 %v639_v59 }
  0xfc   :  { %1013 = vmatpush.msrb.mxu0 %v636_v2 }
  0xfe   :  { %1014 = vmatpush.msrb.mxu0 %v633_v8  ;;  %v613_v8 = vld [vmem:[#allocation5 + $0x38] sm:$0xff] }
 0x100   :  { %1015 = vmatpush.msrb.mxu0 %v630_v15  ;;  %v610_v15 = vld [vmem:[#allocation5 + $0x20] sm:$0xff] }
 0x102   :  { %1016 = vmatpush.msrb.mxu0 %v627_v23  ;;  %v607_v23 = vld [vmem:[#allocation5 + $0x8] sm:$0xff] }
 0x120   :  { %v486_v29 = vpop.f32.mrf.mxu1 }
 0x126   :  { %v524_v31 = vpop.f32.mrf.mxu2 }
 0x128   :  { %v448_v33 = vpop.f32.mrf.mxu0 }
 0x129   :  { %v525_v34 = vadd.f32 %v524_v31, %v448_v33  ;;  %v489_v36 = vpop.f32.mrf.mxu1  ;;  %v624_v31 = vld [vmem:[#allocation5 + $0x90] sm:$0xff] }
 0x12a   :  { %v672_v33 = vld [vmem:[#allocation5 + $0x210] sm:$0xff]  ;;  %1017 = vmatpush.msrb.mxu0 %v624_v31 }
 0x12b   :  { %v552_v35 = vadd.f32 %v3299_v32, %v525_v34  ;;  %1052 = vmatpush.msrb.mxu1 %v672_v33 }
 0x12d   :  { %v566_v37 = vmax.f32 %v552_v35, 0.0 }
 0x12e   :  { %v410_v39 = vpop.f32.mrf.mxu3 }
 0x12f   :  { %581 = vst.msk [vmem:[#allocation3 + $0x8] sm:$0xff] %vm580_vm1, %v566_v37  ;;  %v487_v42 = vadd.f32 %v486_v29, %v410_v39  ;;  %v527_v43 = vpop.f32.mrf.mxu2  ;;  %v625_v37 = vld [vmem:[#allocation5 + $0x98] sm:$0xff] }
 0x130   :  { %v451_v44 = vpop.f32.mrf.mxu0  ;;  %1087 = vmatpush.msrb.mxu2 %v625_v37 }
 0x131   :  { %v551_v47 = vadd.f32 %v3302_v38, %v487_v42  ;;  %v528_v48 = vadd.f32 %v527_v43, %v451_v44  ;;  %v492_v56 = vpop.f32.mrf.mxu1  ;;  %v621_v44 = vld [vmem:[#allocation5 + $0x78] sm:$0xff] }
 0x132   :  { %1018 = vmatpush.msrb.mxu0 %v621_v44  ;;  %1088 = vmatpush.msrb.mxu2 %v622_v45  ;;  %v647_v44 = vld [vmem:[#allocation5 + $0x148] sm:$0xff] }
 0x133   :  { %v3306_v51 = vmax.f32 %v551_v47, 0.0  ;;  %v554_v52 = vadd.f32 %v3299_v32, %v528_v48  ;;  %v663_v48 = vld [vmem:[#allocation5 + $0x1c8] sm:$0xff] }
 0x134   :  { %1089 = vmatpush.msrb.mxu2 %v619_v53  ;;  %v638_v53 = vld [vmem:[#allocation5 + $0x100] sm:$0xff] }
 0x135   :  { %v568_v55 = vmax.f32 %v554_v52, 0.0  ;;  %v618_v52 = vld [vmem:[#allocation5 + $0x60] sm:$0xff] }
 0x136   :  { %v413_v57 = vpop.f32.mrf.mxu3  ;;  %1019 = vmatpush.msrb.mxu0 %v618_v52  ;;  %1090 = vmatpush.msrb.mxu2 %v616_v1  ;;  %v686_v52 = vld [vmem:[#allocation5 + $0x280] sm:$0xff]  ;;  %v629_v1 = vld [vmem:[#allocation5 + $0xb8] sm:$0xff] }
 0x137   :  { %583 = vst.msk [vmem:[#allocation3 + $0x18] sm:$0xff] %vm580_vm1, %v568_v55  ;;  %v490_v61 = vadd.f32 %v489_v36, %v413_v57  ;;  %v530_v62 = vpop.f32.mrf.mxu2  ;;  %v669_v36 = vld [vmem:[#allocation5 + $0x1f8] sm:$0xff]  ;;  %v750_v57 = vld [vmem:[#allocation5 + $0x468] sm:$0xff] }
 0x138   :  { %v454_v63 = vpop.f32.mrf.mxu0  ;;  %1053 = vmatpush.msrb.mxu1 %v669_v36  ;;  %842 = vmatpush.msra.mxu3 %v750_v57  ;;  %v680_v57 = vld [vmem:[#allocation5 + $0x250] sm:$0xff] }
 0x139   :  { %v553_v3 = vadd.f32 %v3302_v38, %v490_v61  ;;  %v531_v4 = vadd.f32 %v530_v62, %v454_v63  ;;  %v495_v24 = vpop.f32.mrf.mxu1  ;;  %v657_v61 = vld [vmem:[#allocation5 + $0x198] sm:$0xff]  ;;  %v615_v62 = vld [vmem:[#allocation5 + $0x48] sm:$0xff]  ;;  %1091 = vmatpush.msrb.mxu2 %v613_v8 }
 0x13a   :  { %1054 = vmatpush.msrb.mxu1 %v666_v40  ;;  %1020 = vmatpush.msrb.mxu0 %v615_v62  ;;  %v653_v40 = vld [vmem:[#allocation5 + $0x178] sm:$0xff]  ;;  %v623_v8 = vld [vmem:[#allocation5 + $0x88] sm:$0xff] }
 0x13b   :  { %v3311_v9 = vmax.f32 %v553_v3, 0.0  ;;  %v556_v10 = vadd.f32 %v3299_v32, %v531_v4  ;;  %v747_v4 = vld [vmem:[#allocation5 + $0x450] sm:$0xff]  ;;  %1092 = vmatpush.msrb.mxu2 %v610_v15  ;;  %v764_v62 = vld [vmem:[#allocation5 + $0x4d8] sm:$0xff]  ;;  %v659_v15 = vld [vmem:[#allocation5 + $0x1a8] sm:$0xff] }
 0x13c   :  { %1055 = vmatpush.msrb.mxu1 %v663_v48  ;;  %843 = vmatpush.msra.mxu3 %v747_v4  ;;  %v776_v48 = vld [vmem:[#allocation5 + $0x538] sm:$0xff]  ;;  %v671_v4 = vld [vmem:[#allocation5 + $0x208] sm:$0xff] }
 0x13d   :  { %v570_v14 = vmax.f32 %v556_v10, 0.0  ;;  %811 = vmatmul.f32.vlgmr.msrb.gmra.mxu3 %v3311_v9  ;;  %881 = vmatmul.f32.vlgmr.msra.gmra.mxu0 %v3311_v9 }
 0x13e   :  { %v416_v17 = vpop.f32.mrf.mxu3  ;;  %v3316_v18 = vld [vmem:[#allocation3 + $0x18] sm:$0xff]  ;;  %951 = vmatmul.f32.vlgmr.msra.gmra.mxu2 %v3311_v9  ;;  %1021 = vmatpush.msrb.mxu0 %v612_v5  ;;  %v626_v5 = vld [vmem:[#allocation5 + $0xa0] sm:$0xff] }
 0x13f   :  { %585 = vst.msk [vmem:[#allocation3 + $0x28] sm:$0xff] %vm580_vm1, %v570_v14  ;;  %v493_v21 = vadd.f32 %v492_v56, %v416_v17  ;;  %v533_v22 = vpop.f32.mrf.mxu2  ;;  %2806 = vmatmul.msk.f32.vlgmr.msra.gmra.mxu1 %vm580_vm1, %v3316_v18  ;;  %v660_v56 = vld [vmem:[#allocation5 + $0x1b0] sm:$0xff]  ;;  %844 = vmatpush.msra.mxu3 %v744_v11  ;;  %v665_v11 = vld [vmem:[#allocation5 + $0x1d8] sm:$0xff] }
 0x140   :  { %v457_v25 = vpop.f32.mrf.mxu0  ;;  %1056 = vmatpush.msrb.mxu1 %v660_v56  ;;  %1022 = vmatpush.msrb.mxu0 %v609_v12  ;;  %v635_v56 = vld [vmem:[#allocation5 + $0xe8] sm:$0xff]  ;;  %v662_v12 = vld [vmem:[#allocation5 + $0x1c0] sm:$0xff] }
 0x141   :  { %v555_v29 = vadd.f32 %v3302_v38, %v493_v21  ;;  %v534_v30 = vadd.f32 %v533_v22, %v457_v25  ;;  %v498_v58 = vpop.f32.mrf.mxu1  ;;  %v606_v21 = vld [vmem:[#allocation5] sm:$0xff]  ;;  %845 = vmatpush.msra.mxu3 %v741_v19  ;;  %1093 = vmatpush.msrb.mxu2 %v607_v23  ;;  %v656_v19 = vld [vmem:[#allocation5 + $0x190] sm:$0xff]  ;;  %v611_v23 = vld [vmem:[#allocation5 + $0x28] sm:$0xff] }
 0x142   :  { %1057 = vmatpush.msrb.mxu1 %v657_v61  ;;  %1023 = vmatpush.msrb.mxu0 %v606_v21  ;;  %v3378_v61 = vld [vmem:[#allocation3 + $0x8] sm:$0xff]  ;;  %v614_v21 = vld [vmem:[#allocation5 + $0x40] sm:$0xff] }
 0x143   :  { %v3323_v34 = vmax.f32 %v555_v29, 0.0  ;;  %v558_v35 = vadd.f32 %v3299_v32, %v534_v30  ;;  %974 = vmatpush.msrb.mxu3 %v776_v48  ;;  %v1411_v48 = vld [vmem:[%s5523_s7 + $0x3e8] sm:$0xff] }
 0x144   :  { %1058 = vmatpush.msrb.mxu1 %v654_v0  ;;  %1148 = vmatpush.msra.mxu0 %v653_v40  ;;  %v674_v0 = vld [vmem:[#allocation5 + $0x220] sm:$0xff]  ;;  %v664_v40 = vld [vmem:[#allocation5 + $0x1d0] sm:$0xff] }
 0x145   :  { %v572_v39 = vmax.f32 %v558_v35, 0.0  ;;  %814 = vmatmul.f32.gmra.mxu3 %v3323_v34  ;;  %884 = vmatmul.f32.gmra.mxu0 %v3323_v34 }
 0x146   :  { %v419_v42 = vpop.f32.mrf.mxu3  ;;  %v3328_v43 = vld [vmem:[#allocation3 + $0x28] sm:$0xff]  ;;  %954 = vmatmul.f32.gmra.mxu2 %v3323_v34 }
 0x147   :  { %587 = vst.msk [vmem:[#allocation3 + $0x38] sm:$0xff] %vm580_vm1, %v572_v39  ;;  %v496_v46 = vadd.f32 %v495_v24, %v419_v42  ;;  %v536_v47 = vpop.f32.mrf.mxu2  ;;  %2807 = vmatmul.msk.f32.gmra.mxu1 %vm580_vm1, %v3328_v43 }
 0x148   :  { %v460_v50 = vpop.f32.mrf.mxu0 }
 0x149   :  { %v557_v54 = vadd.f32 %v3302_v38, %v496_v46  ;;  %v537_v55 = vadd.f32 %v536_v47, %v460_v50  ;;  %v501_v20 = vpop.f32.mrf.mxu1  ;;  %v644_v46 = vld [vmem:[#allocation5 + $0x130] sm:$0xff]  ;;  %v689_v50 = vld [vmem:[#allocation5 + $0x298] sm:$0xff] }
 0x14a   :  { %1187 = vmatpush.msra.mxu1 %v689_v50 }
 0x14b   :  { %v3335_v59 = vmax.f32 %v557_v54, 0.0  ;;  %v560_v60 = vadd.f32 %v3299_v32, %v537_v55  ;;  %v683_v54 = vld [vmem:[#allocation5 + $0x268] sm:$0xff] }
 0x14c   :  { %1188 = vmatpush.msra.mxu1 %v686_v52  ;;  %v770_v55 = vld [vmem:[#allocation5 + $0x508] sm:$0xff]  ;;  %v1406_v52 = vld [vmem:[%s5523_s7 + $0x3c0] sm:$0xff] }
 0x14d   :  { %v574_v63 = vmax.f32 %v560_v60, 0.0  ;;  %817 = vmatmul.f32.gmra.mxu3 %v3335_v59  ;;  %887 = vmatmul.f32.gmra.mxu0 %v3335_v59  ;;  %v632_v60 = vld [vmem:[#allocation5 + $0xd0] sm:$0xff] }
 0x14e   :  { %v422_v2 = vpop.f32.mrf.mxu3  ;;  %v3340_v3 = vld [vmem:[#allocation3 + $0x38] sm:$0xff]  ;;  %957 = vmatmul.f32.gmra.mxu2 %v3335_v59  ;;  %1189 = vmatpush.msra.mxu1 %v683_v54  ;;  %v1404_v54 = vld [vmem:[%s5523_s7 + $0x3b0] sm:$0xff] }
 0x14f   :  { %589 = vst.msk [vmem:[#allocation3 + $0x48] sm:$0xff] %vm580_vm1, %v574_v63  ;;  %v499_v6 = vadd.f32 %v498_v58, %v422_v2  ;;  %v539_v7 = vpop.f32.mrf.mxu2  ;;  %2808 = vmatmul.msk.f32.gmra.mxu1 %vm580_vm1, %v3340_v3  ;;  %v767_v58 = vld [vmem:[#allocation5 + $0x4f0] sm:$0xff]  ;;  %v677_v63 = vld [vmem:[#allocation5 + $0x238] sm:$0xff]  ;;  %v761_v2 = vld [vmem:[#allocation5 + $0x4c0] sm:$0xff] }
 0x150   :  { %v463_v10 = vpop.f32.mrf.mxu0  ;;  %1190 = vmatpush.msra.mxu1 %v680_v57  ;;  %v1403_v57 = vld [vmem:[%s5523_s7 + $0x3a8] sm:$0xff] }
 0x151   :  { %v559_v13 = vadd.f32 %v3302_v38, %v499_v6  ;;  %v540_v14 = vadd.f32 %v539_v7, %v463_v10  ;;  %v504_v36 = vpop.f32.mrf.mxu1  ;;  %v668_v6 = vld [vmem:[#allocation5 + $0x1f0] sm:$0xff]  ;;  %v758_v7 = vld [vmem:[#allocation5 + $0x4a8] sm:$0xff] }
 0x152   :  { %1191 = vmatpush.msra.mxu1 %v677_v63  ;;  %v755_v10 = vld [vmem:[#allocation5 + $0x490] sm:$0xff] }
 0x153   :  { %v3347_v16 = vmax.f32 %v559_v13, 0.0  ;;  %v562_v17 = vadd.f32 %v3299_v32, %v540_v14  ;;  %v620_v13 = vld [vmem:[#allocation5 + $0x70] sm:$0xff]  ;;  %v752_v14 = vld [vmem:[#allocation5 + $0x478] sm:$0xff] }
 0x154   :  { %1192 = vmatpush.msra.mxu1 %v674_v0  ;;  %v1398_v63 = vld [vmem:[%s5523_s7 + $0x380] sm:$0xff]  ;;  %v1399_v0 = vld [vmem:[%s5523_s7 + $0x388] sm:$0xff] }
 0x155   :  { %v576_v22 = vmax.f32 %v562_v17, 0.0  ;;  %820 = vmatmul.f32.gmra.mxu3 %v3347_v16  ;;  %890 = vmatmul.f32.gmra.mxu0 %v3347_v16  ;;  %v617_v17 = vld [vmem:[#allocation5 + $0x58] sm:$0xff] }
 0x156   :  { %v425_v24 = vpop.f32.mrf.mxu3  ;;  %v3352_v25 = vld [vmem:[#allocation3 + $0x48] sm:$0xff]  ;;  %960 = vmatmul.f32.gmra.mxu2 %v3347_v16  ;;  %1193 = vmatpush.msra.mxu1 %v671_v4  ;;  %v1397_v4 = vld [vmem:[%s5523_s7 + $0x378] sm:$0xff] }
 0x157   :  { %591 = vst.msk [vmem:[#allocation3 + $0x58] sm:$0xff] %vm580_vm1, %v576_v22  ;;  %v502_v26 = vadd.f32 %v501_v20, %v425_v24  ;;  %2809 = vmatmul.msk.f32.gmra.mxu1 %vm580_vm1, %v3352_v25  ;;  %v542_v27 = vpop.f32.mrf.mxu2  ;;  %v749_v20 = vld [vmem:[#allocation5 + $0x460] sm:$0xff]  ;;  %v746_v22 = vld [vmem:[#allocation5 + $0x448] sm:$0xff]  ;;  %v743_v24 = vld [vmem:[#allocation5 + $0x430] sm:$0xff] }
 0x158   :  { %v466_v28 = vpop.f32.mrf.mxu0  ;;  %1194 = vmatpush.msra.mxu1 %v668_v6  ;;  %v1476_v6 = vld [vmem:[%s5523_s7 + $0x5f0] sm:$0xff] }
 0x159   :  { %v561_v29 = vadd.f32 %v3302_v38, %v502_v26  ;;  %v543_v30 = vadd.f32 %v542_v27, %v466_v28  ;;  %v608_v26 = vld [vmem:[#allocation5 + $0x10] sm:$0xff]  ;;  %v685_v28 = vld [vmem:[#allocation5 + $0x278] sm:$0xff] }
 0x15a   :  { %1195 = vmatpush.msra.mxu1 %v665_v11  ;;  %v688_v27 = vld [vmem:[#allocation5 + $0x290] sm:$0xff]  ;;  %v1392_v11 = vld [vmem:[%s5523_s7 + $0x350] sm:$0xff] }
 0x15b   :  { %v3359_v31 = vmax.f32 %v561_v29, 0.0  ;;  %v564_v33 = vadd.f32 %v3299_v32, %v543_v30  ;;  %v650_v32 = vld [vmem:[#allocation5 + $0x160] sm:$0xff]  ;;  %v679_v30 = vld [vmem:[#allocation5 + $0x248] sm:$0xff] }
 0x15c   :  { %1149 = vmatpush.msra.mxu0 %v650_v32  ;;  %1196 = vmatpush.msra.mxu1 %v662_v12  ;;  %v682_v29 = vld [vmem:[#allocation5 + $0x260] sm:$0xff]  ;;  %v655_v32 = vld [vmem:[#allocation5 + $0x188] sm:$0xff] }
 0x15d   :  { %v578_v35 = vmax.f32 %v564_v33, 0.0  ;;  %823 = vmatmul.f32.gmra.mxu3 %v3359_v31  ;;  %893 = vmatmul.f32.gmra.mxu0 %v3359_v31  ;;  %v676_v33 = vld [vmem:[#allocation5 + $0x230] sm:$0xff]  ;;  %v1393_v12 = vld [vmem:[%s5523_s7 + $0x358] sm:$0xff] }
 0x15e   :  { %v428_v37 = vpop.f32.mrf.mxu3  ;;  %v3364_v39 = vld [vmem:[#allocation3 + $0x58] sm:$0xff]  ;;  %963 = vmatmul.f32.gmra.mxu2 %v3359_v31  ;;  %1150 = vmatpush.msra.mxu0 %v647_v44 }
 0x15f   :  { %593 = vst.msk [vmem:[#allocation3 + $0x68] sm:$0xff] %vm580_vm1, %v578_v35  ;;  %v505_v41 = vadd.f32 %v504_v36, %v428_v37  ;;  %2810 = vmatmul.msk.f32.gmra.mxu1 %vm580_vm1, %v3364_v39  ;;  %v673_v35 = vld [vmem:[#allocation5 + $0x218] sm:$0xff]  ;;  %v670_v36 = vld [vmem:[#allocation5 + $0x200] sm:$0xff]  ;;  %v667_v37 = vld [vmem:[#allocation5 + $0x1e8] sm:$0xff] }
 0x160   :  { %1151 = vmatpush.msra.mxu0 %v644_v46  ;;  %1197 = vmatpush.msra.mxu1 %v659_v15  ;;  %v1413_v46 = vld [vmem:[%s5523_s7 + $0x3f8] sm:$0xff]  ;;  %v1390_v15 = vld [vmem:[%s5523_s7 + $0x340] sm:$0xff] }
 0x161   :  { %v563_v42 = vadd.f32 %v3302_v38, %v505_v41  ;;  %v773_v38 = vld [vmem:[#allocation5 + $0x520] sm:$0xff] }
 0x162   :  { %1152 = vmatpush.msra.mxu0 %v641_v49  ;;  %975 = vmatpush.msrb.mxu3 %v773_v38  ;;  %v658_v41 = vld [vmem:[#allocation5 + $0x1a0] sm:$0xff]  ;;  %v1407_v38 = vld [vmem:[%s5523_s7 + $0x3c8] sm:$0xff] }
 0x163   :  { %v577_v45 = vmax.f32 %v563_v42, 0.0  ;;  %1198 = vmatpush.msra.mxu1 %v656_v19  ;;  %v1470_v19 = vld [vmem:[%s5523_s7 + $0x5c0] sm:$0xff] }
 0x164   :  { %1153 = vmatpush.msra.mxu0 %v638_v53  ;;  %976 = vmatpush.msrb.mxu3 %v770_v55  ;;  %v1405_v55 = vld [vmem:[%s5523_s7 + $0x3b8] sm:$0xff] }
 0x165   :  { %826 = vmatmul.f32.gmra.mxu3 %v577_v45  ;;  %896 = vmatmul.f32.gmra.mxu0 %v577_v45 }
 0x166   :  { %v3371_v47 = vld [vmem:[#allocation3 + $0x68] sm:$0xff]  ;;  %966 = vmatmul.f32.gmra.mxu2 %v577_v45  ;;  %1154 = vmatpush.msra.mxu0 %v635_v56  ;;  %v1412_v45 = vld [vmem:[%s5523_s7 + $0x3f0] sm:$0xff]  ;;  %v1402_v56 = vld [vmem:[%s5523_s7 + $0x3a0] sm:$0xff] }
 0x167   :  { %2811 = vmatmul.msk.f32.gmra.mxu1 %vm580_vm1, %v3371_v47  ;;  %977 = vmatpush.msrb.mxu3 %v767_v58 }
 0x168   :  { %1155 = vmatpush.msra.mxu0 %v632_v60  ;;  %1478 = vmatpush.msra.mxu2 %v1412_v45  ;;  %v1400_v60 = vld [vmem:[%s5523_s7 + $0x390] sm:$0xff]  ;;  %v1458_v45 = vld [vmem:[%s5523_s7 + $0x560] sm:$0xff] }
 0x169   :  { %978 = vmatpush.msrb.mxu3 %v764_v62 }
 0x16a   :  { %1156 = vmatpush.msra.mxu0 %v629_v1 }
 0x16b   :  { %979 = vmatpush.msrb.mxu3 %v761_v2  ;;  %v1396_v2 = vld [vmem:[%s5523_s7 + $0x370] sm:$0xff] }
 0x16c   :  { %1157 = vmatpush.msra.mxu0 %v626_v5 }
 0x16d   :  { %2800 = vmatmul.msk.f32.vlgmr.msra.gmra.mxu3 %vm580_vm1, %v3316_v18  ;;  %1024 = vmatmul.f32.vlgmr.msrb.gmra.mxu0 %v3306_v51 }
 0x16e   :  { %1094 = vmatmul.f32.vlgmr.msrb.gmra.mxu2 %v3306_v51  ;;  %980 = vmatpush.msrb.mxu3 %v758_v7  ;;  %v1394_v7 = vld [vmem:[%s5523_s7 + $0x360] sm:$0xff] }
 0x16f   :  { %2818 = vmatmul.msk.f32.vlgmr.msrb.gmra.mxu1 %vm580_vm1, %v3378_v61  ;;  %1158 = vmatpush.msra.mxu0 %v623_v8  ;;  %v1395_v8 = vld [vmem:[%s5523_s7 + $0x368] sm:$0xff] }
 0x170   :  { %981 = vmatpush.msrb.mxu3 %v755_v10  ;;  %v1474_v10 = vld [vmem:[%s5523_s7 + $0x5e0] sm:$0xff] }
 0x171   :  { %1159 = vmatpush.msra.mxu0 %v620_v13  ;;  %v1472_v13 = vld [vmem:[%s5523_s7 + $0x5d0] sm:$0xff] }
 0x172   :  { %982 = vmatpush.msrb.mxu3 %v752_v14 }
 0x173   :  { %1160 = vmatpush.msra.mxu0 %v617_v17  ;;  %v1391_v17 = vld [vmem:[%s5523_s7 + $0x348] sm:$0xff] }
 0x174   :  { %983 = vmatpush.msrb.mxu3 %v749_v20 }
 0x175   :  { %2801 = vmatmul.msk.f32.gmra.mxu3 %vm580_vm1, %v3328_v43  ;;  %1027 = vmatmul.f32.gmra.mxu0 %v3311_v9 }
 0x176   :  { %1097 = vmatmul.f32.gmra.mxu2 %v3311_v9  ;;  %1161 = vmatpush.msra.mxu0 %v614_v21  ;;  %v1388_v21 = vld [vmem:[%s5523_s7 + $0x330] sm:$0xff] }
 0x177   :  { %2819 = vmatmul.msk.f32.gmra.mxu1 %vm580_vm1, %v3316_v18  ;;  %984 = vmatpush.msrb.mxu3 %v746_v22  ;;  %v1389_v22 = vld [vmem:[%s5523_s7 + $0x338] sm:$0xff] }
 0x178   :  { %1162 = vmatpush.msra.mxu0 %v611_v23 }
 0x179   :  { %985 = vmatpush.msrb.mxu3 %v743_v24  ;;  %v1468_v24 = vld [vmem:[%s5523_s7 + $0x5b0] sm:$0xff] }
 0x17a   :  { %1163 = vmatpush.msra.mxu0 %v608_v26  ;;  %v1386_v26 = vld [vmem:[%s5523_s7 + $0x320] sm:$0xff] }
 0x17b   :  { %1117 = vmatpush.msra.mxu3 %v688_v27  ;;  %v1387_v27 = vld [vmem:[%s5523_s7 + $0x328] sm:$0xff] }
 0x17c   :  { %1538 = vmatpush.msrb.mxu0 %v1413_v46 }
 0x17d   :  { %2802 = vmatmul.msk.f32.gmra.mxu3 %vm580_vm1, %v3340_v3  ;;  %1030 = vmatmul.f32.gmra.mxu0 %v3323_v34 }
 0x17e   :  { %1100 = vmatmul.f32.gmra.mxu2 %v3323_v34  ;;  %1118 = vmatpush.msra.mxu3 %v685_v28  ;;  %v1466_v28 = vld [vmem:[%s5523_s7 + $0x5a0] sm:$0xff] }
 0x17f   :  { %2820 = vmatmul.msk.f32.gmra.mxu1 %vm580_vm1, %v3328_v43  ;;  %1539 = vmatpush.msrb.mxu0 %v1411_v48 }
 0x180   :  { %1119 = vmatpush.msra.mxu3 %v682_v29  ;;  %v1384_v29 = vld [vmem:[%s5523_s7 + $0x310] sm:$0xff] }
 0x182   :  { %1120 = vmatpush.msra.mxu3 %v679_v30  ;;  %v1385_v30 = vld [vmem:[%s5523_s7 + $0x318] sm:$0xff] }
 0x184   :  { %1121 = vmatpush.msra.mxu3 %v676_v33  ;;  %v1464_v33 = vld [vmem:[%s5523_s7 + $0x590] sm:$0xff] }
 0x185   :  { %2803 = vmatmul.msk.f32.gmra.mxu3 %vm580_vm1, %v3352_v25  ;;  %1033 = vmatmul.f32.gmra.mxu0 %v3335_v59 }
 0x186   :  { %1103 = vmatmul.f32.gmra.mxu2 %v3335_v59  ;;  %1122 = vmatpush.msra.mxu3 %v673_v35 }
 0x187   :  { %2821 = vmatmul.msk.f32.gmra.mxu1 %vm580_vm1, %v3340_v3 }
 0x188   :  { %1123 = vmatpush.msra.mxu3 %v670_v36  ;;  %v1382_v36 = vld [vmem:[%s5523_s7 + $0x300] sm:$0xff] }
 0x18a   :  { %1124 = vmatpush.msra.mxu3 %v667_v37  ;;  %v1383_v37 = vld [vmem:[%s5523_s7 + $0x308] sm:$0xff] }
 0x18c   :  { %1125 = vmatpush.msra.mxu3 %v664_v40  ;;  %v1462_v40 = vld [vmem:[%s5523_s7 + $0x580] sm:$0xff] }
 0x18d   :  { %2804 = vmatmul.msk.f32.gmra.mxu3 %vm580_vm1, %v3364_v39  ;;  %1036 = vmatmul.f32.gmra.mxu0 %v3347_v16 }
 0x18e   :  { %1106 = vmatmul.f32.gmra.mxu2 %v3347_v16 }
 0x18f   :  { %2822 = vmatmul.msk.f32.gmra.mxu1 %vm580_vm1, %v3352_v25 }
 0x195   :  { %2805 = vmatmul.msk.f32.gmra.mxu3 %vm580_vm1, %v3371_v47  ;;  %1039 = vmatmul.f32.gmra.mxu0 %v3359_v31 }
 0x196   :  { %1109 = vmatmul.f32.gmra.mxu2 %v3359_v31 }
 0x197   :  { %2823 = vmatmul.msk.f32.gmra.mxu1 %vm580_vm1, %v3364_v39 }
 0x19d   :  { %2812 = vmatmul.msk.f32.vlgmr.msrb.gmra.mxu3 %vm580_vm1, %v3316_v18  ;;  %1164 = vmatmul.f32.vlgmr.msra.gmra.mxu0 %v3306_v51  ;;  %v661_v51 = vld [vmem:[#allocation5 + $0x1b8] sm:$0xff] }
 0x19e   :  { %1126 = vmatpush.msra.mxu3 %v661_v51 }
 0x19f   :  { %2830 = vmatmul.msk.f32.vlgmr.msra.gmra.mxu1 %vm580_vm1, %v3378_v61 }
 0x1a0   :  { %1127 = vmatpush.msra.mxu3 %v658_v41 }
 0x1a2   :  { %1128 = vmatpush.msra.mxu3 %v655_v32  ;;  %v1460_v32 = vld [vmem:[%s5523_s7 + $0x570] sm:$0xff] }
 0x1a4   :  { %1518 = vmatpush.msrb.mxu3 %v1476_v6  ;;  %v1307_v6 = vld [vmem:[%s5523_s7 + $0xc0] sm:$0xff] }
 0x1a5   :  { %2813 = vmatmul.msk.f32.gmra.mxu3 %vm580_vm1, %v3328_v43  ;;  %1167 = vmatmul.f32.gmra.mxu0 %v3311_v9 }
 0x1a6   :  { %1519 = vmatpush.msrb.mxu3 %v1474_v10  ;;  %v1305_v10 = vld [vmem:[%s5523_s7 + $0xb0] sm:$0xff] }
 0x1a7   :  { %2831 = vmatmul.msk.f32.gmra.mxu1 %vm580_vm1, %v3316_v18 }
 0x1a8   :  { %1520 = vmatpush.msrb.mxu3 %v1472_v13  ;;  %v1341_v13 = vld [vmem:[%s5523_s7 + $0x1d0] sm:$0xff] }
 0x1aa   :  { %1521 = vmatpush.msrb.mxu3 %v1470_v19 }
 0x1ac   :  { %1522 = vmatpush.msrb.mxu3 %v1468_v24  ;;  %v1444_v24 = vld [vmem:[%s5523_s7 + $0x4f0] sm:$0xff] }
 0x1ad   :  { %2814 = vmatmul.msk.f32.gmra.mxu3 %vm580_vm1, %v3340_v3  ;;  %1170 = vmatmul.f32.gmra.mxu0 %v3323_v34 }
 0x1ae   :  { %1523 = vmatpush.msrb.mxu3 %v1466_v28 }
 0x1af   :  { %2832 = vmatmul.msk.f32.gmra.mxu1 %vm580_vm1, %v3328_v43 }
 0x1b0   :  { %1524 = vmatpush.msrb.mxu3 %v1464_v33  ;;  %v1443_v33 = vld [vmem:[%s5523_s7 + $0x4e8] sm:$0xff] }
 0x1b2   :  { %1525 = vmatpush.msrb.mxu3 %v1462_v40 }
 0x1b4   :  { %1526 = vmatpush.msrb.mxu3 %v1460_v32  ;;  %v1440_v32 = vld [vmem:[%s5523_s7 + $0x4d0] sm:$0xff] }
 0x1b5   :  { %2815 = vmatmul.msk.f32.gmra.mxu3 %vm580_vm1, %v3352_v25  ;;  %1173 = vmatmul.f32.gmra.mxu0 %v3335_v59 }
 0x1b6   :  { %1527 = vmatpush.msrb.mxu3 %v1458_v45  ;;  %v1441_v45 = vld [vmem:[%s5523_s7 + $0x4d8] sm:$0xff] }
 0x1b7   :  { %2833 = vmatmul.msk.f32.gmra.mxu1 %vm580_vm1, %v3340_v3 }
 0x1ba   :  { %v3433_v9 = vpop.f32.mrf.mxu0 }
 0x1bc   :  { %v3435_v42 = vpop.f32.mrf.mxu1 }
 0x1bd   :  { %2816 = vmatmul.msk.f32.gmra.mxu3 %vm580_vm1, %v3364_v39  ;;  %1176 = vmatmul.f32.gmra.mxu0 %v3347_v16  ;;  %v1410_v16 = vld [vmem:[%s5523_s7 + $0x3e0] sm:$0xff] }
 0x1be   :  { %1479 = vmatpush.msra.mxu2 %v1410_v16  ;;  %v1456_v16 = vld [vmem:[%s5523_s7 + $0x550] sm:$0xff] }
 0x1bf   :  { %2834 = vmatmul.msk.f32.gmra.mxu1 %vm580_vm1, %v3352_v25  ;;  %1528 = vmatpush.msrb.mxu3 %v1456_v16  ;;  %v1333_v16 = vld [vmem:[%s5523_s7 + $0x190] sm:$0xff] }
 0x1c0   :  { %v3442_v34 = vpop.f32.mrf.mxu3 }
 0x1c1   :  { %v3700_v40 = vpop.f32.mrf.mxu2 }
 0x1c2   :  { %v3444_v44 = vpop.f32.mrf.mxu0 }
 0x1c4   :  { %v3446_v59 = vpop.f32.mrf.mxu1 }
 0x1c5   :  { %2817 = vmatmul.msk.f32.gmra.mxu3 %vm580_vm1, %v3371_v47  ;;  %1179 = vmatmul.f32.gmra.mxu0 %v3359_v31  ;;  %v1408_v31 = vld [vmem:[%s5523_s7 + $0x3d0] sm:$0xff]  ;;  %v1409_v47 = vld [vmem:[%s5523_s7 + $0x3d8] sm:$0xff] }
 0x1c6   :  { %1480 = vmatpush.msra.mxu2 %v1408_v31  ;;  %1540 = vmatpush.msrb.mxu0 %v1409_v47  ;;  %v1452_v47 = vld [vmem:[%s5523_s7 + $0x530] sm:$0xff] }
 0x1c7   :  { %2835 = vmatmul.msk.f32.gmra.mxu1 %vm580_vm1, %v3364_v39 }
 0x1c8   :  { %v3465_v49 = vpop.f32.mrf.mxu3  ;;  %1481 = vmatpush.msra.mxu2 %v1406_v52  ;;  %1541 = vmatpush.msrb.mxu0 %v1407_v38  ;;  %v1450_v52 = vld [vmem:[%s5523_s7 + $0x520] sm:$0xff] }
 0x1ca   :  { %v3473_v50 = vpop.f32.mrf.mxu0  ;;  %1482 = vmatpush.msra.mxu2 %v1404_v54  ;;  %1542 = vmatpush.msrb.mxu0 %v1405_v55  ;;  %v1448_v55 = vld [vmem:[%s5523_s7 + $0x510] sm:$0xff] }
 0x1cc   :  { %v3481_v53 = vpop.f32.mrf.mxu1  ;;  %1483 = vmatpush.msra.mxu2 %v1402_v56  ;;  %1543 = vmatpush.msrb.mxu0 %v1403_v57  ;;  %v1446_v57 = vld [vmem:[%s5523_s7 + $0x500] sm:$0xff] }
 0x1cd   :  { %2824 = vmatmul.msk.f32.vlgmr.msra.gmra.mxu3 %vm580_vm1, %v3378_v61  ;;  %v1401_v61 = vld [vmem:[%s5523_s7 + $0x398] sm:$0xff] }
 0x1ce   :  { %1484 = vmatpush.msra.mxu2 %v1400_v60  ;;  %1544 = vmatpush.msrb.mxu0 %v1401_v61  ;;  %v1313_v61 = vld [vmem:[%s5523_s7 + $0xf0] sm:$0xff] }
 0x1d0   :  { %v3497_v58 = vpop.f32.mrf.mxu3  ;;  %1485 = vmatpush.msra.mxu2 %v1398_v63  ;;  %1545 = vmatpush.msrb.mxu0 %v1399_v0  ;;  %v1309_v0 = vld [vmem:[%s5523_s7 + $0xd0] sm:$0xff] }
 0x1d2   :  { %v891_v62 = vpop.f32.mrf.mxu0  ;;  %1486 = vmatpush.msra.mxu2 %v1396_v2  ;;  %1546 = vmatpush.msrb.mxu0 %v1397_v4  ;;  %v1345_v2 = vld [vmem:[%s5523_s7 + $0x1f0] sm:$0xff] }
 0x1d4   :  { %v926_v1 = vpop.f32.mrf.mxu1  ;;  %1487 = vmatpush.msra.mxu2 %v1394_v7  ;;  %1547 = vmatpush.msrb.mxu0 %v1395_v8 }
 0x1d5   :  { %v3517_v5 = vadd.f32 %v926_v1, %v891_v62  ;;  %2825 = vmatmul.msk.f32.gmra.mxu3 %vm580_vm1, %v3316_v18 }
 0x1d6   :  { %1488 = vmatpush.msra.mxu2 %v1392_v11  ;;  %1548 = vmatpush.msrb.mxu0 %v1393_v12 }
 0x1d8   :  { %v3533_v18 = vpop.f32.mrf.mxu3  ;;  %1489 = vmatpush.msra.mxu2 %v1390_v15  ;;  %1549 = vmatpush.msrb.mxu0 %v1391_v17  ;;  %v1339_v17 = vld [vmem:[%s5523_s7 + $0x1c0] sm:$0xff] }
 0x1da   :  { %v894_v14 = vpop.f32.mrf.mxu0  ;;  %1490 = vmatpush.msra.mxu2 %v1388_v21  ;;  %1550 = vmatpush.msrb.mxu0 %v1389_v22 }
 0x1dc   :  { %v929_v20 = vpop.f32.mrf.mxu1  ;;  %1491 = vmatpush.msra.mxu2 %v1386_v26  ;;  %1551 = vmatpush.msrb.mxu0 %v1387_v27  ;;  %v1445_v26 = vld [vmem:[%s5523_s7 + $0x4f8] sm:$0xff]  ;;  %v1337_v27 = vld [vmem:[%s5523_s7 + $0x1b0] sm:$0xff] }
 0x1dd   :  { %v3559_v23 = vadd.f32 %v929_v20, %v894_v14  ;;  %2826 = vmatmul.msk.f32.gmra.mxu3 %vm580_vm1, %v3328_v43  ;;  %v1303_v14 = vld [vmem:[%s5523_s7 + $0xa0] sm:$0xff]  ;;  %v1301_v20 = vld [vmem:[%s5523_s7 + $0x90] sm:$0xff]  ;;  %1558 = vmatpush.msrb.mxu1 %v1445_v26 }
 0x1de   :  { %1492 = vmatpush.msra.mxu2 %v1384_v29  ;;  %1552 = vmatpush.msrb.mxu0 %v1385_v30  ;;  %v1442_v30 = vld [vmem:[%s5523_s7 + $0x4e0] sm:$0xff] }
 0x1df   :  { %1559 = vmatpush.msrb.mxu1 %v1443_v33 }
 0x1e0   :  { %v3575_v43 = vpop.f32.mrf.mxu3  ;;  %1493 = vmatpush.msra.mxu2 %v1382_v36  ;;  %1553 = vmatpush.msrb.mxu0 %v1383_v37  ;;  %v1297_v37 = vld [vmem:[%s5523_s7 + $0x70] sm:$0xff] }
 0x1e1   :  { %1560 = vmatpush.msrb.mxu1 %v1441_v45  ;;  %v1423_v45 = vld [vmem:[%s5523_s7 + $0x448] sm:$0xff] }
 0x1e2   :  { %v897_v35 = vpop.f32.mrf.mxu0  ;;  %1618 = vmatpush.msra.mxu0 %v1345_v2  ;;  %1498 = vmatpush.msrb.mxu2 %v1444_v24  ;;  %v1289_v2 = vld [vmem:[%s5523_s7 + $0x30] sm:$0xff] }
 0x1e3   :  { %v1321_v24 = vld [vmem:[%s5523_s7 + $0x130] sm:$0xff] }
 0x1e4   :  { %v932_v51 = vpop.f32.mrf.mxu1  ;;  %1499 = vmatpush.msrb.mxu2 %v1442_v30 }
 0x1e5   :  { %v3595_v41 = vadd.f32 %v932_v51, %v897_v35  ;;  %2827 = vmatmul.msk.f32.gmra.mxu3 %vm580_vm1, %v3340_v3  ;;  %v1454_v3 = vld [vmem:[%s5523_s7 + $0x540] sm:$0xff] }
 0x1e6   :  { %1529 = vmatpush.msrb.mxu3 %v1454_v3  ;;  %v1335_v35 = vld [vmem:[%s5523_s7 + $0x1a0] sm:$0xff]  ;;  %1500 = vmatpush.msrb.mxu2 %v1440_v32 }
 0x1e7   :  { %v1422_v32 = vld [vmem:[%s5523_s7 + $0x440] sm:$0xff] }
 0x1e8   :  { %v3605_v46 = vpop.f32.mrf.mxu3  ;;  %1530 = vmatpush.msrb.mxu3 %v1452_v47  ;;  %v1439_v47 = vld [vmem:[%s5523_s7 + $0x4c8] sm:$0xff] }
 0x1e9   :  { %1561 = vmatpush.msrb.mxu1 %v1439_v47 }
 0x1ea   :  { %v1025_v48 = vpop.f32.mrf.mxu0  ;;  %1531 = vmatpush.msrb.mxu3 %v1450_v52  ;;  %v1331_v52 = vld [vmem:[%s5523_s7 + $0x180] sm:$0xff] }
 0x1ec   :  { %v1060_v31 = vpop.f32.mrf.mxu1  ;;  %1532 = vmatpush.msrb.mxu3 %v1448_v55 }
 0x1ed   :  { %2828 = vmatmul.msk.f32.gmra.mxu3 %vm580_vm1, %v3352_v25 }
 0x1ee   :  { %1533 = vmatpush.msrb.mxu3 %v1446_v57  ;;  %v1329_v57 = vld [vmem:[%s5523_s7 + $0x170] sm:$0xff] }
 0x1f0   :  { %v847_v38 = vpop.f32.mrf.mxu3  ;;  %1598 = vmatpush.msra.mxu3 %v1313_v61 }
 0x1f1   :  { %v848_v54 = vadd.f32 %v847_v38, %v3442_v34  ;;  %v1311_v34 = vld [vmem:[%s5523_s7 + $0xe0] sm:$0xff] }
 0x1f2   :  { %v1028_v56 = vpop.f32.mrf.mxu0  ;;  %1599 = vmatpush.msra.mxu3 %v1311_v34  ;;  %v1434_v34 = vld [vmem:[%s5523_s7 + $0x4a0] sm:$0xff] }
 0x1f3   :  { %v1026_v25 = vadd.f32 %v1025_v48, %v848_v54  ;;  %v1295_v48 = vld [vmem:[%s5523_s7 + $0x60] sm:$0xff]  ;;  %v1293_v54 = vld [vmem:[%s5523_s7 + $0x50] sm:$0xff] }
 0x1f4   :  { %v1063_v60 = vpop.f32.mrf.mxu1  ;;  %1600 = vmatpush.msra.mxu3 %v1309_v0  ;;  %v1327_v0 = vld [vmem:[%s5523_s7 + $0x160] sm:$0xff] }
 0x1f5   :  { %v3631_v62 = vadd.f32 %v1060_v31, %v1026_v25  ;;  %2829 = vmatmul.msk.f32.gmra.mxu3 %vm580_vm1, %v3364_v39  ;;  %v3648_v39 = vld [vmem:[%s5522_s6] sm:$0x7]  ;;  %v1437_v25 = vld [vmem:[%s5523_s7 + $0x4b8] sm:$0xff] }
 0x1f6   :  { %v3660_v11 = vperm.slane %v3648_v39, 0  ;;  %1601 = vmatpush.msra.mxu3 %v1307_v6  ;;  %v1438_v31 = vld [vmem:[%s5523_s7 + $0x4c0] sm:$0xff]  ;;  %1562 = vmatpush.msrb.mxu1 %v1437_v25  ;;  %v1432_v6 = vld [vmem:[%s5523_s7 + $0x490] sm:$0xff] }
 0x1f7   :  { %1501 = vmatpush.msrb.mxu2 %v1438_v31  ;;  %v1378_v31 = vld [vmem:[%s5523_s7 + $0x2f8] sm:$0xff] }
 0x1f8   :  { %v850_v63 = vpop.f32.mrf.mxu3  ;;  %1602 = vmatpush.msra.mxu3 %v1305_v10  ;;  %v3766_v10 = vpop.f32.mrf.mxu2 }
 0x1f9   :  { %v851_v1 = vadd.f32 %v850_v63, %v3465_v49  ;;  %v1343_v49 = vld [vmem:[%s5523_s7 + $0x1e0] sm:$0xff]  ;;  %v1435_v63 = vld [vmem:[%s5523_s7 + $0x4a8] sm:$0xff] }
 0x1fa   :  { %v1031_v4 = vpop.f32.mrf.mxu0  ;;  %1619 = vmatpush.msra.mxu0 %v1343_v49  ;;  %1603 = vmatpush.msra.mxu3 %v1303_v14  ;;  %v1325_v49 = vld [vmem:[%s5523_s7 + $0x150] sm:$0xff]  ;;  %v1431_v14 = vld [vmem:[%s5523_s7 + $0x488] sm:$0xff] }
 0x1fb   :  { %v1029_v7 = vadd.f32 %v1028_v56, %v851_v1  ;;  %v1436_v56 = vld [vmem:[%s5523_s7 + $0x4b0] sm:$0xff]  ;;  %1563 = vmatpush.msrb.mxu1 %v1435_v63  ;;  %v1417_v63 = vld [vmem:[%s5523_s7 + $0x418] sm:$0xff] }
 0x1fc   :  { %v1066_v8 = vpop.f32.mrf.mxu1  ;;  %1620 = vmatpush.msra.mxu0 %v1341_v13  ;;  %1604 = vmatpush.msra.mxu3 %v1301_v20  ;;  %v1430_v13 = vld [vmem:[%s5523_s7 + $0x480] sm:$0xff] }
 0x1fd   :  { %v1064_v12 = vadd.f32 %v1063_v60, %v1029_v7  ;;  %1502 = vmatpush.msrb.mxu2 %v1436_v56  ;;  %v1433_v7 = vld [vmem:[%s5523_s7 + $0x498] sm:$0xff]  ;;  %v1376_v56 = vld [vmem:[%s5523_s7 + $0x2e8] sm:$0xff] }
 0x1fe   :  { %1621 = vmatpush.msra.mxu0 %v1339_v17  ;;  %1564 = vmatpush.msrb.mxu1 %v1433_v7  ;;  %v1477_v7 = vld [vmem:[%s5523_s7 + $0x5f8] sm:$0xff] }
 0x1ff   :  { %v1229_v15 = vadd.f32 %v3660_v11, %v1064_v12  ;;  %1503 = vmatpush.msrb.mxu2 %v1434_v34  ;;  %v1416_v34 = vld [vmem:[%s5523_s7 + $0x410] sm:$0xff] }
 0x200   :  { %v853_v19 = vpop.f32.mrf.mxu3  ;;  %1622 = vmatpush.msra.mxu0 %v1337_v27  ;;  %1565 = vmatpush.msrb.mxu1 %v1431_v14  ;;  %v3829_v47 = vpop.f32.mrf.mxu2  ;;  %v1475_v14 = vld [vmem:[%s5523_s7 + $0x5e8] sm:$0xff] }
 0x201   :  { %v1247_v21 = vmax.f32 %v1229_v15, 0.0  ;;  %v854_v22 = vadd.f32 %v853_v19, %v3497_v58  ;;  %v1299_v58 = vld [vmem:[%s5523_s7 + $0x80] sm:$0xff]  ;;  %1504 = vmatpush.msrb.mxu2 %v1432_v6  ;;  %v1285_v19 = vld [vmem:[%s5523_s7 + $0x10] sm:$0xff] }
 0x202   :  { %v1034_v28 = vpop.f32.mrf.mxu0  ;;  %1605 = vmatpush.msra.mxu3 %v1299_v58  ;;  %1623 = vmatpush.msra.mxu0 %v1335_v35  ;;  %v1323_v15 = vld [vmem:[%s5523_s7 + $0x140] sm:$0xff]  ;;  %v1427_v58 = vld [vmem:[%s5523_s7 + $0x468] sm:$0xff]  ;;  %v1424_v35 = vld [vmem:[%s5523_s7 + $0x450] sm:$0xff] }
 0x203   :  { %v1032_v29 = vadd.f32 %v1031_v4, %v854_v22  ;;  %1494 = vmatmul.f32.vlgmr.msra.gmra.mxu2 %v1247_v21  ;;  %1554 = vmatmul.f32.vlgmr.msrb.gmra.mxu0 %v1247_v21  ;;  %v1428_v21 = vld [vmem:[%s5523_s7 + $0x470] sm:$0xff]  ;;  %v1429_v22 = vld [vmem:[%s5523_s7 + $0x478] sm:$0xff] }
 0x204   :  { %v1069_v36 = vpop.f32.mrf.mxu1  ;;  %1606 = vmatpush.msra.mxu3 %v1297_v37  ;;  %1624 = vmatpush.msra.mxu0 %v1333_v16  ;;  %v1317_v37 = vld [vmem:[%s5523_s7 + $0x110] sm:$0xff]  ;;  %v1315_v16 = vld [vmem:[%s5523_s7 + $0x100] sm:$0xff] }
 0x205   :  { %v1067_v51 = vadd.f32 %v1066_v8, %v1032_v29  ;;  %v1287_v8 = vld [vmem:[%s5523_s7 + $0x20] sm:$0xff]  ;;  %1505 = vmatpush.msrb.mxu2 %v1430_v13  ;;  %1566 = vmatpush.msrb.mxu1 %v1429_v22  ;;  %v1373_v22 = vld [vmem:[%s5523_s7 + $0x2d0] sm:$0xff] }
 0x206   :  { %1607 = vmatpush.msra.mxu3 %v1295_v48  ;;  %1625 = vmatpush.msra.mxu0 %v1331_v52  ;;  %v1319_v29 = vld [vmem:[%s5523_s7 + $0x120] sm:$0xff] }
 0x207   :  { %v3715_v3 = vadd.f32 %v3660_v11, %v1067_v51  ;;  %1506 = vmatpush.msrb.mxu2 %v1428_v21  ;;  %1567 = vmatpush.msrb.mxu1 %v1427_v58  ;;  %v1473_v21 = vld [vmem:[%s5523_s7 + $0x5d8] sm:$0xff] }
 0x208   :  { %v856_v38 = vpop.f32.mrf.mxu3  ;;  %1608 = vmatpush.msra.mxu3 %v1293_v54  ;;  %1626 = vmatpush.msra.mxu0 %v1329_v57  ;;  %v1421_v54 = vld [vmem:[%s5523_s7 + $0x438] sm:$0xff]  ;;  %v1419_v57 = vld [vmem:[%s5523_s7 + $0x428] sm:$0xff] }
 0x209   :  { %v857_v55 = vadd.f32 %v856_v38, %v3533_v18  ;;  %v1291_v18 = vld [vmem:[%s5523_s7 + $0x40] sm:$0xff]  ;;  %v1420_v38 = vld [vmem:[%s5523_s7 + $0x430] sm:$0xff]  ;;  %v1469_v58 = vld [vmem:[%s5523_s7 + $0x5b8] sm:$0xff] }
 0x20a   :  { %v1037_v60 = vpop.f32.mrf.mxu0  ;;  %1609 = vmatpush.msra.mxu3 %v1291_v18  ;;  %1627 = vmatpush.msra.mxu0 %v1327_v0  ;;  %v1374_v18 = vld [vmem:[%s5523_s7 + $0x2d8] sm:$0xff]  ;;  %v1372_v0 = vld [vmem:[%s5523_s7 + $0x2c8] sm:$0xff] }
 0x20b   :  { %v1035_v61 = vadd.f32 %v1034_v28, %v857_v55  ;;  %v1426_v28 = vld [vmem:[%s5523_s7 + $0x460] sm:$0xff] }
 0x20c   :  { %v1072_v1 = vpop.f32.mrf.mxu1  ;;  %1610 = vmatpush.msra.mxu3 %v1289_v2  ;;  %1628 = vmatpush.msra.mxu0 %v1325_v49  ;;  %v1414_v2 = vld [vmem:[%s5523_s7 + $0x400] sm:$0xff]  ;;  %v1377_v49 = vld [vmem:[%s5523_s7 + $0x2f0] sm:$0xff] }
 0x20d   :  { %v1070_v4 = vadd.f32 %v1069_v36, %v1035_v61  ;;  %1507 = vmatpush.msrb.mxu2 %v1426_v28  ;;  %v1425_v36 = vld [vmem:[%s5523_s7 + $0x458] sm:$0xff] }
 0x20e   :  { %1611 = vmatpush.msra.mxu3 %v1287_v8  ;;  %1629 = vmatpush.msra.mxu0 %v1323_v15  ;;  %v1370_v8 = vld [vmem:[%s5523_s7 + $0x2b8] sm:$0xff]  ;;  %v1375_v15 = vld [vmem:[%s5523_s7 + $0x2e0] sm:$0xff] }
 0x20f   :  { %v3769_v12 = vadd.f32 %v3660_v11, %v1070_v4  ;;  %1508 = vmatpush.msrb.mxu2 %v1424_v35  ;;  %1568 = vmatpush.msrb.mxu1 %v1425_v36  ;;  %v1415_v4 = vld [vmem:[%s5523_s7 + $0x408] sm:$0xff]  ;;  %v1367_v36 = vld [vmem:[%s5523_s7 + $0x2a0] sm:$0xff] }
 0x210   :  { %v859_v17 = vpop.f32.mrf.mxu3  ;;  %1612 = vmatpush.msra.mxu3 %v1285_v19  ;;  %1630 = vmatpush.msra.mxu0 %v1321_v24  ;;  %v3892_v19 = vpop.f32.mrf.mxu2  ;;  %v1366_v24 = vld [vmem:[%s5523_s7 + $0x298] sm:$0xff]  ;;  %v1467_v35 = vld [vmem:[%s5523_s7 + $0x5a8] sm:$0xff] }
 0x211   :  { %v860_v20 = vadd.f32 %v859_v17, %v3575_v43  ;;  %v1283_v43 = vld [vmem:[%s5523_s7] sm:$0xff]  ;;  %1509 = vmatpush.msrb.mxu2 %v1422_v32  ;;  %1569 = vmatpush.msrb.mxu1 %v1423_v45  ;;  %v1368_v17 = vld [vmem:[%s5523_s7 + $0x2a8] sm:$0xff] }
 0x212   :  { %v1040_v26 = vpop.f32.mrf.mxu0  ;;  %1613 = vmatpush.msra.mxu3 %v1283_v43  ;;  %1631 = vmatpush.msra.mxu0 %v1319_v29  ;;  %v1371_v43 = vld [vmem:[%s5523_s7 + $0x2c0] sm:$0xff]  ;;  %v1369_v29 = vld [vmem:[%s5523_s7 + $0x2b0] sm:$0xff] }
 0x213   :  { %v1038_v27 = vadd.f32 %v1037_v60, %v860_v20  ;;  %1510 = vmatpush.msrb.mxu2 %v1420_v38  ;;  %1570 = vmatpush.msrb.mxu1 %v1421_v54 }
 0x214   :  { %v1075_v30 = vpop.f32.mrf.mxu1  ;;  %1632 = vmatpush.msra.mxu0 %v1317_v37  ;;  %v1360_v37 = vld [vmem:[%s5523_s7 + $0x268] sm:$0xff] }
 0x215   :  { %v1073_v33 = vadd.f32 %v1072_v1, %v1038_v27  ;;  %1571 = vmatpush.msrb.mxu1 %v1419_v57  ;;  %v1364_v27 = vld [vmem:[%s5523_s7 + $0x288] sm:$0xff] }
 0x216   :  { %1633 = vmatpush.msra.mxu0 %v1315_v16  ;;  %v1365_v16 = vld [vmem:[%s5523_s7 + $0x290] sm:$0xff] }
 0x217   :  { %v3815_v51 = vadd.f32 %v3660_v11, %v1073_v33  ;;  %1572 = vmatpush.msrb.mxu1 %v1417_v63 }
 0x218   :  { %v862_v48 = vpop.f32.mrf.mxu3  ;;  %1698 = vmatpush.msrb.mxu0 %v1378_v31  ;;  %v3942_v31 = vpop.f32.mrf.mxu2 }
 0x219   :  { %v863_v52 = vadd.f32 %v862_v48, %v3605_v46  ;;  %v1418_v46 = vld [vmem:[%s5523_s7 + $0x420] sm:$0xff]  ;;  %1573 = vmatpush.msrb.mxu1 %v1415_v4  ;;  %v1358_v48 = vld [vmem:[%s5523_s7 + $0x258] sm:$0xff]  ;;  %v1459_v4 = vld [vmem:[%s5523_s7 + $0x568] sm:$0xff] }
 0x21a   :  { %v3838_v55 = vpop.f32.mrf.mxu0  ;;  %1699 = vmatpush.msrb.mxu0 %v1376_v56  ;;  %1511 = vmatpush.msrb.mxu2 %v1418_v46  ;;  %v1463_v56 = vld [vmem:[%s5523_s7 + $0x588] sm:$0xff] }
 0x21b   :  { %v1041_v25 = vadd.f32 %v1040_v26, %v863_v52  ;;  %1638 = vmatpush.msra.mxu1 %v1377_v49  ;;  %v1471_v26 = vld [vmem:[%s5523_s7 + $0x5c8] sm:$0xff]  ;;  %v3945_v52 = vperm.slane %v3648_v39, 2 }
 0x21c   :  { %v3849_v60 = vpop.f32.mrf.mxu1  ;;  %1700 = vmatpush.msrb.mxu0 %v1374_v18  ;;  %1512 = vmatpush.msrb.mxu2 %v1416_v34  ;;  %v1356_v46 = vld [vmem:[%s5523_s7 + $0x248] sm:$0xff]  ;;  %v1361_v34 = vld [vmem:[%s5523_s7 + $0x270] sm:$0xff] }
 0x21d   :  { %v1076_v61 = vadd.f32 %v1075_v30, %v1041_v25  ;;  %1639 = vmatpush.msra.mxu1 %v1375_v15  ;;  %v1362_v30 = vld [vmem:[%s5523_s7 + $0x278] sm:$0xff]  ;;  %v1363_v25 = vld [vmem:[%s5523_s7 + $0x280] sm:$0xff]  ;;  %v1344_v49 = vld [vmem:[%s5523_s7 + $0x1e8] sm:$0xff]  ;;  %v3998_v15 = vadd.f32 %v3660_v11, %v3631_v62 }
 0x21e   :  { %1701 = vmatpush.msrb.mxu0 %v1372_v0  ;;  %1513 = vmatpush.msrb.mxu2 %v1414_v2  ;;  %v1346_v0 = vld [vmem:[%s5523_s7 + $0x1f8] sm:$0xff]  ;;  %v1355_v62 = vld [vmem:[%s5523_s7 + $0x240] sm:$0xff] }
 0x21f   :  { %v3864_v1 = vadd.f32 %v3660_v11, %v1076_v61  ;;  %1640 = vmatpush.msra.mxu1 %v1373_v22  ;;  %v1461_v61 = vld [vmem:[%s5523_s7 + $0x578] sm:$0xff]  ;;  %v1455_v22 = vld [vmem:[%s5523_s7 + $0x548] sm:$0xff] }
 0x220   :  { %v3872_v6 = vpop.f32.mrf.mxu3  ;;  %1578 = vmatpush.msra.mxu2 %v1477_v7  ;;  %1702 = vmatpush.msrb.mxu0 %v1370_v8  ;;  %v1354_v2 = vld [vmem:[%s5523_s7 + $0x238] sm:$0xff]  ;;  %v1359_v7 = vld [vmem:[%s5523_s7 + $0x260] sm:$0xff]  ;;  %v1352_v8 = vld [vmem:[%s5523_s7 + $0x228] sm:$0xff]  ;;  %v967_v11 = vpop.f32.mrf.mxu2 }
 0x221   :  { %1641 = vmatpush.msra.mxu1 %v1371_v43 }
 0x222   :  { %v1168_v13 = vpop.f32.mrf.mxu0  ;;  %1579 = vmatpush.msra.mxu2 %v1475_v14  ;;  %1703 = vmatpush.msrb.mxu0 %v1368_v17  ;;  %v1357_v14 = vld [vmem:[%s5523_s7 + $0x250] sm:$0xff]  ;;  %v1342_v17 = vld [vmem:[%s5523_s7 + $0x1d8] sm:$0xff] }
 0x223   :  { %1642 = vmatpush.msra.mxu1 %v1369_v29 }
 0x224   :  { %v1203_v20 = vpop.f32.mrf.mxu1  ;;  %1580 = vmatpush.msra.mxu2 %v1473_v21  ;;  %1704 = vmatpush.msrb.mxu0 %v1366_v24  ;;  %v1340_v24 = vld [vmem:[%s5523_s7 + $0x1c8] sm:$0xff] }
 0x225   :  { %1643 = vmatpush.msra.mxu1 %v1367_v36 }
 0x226   :  { %1581 = vmatpush.msra.mxu2 %v1471_v26  ;;  %1705 = vmatpush.msrb.mxu0 %v1364_v27  ;;  %v1348_v26 = vld [vmem:[%s5523_s7 + $0x208] sm:$0xff] }
 0x227   :  { %1644 = vmatpush.msra.mxu1 %v1365_v16  ;;  %v1334_v16 = vld [vmem:[%s5523_s7 + $0x198] sm:$0xff] }
 0x228   :  { %v990_v28 = vpop.f32.mrf.mxu3  ;;  %1582 = vmatpush.msra.mxu2 %v1469_v58  ;;  %1706 = vmatpush.msrb.mxu0 %v1362_v30  ;;  %v1244_v58 = vmax.f32 %v3998_v15, 0.0  ;;  %v1338_v30 = vld [vmem:[%s5523_s7 + $0x1b8] sm:$0xff]  ;;  %v1956_v15 = vld [vmem:[%s5523_s7 + $0x970] sm:$0xff] }
 0x229   :  { %v991_v33 = vadd.f32 %v990_v28, %v3766_v10  ;;  %v1465_v10 = vld [vmem:[%s5523_s7 + $0x598] sm:$0xff]  ;;  %1645 = vmatpush.msra.mxu1 %v1363_v25  ;;  %v1332_v25 = vld [vmem:[%s5523_s7 + $0x188] sm:$0xff] }
 0x22a   :  { %v3931_v45 = vpop.f32.mrf.mxu0  ;;  %1583 = vmatpush.msra.mxu2 %v1467_v35  ;;  %1707 = vmatpush.msrb.mxu0 %v1360_v37  ;;  %v1453_v28 = vld [vmem:[%s5523_s7 + $0x538] sm:$0xff]  ;;  %v1451_v35 = vld [vmem:[%s5523_s7 + $0x528] sm:$0xff]  ;;  %v1351_v37 = vld [vmem:[%s5523_s7 + $0x220] sm:$0xff] }
 0x22b   :  { %v1169_v32 = vadd.f32 %v1168_v13, %v991_v33  ;;  %1646 = vmatpush.msra.mxu1 %v1361_v34  ;;  %v1457_v13 = vld [vmem:[%s5523_s7 + $0x558] sm:$0xff]  ;;  %v1353_v33 = vld [vmem:[%s5523_s7 + $0x230] sm:$0xff] }
 0x22c   :  { %v3947_v54 = vpop.f32.mrf.mxu1  ;;  %1584 = vmatpush.msra.mxu2 %v1465_v10  ;;  %1708 = vmatpush.msrb.mxu0 %v1358_v48  ;;  %v1349_v48 = vld [vmem:[%s5523_s7 + $0x210] sm:$0xff] }
 0x22d   :  { %v1204_v38 = vadd.f32 %v1203_v20, %v1169_v32  ;;  %1647 = vmatpush.msra.mxu1 %v1359_v7  ;;  %v1350_v20 = vld [vmem:[%s5523_s7 + $0x218] sm:$0xff] }
 0x22e   :  { %1585 = vmatpush.msra.mxu2 %v1463_v56  ;;  %1709 = vmatpush.msrb.mxu0 %v1356_v46  ;;  %v1449_v32 = vld [vmem:[%s5523_s7 + $0x518] sm:$0xff]  ;;  %v1347_v46 = vld [vmem:[%s5523_s7 + $0x200] sm:$0xff] }
 0x22f   :  { %v3959_v57 = vadd.f32 %v3945_v52, %v1204_v38  ;;  %1648 = vmatpush.msra.mxu1 %v1357_v14  ;;  %v1447_v38 = vld [vmem:[%s5523_s7 + $0x508] sm:$0xff] }
 0x230   :  { %v3961_v18 = vpop.f32.mrf.mxu3  ;;  %1586 = vmatpush.msra.mxu2 %v1461_v61  ;;  %1710 = vmatpush.msrb.mxu0 %v1354_v2  ;;  %v1330_v2 = vld [vmem:[%s5523_s7 + $0x178] sm:$0xff] }
 0x231   :  { %v1249_v63 = vmax.f32 %v3959_v57, 0.0  ;;  %1649 = vmatpush.msra.mxu1 %v1355_v62  ;;  %v1791_v57 = vld [vmem:[%s5523_s7 + $0x830] sm:$0xff] }
 0x232   :  { %1587 = vmatpush.msra.mxu2 %v1459_v4  ;;  %v1174_v21 = vpop.f32.mrf.mxu0  ;;  %1711 = vmatpush.msrb.mxu0 %v1352_v8  ;;  %v1095_v4 = vpop.f32.mrf.mxu2  ;;  %v1328_v8 = vld [vmem:[%s5523_s7 + $0x168] sm:$0xff] }
 0x233   :  { %1534 = vmatmul.f32.vlgmr.msrb.gmra.mxu3 %v1249_v63  ;;  %1650 = vmatpush.msra.mxu1 %v1353_v33  ;;  %v988_v33 = vadd.f32 %v3872_v6, %v3700_v40  ;;  %v1813_v40 = vld [vmem:[%s5523_s7 + $0x8e0] sm:$0xff] }
 0x234   :  { %1678 = vmatpush.msrb.mxu3 %v1346_v0  ;;  %1588 = vmatpush.msra.mxu2 %v1457_v13  ;;  %v1209_v43 = vpop.f32.mrf.mxu1 }
 0x235   :  { %1712 = vmatpush.msrb.mxu0 %v1350_v20  ;;  %1651 = vmatpush.msra.mxu1 %v1351_v37  ;;  %v1166_v6 = vadd.f32 %v3838_v55, %v988_v33  ;;  %v1809_v55 = vld [vmem:[%s5523_s7 + $0x8c0] sm:$0xff] }
 0x236   :  { %1679 = vmatpush.msrb.mxu3 %v1344_v49  ;;  %1589 = vmatpush.msra.mxu2 %v1455_v22  ;;  %v1322_v22 = vld [vmem:[%s5523_s7 + $0x138] sm:$0xff]  ;;  %v1797_v33 = vld [vmem:[%s5523_s7 + $0x860] sm:$0xff] }
 0x237   :  { %1713 = vmatpush.msrb.mxu0 %v1348_v26  ;;  %1652 = vmatpush.msra.mxu1 %v1349_v48  ;;  %v1320_v26 = vld [vmem:[%s5523_s7 + $0x128] sm:$0xff]  ;;  %v1752_v48 = vld [vmem:[%s5523_s7 + $0x6f8] sm:$0xff] }
 0x238   :  { %1680 = vmatpush.msrb.mxu3 %v1342_v17  ;;  %v996_v27 = vpop.f32.mrf.mxu3  ;;  %1590 = vmatpush.msra.mxu2 %v1453_v28  ;;  %v1324_v17 = vld [vmem:[%s5523_s7 + $0x148] sm:$0xff]  ;;  %v918_v28 = vadd.f32 %v3435_v42, %v3433_v9 }
 0x239   :  { %v997_v29 = vadd.f32 %v996_v27, %v3892_v19  ;;  %v1336_v19 = vld [vmem:[%s5523_s7 + $0x1a8] sm:$0xff]  ;;  %1653 = vmatpush.msra.mxu1 %v1347_v46  ;;  %v1201_v46 = vadd.f32 %v3849_v60, %v1166_v6  ;;  %v1805_v60 = vld [vmem:[%s5523_s7 + $0x8a0] sm:$0xff]  ;;  %v1743_v6 = vld [vmem:[%s5523_s7 + $0x6b0] sm:$0xff] }
 0x23a   :  { %1681 = vmatpush.msrb.mxu3 %v1340_v24  ;;  %1591 = vmatpush.msra.mxu2 %v1451_v35  ;;  %v1177_v61 = vpop.f32.mrf.mxu0  ;;  %v1316_v9 = vld [vmem:[%s5523_s7 + $0x108] sm:$0xff] }
 0x23b   :  { %v1175_v36 = vadd.f32 %v1174_v21, %v997_v29  ;;  %1614 = vmatmul.f32.vlgmr.msra.gmra.mxu3 %v1244_v58 }
 0x23c   :  { %1682 = vmatpush.msrb.mxu3 %v1338_v30  ;;  %1592 = vmatpush.msra.mxu2 %v1449_v32  ;;  %v1212_v7 = vpop.f32.mrf.mxu1  ;;  %v1096_v30 = vadd.f32 %v1095_v4, %v918_v28  ;;  %v1811_v32 = vld [vmem:[%s5523_s7 + $0x8d0] sm:$0xff]  ;;  %v1310_v28 = vld [vmem:[%s5523_s7 + $0xd8] sm:$0xff] }
 0x23d   :  { %v1210_v10 = vadd.f32 %v1209_v43, %v1175_v36  ;;  %v1098_v43 = vpop.f32.mrf.mxu2  ;;  %v4094_v36 = vperm.slane %v3648_v39, 1 }
 0x23e   :  { %1683 = vmatpush.msrb.mxu3 %v1336_v19  ;;  %1593 = vmatpush.msra.mxu2 %v1447_v38  ;;  %v1815_v19 = vld [vmem:[%s5523_s7 + $0x8f0] sm:$0xff] }
 0x23f   :  { %v4053_v56 = vadd.f32 %v3945_v52, %v1210_v10  ;;  %v921_v10 = vadd.f32 %v3446_v59, %v3444_v44  ;;  %v1750_v44 = vld [vmem:[%s5523_s7 + $0x6e8] sm:$0xff] }
 0x240   :  { %1684 = vmatpush.msrb.mxu3 %v1334_v16  ;;  %v999_v34 = vpop.f32.mrf.mxu3 }
 0x241   :  { %v1000_v0 = vadd.f32 %v999_v34, %v3942_v31  ;;  %v1326_v31 = vld [vmem:[%s5523_s7 + $0x158] sm:$0xff] }
 0x242   :  { %1685 = vmatpush.msrb.mxu3 %v1332_v25  ;;  %v1180_v62 = vpop.f32.mrf.mxu0  ;;  %v1099_v25 = vadd.f32 %v1098_v43, %v921_v10  ;;  %v1742_v43 = vld [vmem:[%s5523_s7 + $0x6a8] sm:$0xff] }
 0x243   :  { %v1178_v49 = vadd.f32 %v1177_v61, %v1000_v0  ;;  %v1807_v61 = vld [vmem:[%s5523_s7 + $0x8b0] sm:$0xff]  ;;  %v1748_v0 = vld [vmem:[%s5523_s7 + $0x6d8] sm:$0xff]  ;;  %v1304_v10 = vld [vmem:[%s5523_s7 + $0xa8] sm:$0xff] }
 0x244   :  { %1686 = vmatpush.msrb.mxu3 %v1330_v2  ;;  %v1215_v27 = vpop.f32.mrf.mxu1  ;;  %v1228_v2 = vadd.f32 %v3945_v52, %v1201_v46  ;;  %v1302_v46 = vld [vmem:[%s5523_s7 + $0x98] sm:$0xff] }
 0x245   :  { %v1213_v13 = vadd.f32 %v1212_v7, %v1178_v49  ;;  %v4115_v38 = vpop.f32.mrf.mxu2  ;;  %v1746_v7 = vld [vmem:[%s5523_s7 + $0x6c8] sm:$0xff]  ;;  %v1803_v49 = vld [vmem:[%s5523_s7 + $0x890] sm:$0xff] }
 0x246   :  { %1687 = vmatpush.msrb.mxu3 %v1328_v8 }
 0x247   :  { %v4072_v14 = vadd.f32 %v3945_v52, %v1213_v13  ;;  %v1314_v13 = vld [vmem:[%s5523_s7 + $0xf8] sm:$0xff] }
 0x248   :  { %1688 = vmatpush.msrb.mxu3 %v1326_v31  ;;  %v1002_v20 = vpop.f32.mrf.mxu3  ;;  %v1751_v31 = vld [vmem:[%s5523_s7 + $0x6f0] sm:$0xff] }
 0x249   :  { %v1003_v21 = vadd.f32 %v1002_v20, %v967_v11  ;;  %v1318_v11 = vld [vmem:[%s5523_s7 + $0x118] sm:$0xff] }
 0x24a   :  { %1689 = vmatpush.msrb.mxu3 %v1324_v17  ;;  %v1246_v17 = vmax.f32 %v1228_v2, 0.0  ;;  %v1744_v20 = vld [vmem:[%s5523_s7 + $0x6b8] sm:$0xff] }
 0x24b   :  { %v1181_v24 = vadd.f32 %v1180_v62, %v1003_v21  ;;  %v1801_v21 = vld [vmem:[%s5523_s7 + $0x880] sm:$0xff] }
 0x24c   :  { %1690 = vmatpush.msrb.mxu3 %v1322_v22 }
 0x24d   :  { %v1216_v29 = vadd.f32 %v1215_v27, %v1181_v24  ;;  %v1104_v22 = vpop.f32.mrf.mxu2  ;;  %v1312_v24 = vld [vmem:[%s5523_s7 + $0xe8] sm:$0xff]  ;;  %v1799_v27 = vld [vmem:[%s5523_s7 + $0x870] sm:$0xff] }
 0x24e   :  { %1691 = vmatpush.msrb.mxu3 %v1320_v26  ;;  %v1749_v26 = vld [vmem:[%s5523_s7 + $0x6e0] sm:$0xff] }
 0x24f   :  { %v4091_v35 = vadd.f32 %v3945_v52, %v1216_v29  ;;  %v1747_v29 = vld [vmem:[%s5523_s7 + $0x6d0] sm:$0xff] }
 0x250   :  { %1692 = vmatpush.msrb.mxu3 %v1318_v11  ;;  %v1130_v42 = vpop.f32.mrf.mxu3  ;;  %v994_v11 = vadd.f32 %v3961_v18, %v3829_v47  ;;  %v1745_v47 = vld [vmem:[%s5523_s7 + $0x6c0] sm:$0xff]  ;;  %v1738_v18 = vld [vmem:[%s5523_s7 + $0x688] sm:$0xff] }
 0x251   :  { %v1131_v37 = vadd.f32 %v1130_v42, %v1096_v30  ;;  %v1740_v30 = vld [vmem:[%s5523_s7 + $0x698] sm:$0xff]  ;;  %v1795_v42 = vld [vmem:[%s5523_s7 + $0x850] sm:$0xff] }
 0x252   :  { %1693 = vmatpush.msrb.mxu3 %v1316_v9  ;;  %v1308_v9 = vld [vmem:[%s5523_s7 + $0xc8] sm:$0xff] }
 0x253   :  { %v1227_v39 = vadd.f32 %v4094_v36, %v1131_v37  ;;  %v1172_v37 = vadd.f32 %v3931_v45, %v994_v11  ;;  %v1292_v11 = vld [vmem:[%s5523_s7 + $0x48] sm:$0xff] }
 0x254   :  { %1857 = vmatpush.msra.mxu3 %v1815_v19  ;;  %v1105_v19 = vadd.f32 %v1104_v22, %v3517_v5  ;;  %v1793_v5 = vld [vmem:[%s5523_s7 + $0x840] sm:$0xff] }
 0x255   :  { %v1245_v16 = vmax.f32 %v1227_v39, 0.0  ;;  %v1736_v39 = vld [vmem:[%s5523_s7 + $0x678] sm:$0xff] }
 0x256   :  { %1858 = vmatpush.msra.mxu3 %v1813_v40  ;;  %v1306_v40 = vld [vmem:[%s5523_s7 + $0xb8] sm:$0xff] }
 0x257   :  { %1634 = vmatmul.f32.vlgmr.msra.gmra.mxu0 %v1245_v16  ;;  %1694 = vmatmul.f32.vlgmr.msrb.gmra.mxu3 %v1245_v16  ;;  %v1741_v16 = vld [vmem:[%s5523_s7 + $0x6a0] sm:$0xff] }
 0x258   :  { %1859 = vmatpush.msra.mxu3 %v1811_v32  ;;  %1877 = vmatpush.msra.mxu0 %v1752_v48  ;;  %v1133_v59 = vpop.f32.mrf.mxu3  ;;  %v1107_v48 = vpop.f32.mrf.mxu2 }
 0x259   :  { %v1134_v34 = vadd.f32 %v1133_v59, %v1099_v25  ;;  %v1732_v59 = vld [vmem:[%s5523_s7 + $0x658] sm:$0xff]  ;;  %v1108_v2 = vadd.f32 %v1107_v48, %v3559_v23  ;;  %v1723_v48 = vld [vmem:[%s5523_s7 + $0x610] sm:$0xff] }
 0x25a   :  { %1860 = vmatpush.msra.mxu3 %v1809_v55  ;;  %1878 = vmatpush.msra.mxu0 %v1750_v44  ;;  %v1734_v55 = vld [vmem:[%s5523_s7 + $0x668] sm:$0xff]  ;;  %v1739_v44 = vld [vmem:[%s5523_s7 + $0x690] sm:$0xff] }
 0x25b   :  { %v1230_v4 = vadd.f32 %v4094_v36, %v1134_v34  ;;  %v1737_v34 = vld [vmem:[%s5523_s7 + $0x680] sm:$0xff] }
 0x25c   :  { %1861 = vmatpush.msra.mxu3 %v1807_v61  ;;  %1879 = vmatpush.msra.mxu0 %v1748_v0  ;;  %v1300_v61 = vld [vmem:[%s5523_s7 + $0x88] sm:$0xff] }
 0x25d   :  { %v1248_v8 = vmax.f32 %v1230_v4, 0.0  ;;  %v1730_v0 = vld [vmem:[%s5523_s7 + $0x648] sm:$0xff] }
 0x25e   :  { %1862 = vmatpush.msra.mxu3 %v1805_v60  ;;  %1880 = vmatpush.msra.mxu0 %v1746_v7  ;;  %v1787_v60 = vld [vmem:[%s5523_s7 + $0x810] sm:$0xff]  ;;  %v1298_v7 = vld [vmem:[%s5523_s7 + $0x78] sm:$0xff] }
 0x25f   :  { %1514 = vmatmul.f32.vlgmr.msrb.gmra.mxu2 %v1248_v8  ;;  %1574 = vmatmul.f32.vlgmr.msrb.gmra.mxu1 %v1248_v8  ;;  %v1728_v8 = vld [vmem:[%s5523_s7 + $0x638] sm:$0xff] }
 0x260   :  { %1863 = vmatpush.msra.mxu3 %v1803_v49  ;;  %1658 = vmatpush.msrb.mxu2 %v1314_v13  ;;  %v4153_v62 = vpop.f32.mrf.mxu3  ;;  %v1735_v49 = vld [vmem:[%s5523_s7 + $0x670] sm:$0xff] }
 0x261   :  { %1714 = vmatmul.f32.vlgmr.msrb.gmra.mxu0 %v1246_v17  ;;  %1817 = vmatpush.msrb.mxu1 %v1751_v31  ;;  %v1296_v31 = vld [vmem:[%s5523_s7 + $0x68] sm:$0xff] }
 0x262   :  { %1881 = vmatpush.msra.mxu0 %v1744_v20  ;;  %1864 = vmatpush.msra.mxu3 %v1801_v21  ;;  %v1726_v20 = vld [vmem:[%s5523_s7 + $0x628] sm:$0xff] }
 0x263   :  { %1659 = vmatpush.msrb.mxu2 %v1312_v24  ;;  %1818 = vmatpush.msrb.mxu1 %v1749_v26  ;;  %v1972_v24 = vld [vmem:[%s5523_s7 + $0x9f0] sm:$0xff]  ;;  %v1294_v26 = vld [vmem:[%s5523_s7 + $0x58] sm:$0xff] }
 0x264   :  { %1882 = vmatpush.msra.mxu0 %v1742_v43  ;;  %1865 = vmatpush.msra.mxu3 %v1799_v27  ;;  %v1110_v43 = vpop.f32.mrf.mxu2  ;;  %v1731_v27 = vld [vmem:[%s5523_s7 + $0x650] sm:$0xff] }
 0x265   :  { %1660 = vmatpush.msrb.mxu2 %v1310_v28  ;;  %1819 = vmatpush.msrb.mxu1 %v1747_v29  ;;  %v1724_v28 = vld [vmem:[%s5523_s7 + $0x618] sm:$0xff]  ;;  %v1970_v29 = vld [vmem:[%s5523_s7 + $0x9e0] sm:$0xff] }
 0x266   :  { %1883 = vmatpush.msra.mxu0 %v1740_v30  ;;  %1866 = vmatpush.msra.mxu3 %v1797_v33  ;;  %v1729_v30 = vld [vmem:[%s5523_s7 + $0x640] sm:$0xff]  ;;  %v1722_v33 = vld [vmem:[%s5523_s7 + $0x608] sm:$0xff] }
 0x267   :  { %1661 = vmatpush.msrb.mxu2 %v1308_v9  ;;  %1820 = vmatpush.msrb.mxu1 %v1745_v47  ;;  %v1111_v9 = vadd.f32 %v1110_v43, %v3595_v41  ;;  %v1968_v47 = vld [vmem:[%s5523_s7 + $0x9d0] sm:$0xff]  ;;  %v1773_v43 = vld [vmem:[%s5523_s7 + $0x7a0] sm:$0xff] }
 0x268   :  { %1884 = vmatpush.msra.mxu0 %v1738_v18  ;;  %1867 = vmatpush.msra.mxu3 %v1795_v42  ;;  %v1139_v32 = vpop.f32.mrf.mxu3  ;;  %v1250_v18 = vmax.f32 %v3715_v3, 0.0  ;;  %v2004_v42 = vld [vmem:[%s5523_s7 + $0xaf0] sm:$0xff]  ;;  %v1966_v3 = vld [vmem:[%s5523_s7 + $0x9c0] sm:$0xff] }
 0x269   :  { %1594 = vmatmul.f32.vlgmr.msra.gmra.mxu2 %v1249_v63  ;;  %1654 = vmatmul.f32.vlgmr.msra.gmra.mxu1 %v1246_v17  ;;  %v1140_v45 = vadd.f32 %v1139_v32, %v1105_v19  ;;  %v1207_v63 = vadd.f32 %v3947_v54, %v1172_v37  ;;  %v1789_v54 = vld [vmem:[%s5523_s7 + $0x820] sm:$0xff]  ;;  %v1290_v19 = vld [vmem:[%s5523_s7 + $0x38] sm:$0xff]  ;;  %v1727_v41 = vld [vmem:[%s5523_s7 + $0x630] sm:$0xff] }
 0x26a   :  { %1662 = vmatpush.msrb.mxu2 %v1306_v40  ;;  %1821 = vmatpush.msrb.mxu1 %v1743_v6  ;;  %v1733_v17 = vld [vmem:[%s5523_s7 + $0x660] sm:$0xff] }
 0x26b   :  { %1885 = vmatpush.msra.mxu0 %v1736_v39  ;;  %v4223_v25 = vadd.f32 %v4094_v36, %v1140_v45  ;;  %1868 = vmatpush.msra.mxu3 %v1793_v5  ;;  %v4251_v4 = vadd.f32 %v3945_v52, %v1207_v63  ;;  %v1785_v52 = vld [vmem:[%s5523_s7 + $0x800] sm:$0xff]  ;;  %v1288_v39 = vld [vmem:[%s5523_s7 + $0x28] sm:$0xff]  ;;  %v1964_v45 = vld [vmem:[%s5523_s7 + $0x9b0] sm:$0xff] }
 0x26c   :  { %1663 = vmatpush.msrb.mxu2 %v1304_v10  ;;  %1822 = vmatpush.msrb.mxu1 %v1741_v16  ;;  %v2002_v6 = vld [vmem:[%s5523_s7 + $0xae0] sm:$0xff]  ;;  %v2000_v10 = vld [vmem:[%s5523_s7 + $0xad0] sm:$0xff]  ;;  %v1286_v16 = vld [vmem:[%s5523_s7 + $0x18] sm:$0xff] }
 0x26d   :  { %1886 = vmatpush.msra.mxu0 %v1734_v55  ;;  %1869 = vmatpush.msra.mxu3 %v1791_v57  ;;  %v1252_v21 = vmax.f32 %v4251_v4, 0.0  ;;  %v1725_v5 = vld [vmem:[%s5523_s7 + $0x620] sm:$0xff]  ;;  %v1284_v63 = vld [vmem:[%s5523_s7 + $0x8] sm:$0xff]  ;;  %v2241_v4 = vld [vmem:[%s5523_s7 + $0xe70] sm:$0xff] }
 0x26e   :  { %1664 = vmatpush.msrb.mxu2 %v1302_v46  ;;  %1823 = vmatpush.msrb.mxu1 %v1739_v44  ;;  %v1962_v55 = vld [vmem:[%s5523_s7 + $0x9a0] sm:$0xff]  ;;  %v1960_v44 = vld [vmem:[%s5523_s7 + $0x990] sm:$0xff] }
 0x26f   :  { %1887 = vmatpush.msra.mxu0 %v1732_v59  ;;  %1870 = vmatpush.msra.mxu3 %v1789_v54  ;;  %v1998_v57 = vld [vmem:[%s5523_s7 + $0xac0] sm:$0xff]  ;;  %v1783_v59 = vld [vmem:[%s5523_s7 + $0x7f0] sm:$0xff]  ;;  %v1784_v54 = vld [vmem:[%s5523_s7 + $0x7f8] sm:$0xff] }
 0x270   :  { %1665 = vmatpush.msrb.mxu2 %v1300_v61  ;;  %1824 = vmatpush.msrb.mxu1 %v1737_v34  ;;  %v1142_v23 = vpop.f32.mrf.mxu3  ;;  %v1721_v46 = vld [vmem:[%s5523_s7 + $0x600] sm:$0xff]  ;;  %v1996_v61 = vld [vmem:[%s5523_s7 + $0xab0] sm:$0xff] }
 0x271   :  { %1888 = vmatpush.msra.mxu0 %v1730_v0  ;;  %1871 = vmatpush.msra.mxu3 %v1787_v60  ;;  %v1143_v13 = vadd.f32 %v1142_v23, %v1108_v2  ;;  %v1958_v34 = vld [vmem:[%s5523_s7 + $0x980] sm:$0xff]  ;;  %v1782_v60 = vld [vmem:[%s5523_s7 + $0x7e8] sm:$0xff] }
 0x272   :  { %1666 = vmatpush.msrb.mxu2 %v1298_v7  ;;  %1825 = vmatpush.msrb.mxu1 %v1735_v49  ;;  %v1781_v0 = vld [vmem:[%s5523_s7 + $0x7e0] sm:$0xff]  ;;  %v1780_v7 = vld [vmem:[%s5523_s7 + $0x7d8] sm:$0xff]  ;;  %v1992_v49 = vld [vmem:[%s5523_s7 + $0xa90] sm:$0xff] }
 0x273   :  { %1889 = vmatpush.msra.mxu0 %v1728_v8  ;;  %v4276_v22 = vadd.f32 %v4094_v36, %v1143_v13  ;;  %1872 = vmatpush.msra.mxu3 %v1785_v52  ;;  %v1994_v2 = vld [vmem:[%s5523_s7 + $0xaa0] sm:$0xff]  ;;  %v1778_v52 = vld [vmem:[%s5523_s7 + $0x7c8] sm:$0xff] }
 0x274   :  { %1667 = vmatpush.msrb.mxu2 %v1296_v31  ;;  %1826 = vmatpush.msrb.mxu1 %v1733_v17  ;;  %v1954_v8 = vld [vmem:[%s5523_s7 + $0x960] sm:$0xff]  ;;  %v1952_v31 = vld [vmem:[%s5523_s7 + $0x950] sm:$0xff] }
 0x275   :  { %1873 = vmatmul.f32.vlgmr.msra.gmra.mxu3 %v1252_v21  ;;  %1890 = vmatpush.msra.mxu0 %v1726_v20  ;;  %v1777_v23 = vld [vmem:[%s5523_s7 + $0x7c0] sm:$0xff]  ;;  %v1775_v17 = vld [vmem:[%s5523_s7 + $0x7b0] sm:$0xff]  ;;  %v1776_v20 = vld [vmem:[%s5523_s7 + $0x7b8] sm:$0xff] }
 0x276   :  { %2038 = vmatpush.msrb.mxu3 %v1972_v24  ;;  %1668 = vmatpush.msrb.mxu2 %v1294_v26  ;;  %v1990_v13 = vld [vmem:[%s5523_s7 + $0xa80] sm:$0xff]  ;;  %v1988_v24 = vld [vmem:[%s5523_s7 + $0xa70] sm:$0xff] }
 0x277   :  { %1827 = vmatpush.msrb.mxu1 %v1731_v27  ;;  %1891 = vmatpush.msra.mxu0 %v1724_v28  ;;  %v1950_v26 = vld [vmem:[%s5523_s7 + $0x940] sm:$0xff]  ;;  %v1774_v27 = vld [vmem:[%s5523_s7 + $0x7a8] sm:$0xff] }
 0x278   :  { %2039 = vmatpush.msrb.mxu3 %v1970_v29  ;;  %1669 = vmatpush.msrb.mxu2 %v1292_v11  ;;  %v1145_v37 = vpop.f32.mrf.mxu3  ;;  %v1986_v28 = vld [vmem:[%s5523_s7 + $0xa60] sm:$0xff]  ;;  %v1948_v29 = vld [vmem:[%s5523_s7 + $0x930] sm:$0xff] }
 0x279   :  { %1828 = vmatpush.msrb.mxu1 %v1729_v30  ;;  %1892 = vmatpush.msra.mxu0 %v1722_v33  ;;  %v1146_v40 = vadd.f32 %v1145_v37, %v1111_v9  ;;  %v1771_v11 = vld [vmem:[%s5523_s7 + $0x790] sm:$0xff]  ;;  %v1772_v30 = vld [vmem:[%s5523_s7 + $0x798] sm:$0xff]  ;;  %v1946_v9 = vld [vmem:[%s5523_s7 + $0x920] sm:$0xff] }
 0x27a   :  { %2040 = vmatpush.msrb.mxu3 %v1968_v47  ;;  %1893 = vmatmul.f32.vlgmr.msra.gmra.mxu0 %v1250_v18  ;;  %v1984_v33 = vld [vmem:[%s5523_s7 + $0xa50] sm:$0xff]  ;;  %v1769_v47 = vld [vmem:[%s5523_s7 + $0x780] sm:$0xff] }
 0x27b   :  { %2058 = vmatpush.msrb.mxu0 %v2004_v42  ;;  %1670 = vmatpush.msrb.mxu2 %v1290_v19  ;;  %v4328_v32 = vadd.f32 %v4094_v36, %v1146_v40  ;;  %v1982_v42 = vld [vmem:[%s5523_s7 + $0xa40] sm:$0xff]  ;;  %v1944_v19 = vld [vmem:[%s5523_s7 + $0x910] sm:$0xff] }
 0x27c   :  { %1829 = vmatpush.msrb.mxu1 %v1727_v41  ;;  %2041 = vmatpush.msrb.mxu3 %v1966_v3  ;;  %v1767_v37 = vld [vmem:[%s5523_s7 + $0x770] sm:$0xff]  ;;  %v1768_v41 = vld [vmem:[%s5523_s7 + $0x778] sm:$0xff]  ;;  %v1942_v40 = vld [vmem:[%s5523_s7 + $0x900] sm:$0xff] }
 0x27d   :  { %2059 = vmatpush.msrb.mxu0 %v2002_v6  ;;  %1671 = vmatpush.msrb.mxu2 %v1288_v39  ;;  %v1980_v3 = vld [vmem:[%s5523_s7 + $0xa30] sm:$0xff]  ;;  %v1765_v6 = vld [vmem:[%s5523_s7 + $0x760] sm:$0xff]  ;;  %v1766_v39 = vld [vmem:[%s5523_s7 + $0x768] sm:$0xff] }
 0x27e   :  { %1830 = vmatpush.msrb.mxu1 %v1725_v5  ;;  %2042 = vmatpush.msrb.mxu3 %v1964_v45  ;;  %v1978_v5 = vld [vmem:[%s5523_s7 + $0xa20] sm:$0xff]  ;;  %v1253_v45 = vmax.f32 %v3769_v12, 0.0  ;;  %v2398_v12 = vld [vmem:[%s5523_s7 + $0xf70] sm:$0xff] }
 0x27f   :  { %2060 = vmatpush.msrb.mxu0 %v2000_v10  ;;  %1672 = vmatpush.msrb.mxu2 %v1286_v16  ;;  %v2005_v10 = vld [vmem:[%s5523_s7 + $0xaf8] sm:$0xff]  ;;  %v1763_v16 = vld [vmem:[%s5523_s7 + $0x750] sm:$0xff] }
 0x280   :  { %1831 = vmatpush.msrb.mxu1 %v1723_v48  ;;  %2043 = vmatpush.msrb.mxu3 %v1962_v55  ;;  %v1764_v48 = vld [vmem:[%s5523_s7 + $0x758] sm:$0xff]  ;;  %v1976_v55 = vld [vmem:[%s5523_s7 + $0xa10] sm:$0xff] }
 0x281   :  { %2061 = vmatpush.msrb.mxu0 %v1998_v57  ;;  %1673 = vmatpush.msrb.mxu2 %v1284_v63  ;;  %v924_v57 = vadd.f32 %v3481_v53, %v3473_v50  ;;  %v2003_v63 = vld [vmem:[%s5523_s7 + $0xae8] sm:$0xff]  ;;  %v1974_v50 = vld [vmem:[%s5523_s7 + $0xa00] sm:$0xff] }
 0x282   :  { %1832 = vmatpush.msrb.mxu1 %v1721_v46  ;;  %2044 = vmatpush.msrb.mxu3 %v1960_v44  ;;  %v1761_v46 = vld [vmem:[%s5523_s7 + $0x740] sm:$0xff]  ;;  %v1762_v44 = vld [vmem:[%s5523_s7 + $0x748] sm:$0xff] }
 0x283   :  { %1674 = vmatmul.f32.vlgmr.msrb.gmra.mxu2 %v1244_v58  ;;  %1833 = vmatmul.f32.vlgmr.msrb.gmra.mxu1 %v1250_v18  ;;  %v1779_v58 = vld [vmem:[%s5523_s7 + $0x7d0] sm:$0xff]  ;;  %v1770_v18 = vld [vmem:[%s5523_s7 + $0x788] sm:$0xff]  ;;  %v1102_v53 = vadd.f32 %v4115_v38, %v924_v57 }
 0x284   :  { %1837 = vmatpush.msra.mxu2 %v1783_v59  ;;  %1897 = vmatpush.msra.mxu1 %v1784_v54  ;;  %v2001_v59 = vld [vmem:[%s5523_s7 + $0xad8] sm:$0xff]  ;;  %v1254_v54 = vmax.f32 %v4223_v25, 0.0  ;;  %v2024_v57 = vld [vmem:[%s5523_s7 + $0xb90] sm:$0xff]  ;;  %v2007_v25 = vld [vmem:[%s5523_s7 + $0xb08] sm:$0xff] }
 0x285   :  { %2062 = vmatpush.msrb.mxu0 %v1996_v61  ;;  %2045 = vmatpush.msrb.mxu3 %v1958_v34  ;;  %v2037_v61 = vld [vmem:[%s5523_s7 + $0xbf8] sm:$0xff]  ;;  %v1759_v34 = vld [vmem:[%s5523_s7 + $0x730] sm:$0xff]  ;;  %v1137_v38 = vadd.f32 %v4153_v62, %v1102_v53  ;;  %v1757_v62 = vld [vmem:[%s5523_s7 + $0x720] sm:$0xff] }
 0x286   :  { %1838 = vmatpush.msra.mxu2 %v1781_v0  ;;  %1898 = vmatpush.msra.mxu1 %v1782_v60  ;;  %v1760_v0 = vld [vmem:[%s5523_s7 + $0x738] sm:$0xff]  ;;  %v1999_v60 = vld [vmem:[%s5523_s7 + $0xac8] sm:$0xff] }
 0x287   :  { %2063 = vmatpush.msrb.mxu0 %v1994_v2  ;;  %2046 = vmatpush.msrb.mxu3 %v1956_v15  ;;  %v2035_v2 = vld [vmem:[%s5523_s7 + $0xbe8] sm:$0xff] }
 0x288   :  { %1839 = vmatpush.msra.mxu2 %v1779_v58  ;;  %1899 = vmatpush.msra.mxu1 %v1780_v7  ;;  %v1758_v15 = vld [vmem:[%s5523_s7 + $0x728] sm:$0xff]  ;;  %v1997_v58 = vld [vmem:[%s5523_s7 + $0xab8] sm:$0xff] }
 0x289   :  { %2064 = vmatpush.msrb.mxu0 %v1992_v49  ;;  %2047 = vmatpush.msrb.mxu3 %v1954_v8  ;;  %v2033_v7 = vld [vmem:[%s5523_s7 + $0xbd8] sm:$0xff]  ;;  %v1755_v49 = vld [vmem:[%s5523_s7 + $0x710] sm:$0xff]  ;;  %v1233_v8 = vadd.f32 %v4094_v36, %v1137_v38  ;;  %v1753_v36 = vld [vmem:[%s5523_s7 + $0x700] sm:$0xff] }
 0x28a   :  { %1840 = vmatpush.msra.mxu2 %v1777_v23  ;;  %1900 = vmatpush.msra.mxu1 %v1778_v52  ;;  %v1756_v23 = vld [vmem:[%s5523_s7 + $0x718] sm:$0xff]  ;;  %v1995_v52 = vld [vmem:[%s5523_s7 + $0xaa8] sm:$0xff] }
 0x28b   :  { %2065 = vmatpush.msrb.mxu0 %v1990_v13  ;;  %2048 = vmatpush.msrb.mxu3 %v1952_v31  ;;  %v2031_v13 = vld [vmem:[%s5523_s7 + $0xbc8] sm:$0xff]  ;;  %v2013_v38 = vld [vmem:[%s5523_s7 + $0xb38] sm:$0xff] }
 0x28c   :  { %1841 = vmatpush.msra.mxu2 %v1775_v17  ;;  %1901 = vmatpush.msra.mxu1 %v1776_v20  ;;  %v1754_v31 = vld [vmem:[%s5523_s7 + $0x708] sm:$0xff]  ;;  %v1993_v17 = vld [vmem:[%s5523_s7 + $0xa98] sm:$0xff]  ;;  %v1251_v20 = vmax.f32 %v1233_v8, 0.0  ;;  %v2255_v8 = vld [vmem:[%s5523_s7 + $0xee0] sm:$0xff] }
 0x28d   :  { %2066 = vmatpush.msrb.mxu0 %v1988_v24  ;;  %2049 = vmatpush.msrb.mxu3 %v1950_v26  ;;  %v1816_v24 = vld [vmem:[%s5523_s7 + $0x8f8] sm:$0xff]  ;;  %v2036_v26 = vld [vmem:[%s5523_s7 + $0xbf0] sm:$0xff]  ;;  %v2015_v53 = vld [vmem:[%s5523_s7 + $0xb48] sm:$0xff] }
 0x28e   :  { %1842 = vmatpush.msra.mxu2 %v1773_v43  ;;  %1902 = vmatpush.msra.mxu1 %v1774_v27  ;;  %v2029_v43 = vld [vmem:[%s5523_s7 + $0xbb8] sm:$0xff]  ;;  %v1991_v27 = vld [vmem:[%s5523_s7 + $0xa88] sm:$0xff] }
 0x28f   :  { %2067 = vmatpush.msrb.mxu0 %v1986_v28  ;;  %2050 = vmatpush.msrb.mxu3 %v1948_v29  ;;  %v1814_v28 = vld [vmem:[%s5523_s7 + $0x8e8] sm:$0xff]  ;;  %v2034_v29 = vld [vmem:[%s5523_s7 + $0xbe0] sm:$0xff] }
 0x290   :  { %1843 = vmatpush.msra.mxu2 %v1771_v11  ;;  %1903 = vmatpush.msra.mxu1 %v1772_v30  ;;  %v2027_v11 = vld [vmem:[%s5523_s7 + $0xba8] sm:$0xff]  ;;  %v1989_v30 = vld [vmem:[%s5523_s7 + $0xa78] sm:$0xff] }
 0x291   :  { %2068 = vmatpush.msrb.mxu0 %v1984_v33  ;;  %2051 = vmatpush.msrb.mxu3 %v1946_v9  ;;  %v1812_v33 = vld [vmem:[%s5523_s7 + $0x8d8] sm:$0xff]  ;;  %v2032_v9 = vld [vmem:[%s5523_s7 + $0xbd0] sm:$0xff] }
 0x292   :  { %1844 = vmatpush.msra.mxu2 %v1769_v47  ;;  %1904 = vmatpush.msra.mxu1 %v1770_v18  ;;  %v2025_v47 = vld [vmem:[%s5523_s7 + $0xb98] sm:$0xff]  ;;  %v1987_v18 = vld [vmem:[%s5523_s7 + $0xa68] sm:$0xff] }
 0x293   :  { %2069 = vmatpush.msrb.mxu0 %v1982_v42  ;;  %2052 = vmatpush.msrb.mxu3 %v1944_v19  ;;  %v1810_v42 = vld [vmem:[%s5523_s7 + $0x8c8] sm:$0xff]  ;;  %v2030_v19 = vld [vmem:[%s5523_s7 + $0xbc0] sm:$0xff] }
 0x294   :  { %1845 = vmatpush.msra.mxu2 %v1767_v37  ;;  %1905 = vmatpush.msra.mxu1 %v1768_v41  ;;  %v2023_v37 = vld [vmem:[%s5523_s7 + $0xb88] sm:$0xff]  ;;  %v1985_v41 = vld [vmem:[%s5523_s7 + $0xa58] sm:$0xff] }
 0x295   :  { %2070 = vmatpush.msrb.mxu0 %v1980_v3  ;;  %2053 = vmatpush.msrb.mxu3 %v1942_v40  ;;  %v1808_v3 = vld [vmem:[%s5523_s7 + $0x8b8] sm:$0xff]  ;;  %v2028_v40 = vld [vmem:[%s5523_s7 + $0xbb0] sm:$0xff] }
 0x296   :  { %1846 = vmatpush.msra.mxu2 %v1765_v6  ;;  %1906 = vmatpush.msra.mxu1 %v1766_v39  ;;  %v2021_v6 = vld [vmem:[%s5523_s7 + $0xb78] sm:$0xff]  ;;  %v1983_v39 = vld [vmem:[%s5523_s7 + $0xa48] sm:$0xff] }
 0x297   :  { %2054 = vmatmul.f32.vlgmr.msrb.gmra.mxu3 %v1253_v45  ;;  %2071 = vmatpush.msrb.mxu0 %v1978_v5  ;;  %v1806_v5 = vld [vmem:[%s5523_s7 + $0x8a8] sm:$0xff] }
 0x298   :  { %2118 = vmatpush.msra.mxu3 %v2005_v10  ;;  %1847 = vmatpush.msra.mxu2 %v1763_v16  ;;  %v2026_v10 = vld [vmem:[%s5523_s7 + $0xba0] sm:$0xff]  ;;  %v2019_v16 = vld [vmem:[%s5523_s7 + $0xb68] sm:$0xff] }
 0x299   :  { %1907 = vmatpush.msra.mxu1 %v1764_v48  ;;  %2072 = vmatpush.msrb.mxu0 %v1976_v55  ;;  %v1981_v48 = vld [vmem:[%s5523_s7 + $0xa38] sm:$0xff] }
 0x29a   :  { %2119 = vmatpush.msra.mxu3 %v2003_v63  ;;  %1848 = vmatpush.msra.mxu2 %v1761_v46  ;;  %v1804_v55 = vld [vmem:[%s5523_s7 + $0x898] sm:$0xff]  ;;  %v1979_v46 = vld [vmem:[%s5523_s7 + $0xa28] sm:$0xff] }
 0x29b   :  { %1908 = vmatpush.msra.mxu1 %v1762_v44  ;;  %2073 = vmatpush.msrb.mxu0 %v1974_v50  ;;  %v2017_v63 = vld [vmem:[%s5523_s7 + $0xb58] sm:$0xff]  ;;  %v1802_v44 = vld [vmem:[%s5523_s7 + $0x888] sm:$0xff]  ;;  %v2022_v50 = vld [vmem:[%s5523_s7 + $0xb80] sm:$0xff] }
 0x29c   :  { %2120 = vmatpush.msra.mxu3 %v2001_v59  ;;  %2074 = vmatmul.f32.vlgmr.msrb.gmra.mxu0 %v1254_v54  ;;  %v1977_v59 = vld [vmem:[%s5523_s7 + $0xa18] sm:$0xff] }
 0x29d   :  { %2138 = vmatpush.msra.mxu0 %v2037_v61  ;;  %1849 = vmatpush.msra.mxu2 %v1759_v34  ;;  %v1800_v61 = vld [vmem:[%s5523_s7 + $0x878] sm:$0xff]  ;;  %v2020_v34 = vld [vmem:[%s5523_s7 + $0xb70] sm:$0xff] }
 0x29e   :  { %1909 = vmatpush.msra.mxu1 %v1760_v0  ;;  %2121 = vmatpush.msra.mxu3 %v1999_v60  ;;  %v1975_v0 = vld [vmem:[%s5523_s7 + $0xa08] sm:$0xff] }
 0x29f   :  { %2139 = vmatpush.msra.mxu0 %v2035_v2  ;;  %1850 = vmatpush.msra.mxu2 %v1757_v62  ;;  %v1798_v60 = vld [vmem:[%s5523_s7 + $0x868] sm:$0xff]  ;;  %v2018_v2 = vld [vmem:[%s5523_s7 + $0xb60] sm:$0xff] }
 0x2a0   :  { %1910 = vmatpush.msra.mxu1 %v1758_v15  ;;  %2122 = vmatpush.msra.mxu3 %v1997_v58  ;;  %v2011_v62 = vld [vmem:[%s5523_s7 + $0xb28] sm:$0xff]  ;;  %v2257_v15 = vld [vmem:[%s5523_s7 + $0xef0] sm:$0xff]  ;;  %v1796_v58 = vld [vmem:[%s5523_s7 + $0x858] sm:$0xff] }
 0x2a1   :  { %2140 = vmatpush.msra.mxu0 %v2033_v7  ;;  %1851 = vmatpush.msra.mxu2 %v1755_v49  ;;  %v2016_v7 = vld [vmem:[%s5523_s7 + $0xb50] sm:$0xff]  ;;  %v2009_v49 = vld [vmem:[%s5523_s7 + $0xb18] sm:$0xff] }
 0x2a2   :  { %1911 = vmatpush.msra.mxu1 %v1756_v23  ;;  %2123 = vmatpush.msra.mxu3 %v1995_v52  ;;  %v1794_v23 = vld [vmem:[%s5523_s7 + $0x848] sm:$0xff]  ;;  %v2014_v52 = vld [vmem:[%s5523_s7 + $0xb40] sm:$0xff] }
 0x2a3   :  { %2141 = vmatpush.msra.mxu0 %v2031_v13  ;;  %1852 = vmatpush.msra.mxu2 %v1753_v36  ;;  %v1255_v13 = vmax.f32 %v4053_v56, 0.0  ;;  %v2194_v36 = vld [vmem:[%s5523_s7 + $0xcf8] sm:$0xff]  ;;  %v2251_v56 = vld [vmem:[%s5523_s7 + $0xec0] sm:$0xff] }
 0x2a4   :  { %1912 = vmatpush.msra.mxu1 %v1754_v31  ;;  %2124 = vmatpush.msra.mxu3 %v1993_v17  ;;  %v1792_v31 = vld [vmem:[%s5523_s7 + $0x838] sm:$0xff]  ;;  %v2012_v17 = vld [vmem:[%s5523_s7 + $0xb30] sm:$0xff] }
 0x2a5   :  { %1853 = vmatmul.f32.vlgmr.msra.gmra.mxu2 %v1251_v20  ;;  %1913 = vmatmul.f32.vlgmr.msra.gmra.mxu1 %v1251_v20  ;;  %v2192_v20 = vld [vmem:[%s5523_s7 + $0xce8] sm:$0xff] }
 0x2a6   :  { %1917 = vmatpush.msrb.mxu2 %v1816_v24  ;;  %2078 = vmatpush.msrb.mxu1 %v2036_v26  ;;  %v1790_v24 = vld [vmem:[%s5523_s7 + $0x828] sm:$0xff]  ;;  %v2010_v26 = vld [vmem:[%s5523_s7 + $0xb20] sm:$0xff] }
 0x2a7   :  { %2142 = vmatpush.msra.mxu0 %v2029_v43  ;;  %2125 = vmatpush.msra.mxu3 %v1991_v27  ;;  %v2249_v43 = vld [vmem:[%s5523_s7 + $0xeb0] sm:$0xff]  ;;  %v2190_v27 = vld [vmem:[%s5523_s7 + $0xcd8] sm:$0xff] }
 0x2a8   :  { %1918 = vmatpush.msrb.mxu2 %v1814_v28  ;;  %2079 = vmatpush.msrb.mxu1 %v2034_v29  ;;  %v1788_v28 = vld [vmem:[%s5523_s7 + $0x818] sm:$0xff]  ;;  %v2008_v29 = vld [vmem:[%s5523_s7 + $0xb10] sm:$0xff] }
 0x2a9   :  { %2143 = vmatpush.msra.mxu0 %v2027_v11  ;;  %2126 = vmatpush.msra.mxu3 %v1989_v30  ;;  %v2247_v11 = vld [vmem:[%s5523_s7 + $0xea0] sm:$0xff]  ;;  %v2188_v30 = vld [vmem:[%s5523_s7 + $0xcc8] sm:$0xff] }
 0x2aa   :  { %1919 = vmatpush.msrb.mxu2 %v1812_v33  ;;  %2080 = vmatpush.msrb.mxu1 %v2032_v9  ;;  %v1786_v33 = vld [vmem:[%s5523_s7 + $0x808] sm:$0xff]  ;;  %v2006_v9 = vld [vmem:[%s5523_s7 + $0xb00] sm:$0xff] }
 0x2ab   :  { %2144 = vmatpush.msra.mxu0 %v2025_v47  ;;  %2127 = vmatpush.msra.mxu3 %v1987_v18  ;;  %v2245_v47 = vld [vmem:[%s5523_s7 + $0xe90] sm:$0xff]  ;;  %v1973_v18 = vld [vmem:[%s5523_s7 + $0x9f8] sm:$0xff] }
 0x2ac   :  { %1920 = vmatpush.msrb.mxu2 %v1810_v42  ;;  %2081 = vmatpush.msrb.mxu1 %v2030_v19  ;;  %v2193_v42 = vld [vmem:[%s5523_s7 + $0xcf0] sm:$0xff]  ;;  %v2186_v19 = vld [vmem:[%s5523_s7 + $0xcb8] sm:$0xff] }
 0x2ad   :  { %2145 = vmatpush.msra.mxu0 %v2023_v37  ;;  %2128 = vmatpush.msra.mxu3 %v1985_v41  ;;  %v2243_v37 = vld [vmem:[%s5523_s7 + $0xe80] sm:$0xff]  ;;  %v1971_v41 = vld [vmem:[%s5523_s7 + $0x9e8] sm:$0xff] }
 0x2ae   :  { %1921 = vmatpush.msrb.mxu2 %v1808_v3  ;;  %2082 = vmatpush.msrb.mxu1 %v2028_v40  ;;  %v2191_v3 = vld [vmem:[%s5523_s7 + $0xce0] sm:$0xff]  ;;  %v2184_v40 = vld [vmem:[%s5523_s7 + $0xca8] sm:$0xff] }
 0x2af   :  { %2146 = vmatpush.msra.mxu0 %v2021_v6  ;;  %2129 = vmatpush.msra.mxu3 %v1983_v39  ;;  %v2189_v6 = vld [vmem:[%s5523_s7 + $0xcd0] sm:$0xff]  ;;  %v2182_v39 = vld [vmem:[%s5523_s7 + $0xc98] sm:$0xff] }
 0x2b0   :  { %1922 = vmatpush.msrb.mxu2 %v1806_v5  ;;  %2083 = vmatpush.msrb.mxu1 %v2026_v10  ;;  %v2239_v5 = vld [vmem:[%s5523_s7 + $0xe60] sm:$0xff]  ;;  %v1967_v10 = vld [vmem:[%s5523_s7 + $0x9c8] sm:$0xff] }
 0x2b1   :  { %2147 = vmatpush.msra.mxu0 %v2019_v16  ;;  %2130 = vmatpush.msra.mxu3 %v1981_v48  ;;  %v2187_v16 = vld [vmem:[%s5523_s7 + $0xcc0] sm:$0xff]  ;;  %v2180_v48 = vld [vmem:[%s5523_s7 + $0xc88] sm:$0xff] }
 0x2b2   :  { %1923 = vmatpush.msrb.mxu2 %v1804_v55  ;;  %2084 = vmatpush.msrb.mxu1 %v2024_v57  ;;  %v2237_v55 = vld [vmem:[%s5523_s7 + $0xe50] sm:$0xff]  ;;  %v1965_v57 = vld [vmem:[%s5523_s7 + $0x9b8] sm:$0xff] }
 0x2b3   :  { %2148 = vmatpush.msra.mxu0 %v2017_v63  ;;  %2131 = vmatpush.msra.mxu3 %v1979_v46  ;;  %v2185_v63 = vld [vmem:[%s5523_s7 + $0xcb0] sm:$0xff]  ;;  %v2178_v46 = vld [vmem:[%s5523_s7 + $0xc78] sm:$0xff] }
 0x2b4   :  { %1924 = vmatpush.msrb.mxu2 %v1802_v44  ;;  %2085 = vmatpush.msrb.mxu1 %v2022_v50  ;;  %v2235_v44 = vld [vmem:[%s5523_s7 + $0xe40] sm:$0xff]  ;;  %v1963_v50 = vld [vmem:[%s5523_s7 + $0x9a8] sm:$0xff] }
 0x2b5   :  { %2149 = vmatpush.msra.mxu0 %v2015_v53  ;;  %2132 = vmatpush.msra.mxu3 %v1977_v59  ;;  %v2183_v53 = vld [vmem:[%s5523_s7 + $0xca0] sm:$0xff]  ;;  %v2176_v59 = vld [vmem:[%s5523_s7 + $0xc68] sm:$0xff] }
 0x2b6   :  { %1925 = vmatpush.msrb.mxu2 %v1800_v61  ;;  %2086 = vmatpush.msrb.mxu1 %v2020_v34  ;;  %v2233_v61 = vld [vmem:[%s5523_s7 + $0xe30] sm:$0xff]  ;;  %v1961_v34 = vld [vmem:[%s5523_s7 + $0x998] sm:$0xff] }
 0x2b7   :  { %2150 = vmatpush.msra.mxu0 %v2013_v38  ;;  %2133 = vmatpush.msra.mxu3 %v1975_v0  ;;  %v2181_v38 = vld [vmem:[%s5523_s7 + $0xc90] sm:$0xff]  ;;  %v2174_v0 = vld [vmem:[%s5523_s7 + $0xc58] sm:$0xff] }
 0x2b8   :  { %1926 = vmatpush.msrb.mxu2 %v1798_v60  ;;  %2087 = vmatpush.msrb.mxu1 %v2018_v2  ;;  %v2231_v60 = vld [vmem:[%s5523_s7 + $0xe20] sm:$0xff]  ;;  %v1959_v2 = vld [vmem:[%s5523_s7 + $0x988] sm:$0xff] }
 0x2b9   :  { %2134 = vmatmul.f32.vlgmr.msra.gmra.mxu3 %v1254_v54  ;;  %2151 = vmatpush.msra.mxu0 %v2011_v62  ;;  %v2253_v54 = vld [vmem:[%s5523_s7 + $0xed0] sm:$0xff]  ;;  %v2179_v62 = vld [vmem:[%s5523_s7 + $0xc80] sm:$0xff] }
 0x2ba   :  { %2299 = vmatpush.msrb.mxu3 %v2257_v15  ;;  %1927 = vmatpush.msrb.mxu2 %v1796_v58  ;;  %v2172_v15 = vld [vmem:[%s5523_s7 + $0xc48] sm:$0xff]  ;;  %v2229_v58 = vld [vmem:[%s5523_s7 + $0xe10] sm:$0xff] }
 0x2bb   :  { %2088 = vmatpush.msrb.mxu1 %v2016_v7  ;;  %2152 = vmatpush.msra.mxu0 %v2009_v49  ;;  %v1957_v7 = vld [vmem:[%s5523_s7 + $0x978] sm:$0xff]  ;;  %v2177_v49 = vld [vmem:[%s5523_s7 + $0xc70] sm:$0xff] }
 0x2bc   :  { %2300 = vmatpush.msrb.mxu3 %v2255_v8  ;;  %1928 = vmatpush.msrb.mxu2 %v1794_v23  ;;  %v2170_v8 = vld [vmem:[%s5523_s7 + $0xc38] sm:$0xff]  ;;  %v2227_v23 = vld [vmem:[%s5523_s7 + $0xe00] sm:$0xff] }
 0x2bd   :  { %2089 = vmatpush.msrb.mxu1 %v2014_v52  ;;  %2153 = vmatpush.msra.mxu0 %v2007_v25  ;;  %v1955_v52 = vld [vmem:[%s5523_s7 + $0x968] sm:$0xff]  ;;  %v2175_v25 = vld [vmem:[%s5523_s7 + $0xc60] sm:$0xff] }
 0x2be   :  { %2301 = vmatpush.msrb.mxu3 %v2253_v54  ;;  %2154 = vmatmul.f32.vlgmr.msra.gmra.mxu0 %v1255_v13  ;;  %v2168_v54 = vld [vmem:[%s5523_s7 + $0xc28] sm:$0xff] }
 0x2bf   :  { %2319 = vmatpush.msrb.mxu0 %v2194_v36  ;;  %1929 = vmatpush.msrb.mxu2 %v1792_v31  ;;  %v2414_v36 = vld [vmem:[%s5523_s7 + $0xff0] sm:$0xff]  ;;  %v1953_v31 = vld [vmem:[%s5523_s7 + $0x958] sm:$0xff] }
 0x2c0   :  { %2090 = vmatpush.msrb.mxu1 %v2012_v17  ;;  %2302 = vmatpush.msrb.mxu3 %v2251_v56  ;;  %v4886_v17 = vpop.f32.mrf.mxu2  ;;  %v2173_v56 = vld [vmem:[%s5523_s7 + $0xc50] sm:$0xff] }
 0x2c1   :  { %2320 = vmatpush.msrb.mxu0 %v2192_v20  ;;  %1930 = vmatpush.msrb.mxu2 %v1790_v24  ;;  %v2166_v20 = vld [vmem:[%s5523_s7 + $0xc18] sm:$0xff]  ;;  %v2412_v24 = vld [vmem:[%s5523_s7 + $0xfe0] sm:$0xff] }
 0x2c2   :  { %2091 = vmatpush.msrb.mxu1 %v2010_v26  ;;  %2303 = vmatpush.msrb.mxu3 %v2249_v43  ;;  %v1951_v26 = vld [vmem:[%s5523_s7 + $0x948] sm:$0xff]  ;;  %v2171_v43 = vld [vmem:[%s5523_s7 + $0xc40] sm:$0xff] }
 0x2c3   :  { %2321 = vmatpush.msrb.mxu0 %v2190_v27  ;;  %1931 = vmatpush.msrb.mxu2 %v1788_v28  ;;  %v2164_v27 = vld [vmem:[%s5523_s7 + $0xc08] sm:$0xff]  ;;  %v1555_v28 = vpop.f32.mrf.mxu0 }
 0x2c4   :  { %2092 = vmatpush.msrb.mxu1 %v2008_v29  ;;  %2304 = vmatpush.msrb.mxu3 %v2247_v11  ;;  %v2410_v29 = vld [vmem:[%s5523_s7 + $0xfd0] sm:$0xff] }
 0x2c5   :  { %2322 = vmatpush.msrb.mxu0 %v2188_v30  ;;  %1932 = vmatpush.msrb.mxu2 %v1786_v33  ;;  %v1256_v30 = vmax.f32 %v3815_v51, 0.0  ;;  %v2446_v33 = vld [vmem:[%s5523_s7 + $0x10f0] sm:$0xff]  ;;  %v2408_v51 = vld [vmem:[%s5523_s7 + $0xfc0] sm:$0xff] }
 0x2c6   :  { %2093 = vmatpush.msrb.mxu1 %v2006_v9  ;;  %2305 = vmatpush.msrb.mxu3 %v2245_v47  ;;  %v1949_v9 = vld [vmem:[%s5523_s7 + $0x938] sm:$0xff] }
 0x2c7   :  { %1933 = vmatmul.f32.vlgmr.msrb.gmra.mxu2 %v1252_v21  ;;  %2094 = vmatmul.f32.vlgmr.msrb.gmra.mxu1 %v1255_v13  ;;  %v1969_v21 = vld [vmem:[%s5523_s7 + $0x9d8] sm:$0xff]  ;;  %v1258_v13 = vmax.f32 %v4072_v14, 0.0 }
 0x2c8   :  { %2098 = vmatpush.msra.mxu2 %v1973_v18  ;;  %2259 = vmatpush.msra.mxu1 %v2193_v42  ;;  %v2169_v18 = vld [vmem:[%s5523_s7 + $0xc30] sm:$0xff]  ;;  %v2444_v42 = vld [vmem:[%s5523_s7 + $0x10e0] sm:$0xff]  ;;  %v2407_v14 = vld [vmem:[%s5523_s7 + $0xfb8] sm:$0xff] }
 0x2c9   :  { %2323 = vmatpush.msrb.mxu0 %v2186_v19  ;;  %2306 = vmatpush.msrb.mxu3 %v2243_v37  ;;  %v1947_v19 = vld [vmem:[%s5523_s7 + $0x928] sm:$0xff]  ;;  %v2167_v37 = vld [vmem:[%s5523_s7 + $0xc20] sm:$0xff] }
 0x2ca   :  { %2099 = vmatpush.msra.mxu2 %v1971_v41  ;;  %2260 = vmatpush.msra.mxu1 %v2191_v3  ;;  %v2406_v41 = vld [vmem:[%s5523_s7 + $0xfb0] sm:$0xff] }
 0x2cb   :  { %2324 = vmatpush.msrb.mxu0 %v2184_v40  ;;  %2307 = vmatpush.msrb.mxu3 %v2241_v4  ;;  %v2442_v3 = vld [vmem:[%s5523_s7 + $0x10d0] sm:$0xff]  ;;  %v1945_v40 = vld [vmem:[%s5523_s7 + $0x918] sm:$0xff] }
 0x2cc   :  { %2100 = vmatpush.msra.mxu2 %v1969_v21  ;;  %2261 = vmatpush.msra.mxu1 %v2189_v6  ;;  %v2165_v21 = vld [vmem:[%s5523_s7 + $0xc10] sm:$0xff]  ;;  %v2404_v6 = vld [vmem:[%s5523_s7 + $0xfa0] sm:$0xff] }
 0x2cd   :  { %2325 = vmatpush.msrb.mxu0 %v2182_v39  ;;  %2308 = vmatpush.msrb.mxu3 %v2239_v5  ;;  %v2440_v39 = vld [vmem:[%s5523_s7 + $0x10c0] sm:$0xff]  ;;  %v1943_v5 = vld [vmem:[%s5523_s7 + $0x908] sm:$0xff] }
 0x2ce   :  { %2101 = vmatpush.msra.mxu2 %v1967_v10  ;;  %2262 = vmatpush.msra.mxu1 %v2187_v16  ;;  %v2163_v10 = vld [vmem:[%s5523_s7 + $0xc00] sm:$0xff]  ;;  %v2402_v16 = vld [vmem:[%s5523_s7 + $0xf90] sm:$0xff] }
 0x2cf   :  { %2326 = vmatpush.msrb.mxu0 %v2180_v48  ;;  %2309 = vmatpush.msrb.mxu3 %v2237_v55  ;;  %v2225_v48 = vld [vmem:[%s5523_s7 + $0xdf0] sm:$0xff]  ;;  %v2226_v55 = vld [vmem:[%s5523_s7 + $0xdf8] sm:$0xff] }
 0x2d0   :  { %2102 = vmatpush.msra.mxu2 %v1965_v57  ;;  %2263 = vmatpush.msra.mxu1 %v2185_v63  ;;  %v2438_v57 = vld [vmem:[%s5523_s7 + $0x10b0] sm:$0xff]  ;;  %v2400_v63 = vld [vmem:[%s5523_s7 + $0xf80] sm:$0xff] }
 0x2d1   :  { %2327 = vmatpush.msrb.mxu0 %v2178_v46  ;;  %2310 = vmatpush.msrb.mxu3 %v2235_v44  ;;  %v2223_v46 = vld [vmem:[%s5523_s7 + $0xde0] sm:$0xff]  ;;  %v2224_v44 = vld [vmem:[%s5523_s7 + $0xde8] sm:$0xff] }
 0x2d2   :  { %2103 = vmatpush.msra.mxu2 %v1963_v50  ;;  %2264 = vmatpush.msra.mxu1 %v2183_v53  ;;  %v2436_v50 = vld [vmem:[%s5523_s7 + $0x10a0] sm:$0xff]  ;;  %v2222_v53 = vld [vmem:[%s5523_s7 + $0xdd8] sm:$0xff] }
 0x2d3   :  { %2328 = vmatpush.msrb.mxu0 %v2176_v59  ;;  %2311 = vmatpush.msrb.mxu3 %v2233_v61  ;;  %v2434_v59 = vld [vmem:[%s5523_s7 + $0x1090] sm:$0xff]  ;;  %v2396_v61 = vld [vmem:[%s5523_s7 + $0xf60] sm:$0xff] }
 0x2d4   :  { %2104 = vmatpush.msra.mxu2 %v1961_v34  ;;  %2265 = vmatpush.msra.mxu1 %v2181_v38  ;;  %v2219_v38 = vld [vmem:[%s5523_s7 + $0xdc0] sm:$0xff] }
 0x2d5   :  { %2329 = vmatpush.msrb.mxu0 %v2174_v0  ;;  %2312 = vmatpush.msrb.mxu3 %v2231_v60  ;;  %v2220_v0 = vld [vmem:[%s5523_s7 + $0xdc8] sm:$0xff] }
 0x2d6   :  { %2105 = vmatpush.msra.mxu2 %v1959_v2  ;;  %2266 = vmatpush.msra.mxu1 %v2179_v62  ;;  %v2432_v2 = vld [vmem:[%s5523_s7 + $0x1080] sm:$0xff]  ;;  %v2394_v62 = vld [vmem:[%s5523_s7 + $0xf50] sm:$0xff] }
 0x2d7   :  { %2330 = vmatpush.msrb.mxu0 %v2172_v15  ;;  %2313 = vmatpush.msrb.mxu3 %v2229_v58  ;;  %v2217_v15 = vld [vmem:[%s5523_s7 + $0xdb0] sm:$0xff]  ;;  %v2218_v58 = vld [vmem:[%s5523_s7 + $0xdb8] sm:$0xff] }
 0x2d8   :  { %2106 = vmatpush.msra.mxu2 %v1957_v7  ;;  %2267 = vmatpush.msra.mxu1 %v2177_v49  ;;  %v2430_v7 = vld [vmem:[%s5523_s7 + $0x1070] sm:$0xff]  ;;  %v2392_v49 = vld [vmem:[%s5523_s7 + $0xf40] sm:$0xff] }
 0x2d9   :  { %2331 = vmatpush.msrb.mxu0 %v2170_v8  ;;  %2314 = vmatpush.msrb.mxu3 %v2227_v23  ;;  %v2215_v8 = vld [vmem:[%s5523_s7 + $0xda0] sm:$0xff]  ;;  %v2216_v23 = vld [vmem:[%s5523_s7 + $0xda8] sm:$0xff] }
 0x2da   :  { %2107 = vmatpush.msra.mxu2 %v1955_v52  ;;  %2268 = vmatpush.msra.mxu1 %v2175_v25  ;;  %v2428_v52 = vld [vmem:[%s5523_s7 + $0x1060] sm:$0xff]  ;;  %v2390_v25 = vld [vmem:[%s5523_s7 + $0xf30] sm:$0xff] }
 0x2db   :  { %2315 = vmatmul.f32.vlgmr.msrb.gmra.mxu3 %v1258_v13  ;;  %2332 = vmatpush.msrb.mxu0 %v2168_v54  ;;  %v2213_v54 = vld [vmem:[%s5523_s7 + $0xd90] sm:$0xff] }
 0x2dc   :  { %2480 = vmatpush.msra.mxu3 %v2414_v36  ;;  %2108 = vmatpush.msra.mxu2 %v1953_v31  ;;  %v1575_v11 = vpop.f32.mrf.mxu1  ;;  %v2214_v36 = vld [vmem:[%s5523_s7 + $0xd98] sm:$0xff]  ;;  %v2426_v31 = vld [vmem:[%s5523_s7 + $0x1050] sm:$0xff] }
 0x2dd   :  { %2269 = vmatpush.msra.mxu1 %v2173_v56  ;;  %2333 = vmatpush.msrb.mxu0 %v2166_v20  ;;  %v1576_v47 = vadd.f32 %v1575_v11, %v1555_v28  ;;  %v2388_v56 = vld [vmem:[%s5523_s7 + $0xf20] sm:$0xff]  ;;  %v2209_v28 = vld [vmem:[%s5523_s7 + $0xd70] sm:$0xff] }
 0x2de   :  { %2481 = vmatpush.msra.mxu3 %v2412_v24  ;;  %2109 = vmatpush.msra.mxu2 %v1951_v26  ;;  %v2211_v20 = vld [vmem:[%s5523_s7 + $0xd80] sm:$0xff]  ;;  %v2212_v24 = vld [vmem:[%s5523_s7 + $0xd88] sm:$0xff]  ;;  %v5056_v26 = vpop.f32.mrf.mxu3  ;;  %v2422_v11 = vld [vmem:[%s5523_s7 + $0x1030] sm:$0xff] }
 0x2df   :  { %2270 = vmatpush.msra.mxu1 %v2171_v43  ;;  %2334 = vmatpush.msrb.mxu0 %v2164_v27  ;;  %v2424_v43 = vld [vmem:[%s5523_s7 + $0x1040] sm:$0xff]  ;;  %v2386_v27 = vld [vmem:[%s5523_s7 + $0xf10] sm:$0xff] }
 0x2e0   :  { %2482 = vmatpush.msra.mxu3 %v2410_v29  ;;  %2335 = vmatmul.f32.vlgmr.msrb.gmra.mxu0 %v1256_v30  ;;  %v2210_v29 = vld [vmem:[%s5523_s7 + $0xd78] sm:$0xff] }
 0x2e1   :  { %2500 = vmatpush.msra.mxu0 %v2446_v33  ;;  %2110 = vmatpush.msra.mxu2 %v1949_v9  ;;  %v2207_v33 = vld [vmem:[%s5523_s7 + $0xd60] sm:$0xff]  ;;  %v2208_v9 = vld [vmem:[%s5523_s7 + $0xd68] sm:$0xff] }
 0x2e2   :  { %2271 = vmatpush.msra.mxu1 %v2169_v18  ;;  %2483 = vmatpush.msra.mxu3 %v2408_v51  ;;  %v4942_v4 = vpop.f32.mrf.mxu2  ;;  %v1259_v18 = vmax.f32 %v3864_v1, 0.0  ;;  %v2447_v51 = vld [vmem:[%s5523_s7 + $0x10f8] sm:$0xff]  ;;  %v2624_v1 = vld [vmem:[%s5525_s9 + $0x60] sm:$0xff] }
 0x2e3   :  { %2501 = vmatpush.msra.mxu0 %v2444_v42  ;;  %2111 = vmatpush.msra.mxu2 %v1947_v19  ;;  %v2205_v42 = vld [vmem:[%s5523_s7 + $0xd50] sm:$0xff]  ;;  %v2206_v19 = vld [vmem:[%s5523_s7 + $0xd58] sm:$0xff] }
 0x2e4   :  { %2272 = vmatpush.msra.mxu1 %v2167_v37  ;;  %2484 = vmatpush.msra.mxu3 %v2406_v41  ;;  %v2418_v37 = vld [vmem:[%s5523_s7 + $0x1010] sm:$0xff]  ;;  %v2445_v41 = vld [vmem:[%s5523_s7 + $0x10e8] sm:$0xff] }
 0x2e5   :  { %2502 = vmatpush.msra.mxu0 %v2442_v3  ;;  %2112 = vmatpush.msra.mxu2 %v1945_v40  ;;  %v2203_v3 = vld [vmem:[%s5523_s7 + $0xd40] sm:$0xff]  ;;  %v2204_v40 = vld [vmem:[%s5523_s7 + $0xd48] sm:$0xff] }
 0x2e6   :  { %2273 = vmatpush.msra.mxu1 %v2165_v21  ;;  %2485 = vmatpush.msra.mxu3 %v2404_v6  ;;  %v2416_v21 = vld [vmem:[%s5523_s7 + $0x1000] sm:$0xff]  ;;  %v2443_v6 = vld [vmem:[%s5523_s7 + $0x10d8] sm:$0xff] }
 0x2e7   :  { %2503 = vmatpush.msra.mxu0 %v2440_v39  ;;  %2113 = vmatpush.msra.mxu2 %v1943_v5  ;;  %v1260_v39 = vmax.f32 %v4328_v32, 0.0  ;;  %v5116_v5 = vpop.f32.mrf.mxu3  ;;  %v2234_v32 = vld [vmem:[%s5523_s7 + $0xe38] sm:$0xff] }
 0x2e8   :  { %2274 = vmatpush.msra.mxu1 %v2163_v10  ;;  %2486 = vmatpush.msra.mxu3 %v2402_v16  ;;  %v5118_v10 = vpop.f32.mrf.mxu0  ;;  %v2479_v16 = vld [vmem:[%s5523_s7 + $0x11f8] sm:$0xff] }
 0x2e9   :  { %2114 = vmatmul.f32.vlgmr.msra.gmra.mxu2 %v1253_v45  ;;  %2275 = vmatmul.f32.vlgmr.msra.gmra.mxu1 %v1256_v30  ;;  %v2221_v45 = vld [vmem:[%s5523_s7 + $0xdd0] sm:$0xff]  ;;  %v2384_v30 = vld [vmem:[%s5523_s7 + $0xf00] sm:$0xff] }
 0x2ea   :  { %2279 = vmatpush.msrb.mxu2 %v2225_v48  ;;  %2339 = vmatpush.msrb.mxu1 %v2226_v55  ;;  %v2201_v48 = vld [vmem:[%s5523_s7 + $0xd30] sm:$0xff]  ;;  %v2202_v55 = vld [vmem:[%s5523_s7 + $0xd38] sm:$0xff] }
 0x2eb   :  { %2504 = vmatpush.msra.mxu0 %v2438_v57  ;;  %2487 = vmatpush.msra.mxu3 %v2400_v63  ;;  %v2441_v57 = vld [vmem:[%s5523_s7 + $0x10c8] sm:$0xff] }
 0x2ec   :  { %2280 = vmatpush.msrb.mxu2 %v2223_v46  ;;  %2340 = vmatpush.msrb.mxu1 %v2224_v44  ;;  %v1595_v34 = vpop.f32.mrf.mxu2  ;;  %v2477_v63 = vld [vmem:[%s5523_s7 + $0x11e8] sm:$0xff]  ;;  %v2199_v46 = vld [vmem:[%s5523_s7 + $0xd20] sm:$0xff] }
 0x2ed   :  { %2505 = vmatpush.msra.mxu0 %v2436_v50  ;;  %2488 = vmatpush.msra.mxu3 %v2398_v12  ;;  %v5006_v60 = vadd.f32 %v1595_v34, %v1576_v47  ;;  %v2420_v47 = vld [vmem:[%s5523_s7 + $0x1020] sm:$0xff]  ;;  %v2200_v44 = vld [vmem:[%s5523_s7 + $0xd28] sm:$0xff]  ;;  %v2439_v50 = vld [vmem:[%s5523_s7 + $0x10b8] sm:$0xff] }
 0x2ee   :  { %2281 = vmatpush.msrb.mxu2 %v2221_v45  ;;  %2341 = vmatpush.msrb.mxu1 %v2222_v53  ;;  %v2475_v12 = vld [vmem:[%s5523_s7 + $0x11d8] sm:$0xff]  ;;  %v2197_v45 = vld [vmem:[%s5523_s7 + $0xd10] sm:$0xff]  ;;  %v2195_v34 = vld [vmem:[%s5523_s7 + $0xd00] sm:$0xff] }
 0x2ef   :  { %2506 = vmatpush.msra.mxu0 %v2434_v59  ;;  %2489 = vmatpush.msra.mxu3 %v2396_v61  ;;  %v2198_v53 = vld [vmem:[%s5523_s7 + $0xd18] sm:$0xff]  ;;  %v2437_v59 = vld [vmem:[%s5523_s7 + $0x10a8] sm:$0xff] }
 0x2f0   :  { %2282 = vmatpush.msrb.mxu2 %v2219_v38  ;;  %2342 = vmatpush.msrb.mxu1 %v2220_v0  ;;  %v2473_v61 = vld [vmem:[%s5523_s7 + $0x11c8] sm:$0xff] }
 0x2f1   :  { %2507 = vmatpush.msra.mxu0 %v2432_v2  ;;  %2490 = vmatpush.msra.mxu3 %v2394_v62  ;;  %v2196_v0 = vld [vmem:[%s5523_s7 + $0xd08] sm:$0xff]  ;;  %v2435_v2 = vld [vmem:[%s5523_s7 + $0x1098] sm:$0xff] }
 0x2f2   :  { %2283 = vmatpush.msrb.mxu2 %v2217_v15  ;;  %2343 = vmatpush.msrb.mxu1 %v2218_v58  ;;  %v1695_v15 = vpop.f32.mrf.mxu3  ;;  %v1257_v58 = vmax.f32 %v4276_v22, 0.0  ;;  %v2433_v22 = vld [vmem:[%s5523_s7 + $0x1088] sm:$0xff] }
 0x2f3   :  { %2508 = vmatpush.msra.mxu0 %v2430_v7  ;;  %2491 = vmatpush.msra.mxu3 %v2392_v49  ;;  %v2258_v7 = vld [vmem:[%s5523_s7 + $0xef8] sm:$0xff]  ;;  %v2478_v49 = vld [vmem:[%s5523_s7 + $0x11f0] sm:$0xff] }
 0x2f4   :  { %2284 = vmatpush.msrb.mxu2 %v2215_v8  ;;  %2344 = vmatpush.msrb.mxu1 %v2216_v23  ;;  %v1715_v23 = vpop.f32.mrf.mxu0 }
 0x2f5   :  { %2509 = vmatpush.msra.mxu0 %v2428_v52  ;;  %2492 = vmatpush.msra.mxu3 %v2390_v25  ;;  %v2256_v52 = vld [vmem:[%s5523_s7 + $0xee8] sm:$0xff]  ;;  %v2476_v25 = vld [vmem:[%s5523_s7 + $0x11e0] sm:$0xff] }
 0x2f6   :  { %2285 = vmatpush.msrb.mxu2 %v2213_v54  ;;  %2345 = vmatpush.msrb.mxu1 %v2214_v36  ;;  %v2469_v36 = vld [vmem:[%s5523_s7 + $0x11a8] sm:$0xff] }
 0x2f7   :  { %2510 = vmatpush.msra.mxu0 %v2426_v31  ;;  %2493 = vmatpush.msra.mxu3 %v2388_v56  ;;  %v2431_v31 = vld [vmem:[%s5523_s7 + $0x1078] sm:$0xff] }
 0x2f8   :  { %2286 = vmatpush.msrb.mxu2 %v2211_v20  ;;  %2346 = vmatpush.msrb.mxu1 %v2212_v24  ;;  %v2254_v56 = vld [vmem:[%s5523_s7 + $0xed8] sm:$0xff]  ;;  %v2474_v20 = vld [vmem:[%s5523_s7 + $0x11d0] sm:$0xff] }
 0x2f9   :  { %2511 = vmatpush.msra.mxu0 %v2424_v43  ;;  %2494 = vmatpush.msra.mxu3 %v2386_v27  ;;  %v2467_v24 = vld [vmem:[%s5523_s7 + $0x1198] sm:$0xff]  ;;  %v2429_v43 = vld [vmem:[%s5523_s7 + $0x1068] sm:$0xff] }
 0x2fa   :  { %2287 = vmatpush.msrb.mxu2 %v2209_v28  ;;  %2347 = vmatpush.msrb.mxu1 %v2210_v29  ;;  %v2252_v27 = vld [vmem:[%s5523_s7 + $0xec8] sm:$0xff]  ;;  %v2472_v28 = vld [vmem:[%s5523_s7 + $0x11c0] sm:$0xff] }
 0x2fb   :  { %2512 = vmatpush.msra.mxu0 %v2422_v11  ;;  %2495 = vmatpush.msra.mxu3 %v2384_v30  ;;  %v2465_v29 = vld [vmem:[%s5523_s7 + $0x1188] sm:$0xff]  ;;  %v2427_v11 = vld [vmem:[%s5523_s7 + $0x1058] sm:$0xff] }
 0x2fc   :  { %2288 = vmatpush.msrb.mxu2 %v2207_v33  ;;  %2348 = vmatpush.msrb.mxu1 %v2208_v9  ;;  %v2250_v30 = vld [vmem:[%s5523_s7 + $0xeb8] sm:$0xff]  ;;  %v2470_v33 = vld [vmem:[%s5523_s7 + $0x11b0] sm:$0xff] }
 0x2fd   :  { %2496 = vmatmul.f32.vlgmr.msra.gmra.mxu3 %v1259_v18  ;;  %2513 = vmatpush.msra.mxu0 %v2420_v47  ;;  %v2463_v9 = vld [vmem:[%s5523_s7 + $0x1178] sm:$0xff]  ;;  %v2425_v47 = vld [vmem:[%s5523_s7 + $0x1048] sm:$0xff] }
 0x2fe   :  { %2560 = vmatpush.msrb.mxu3 %v2447_v51  ;;  %2289 = vmatpush.msrb.mxu2 %v2205_v42  ;;  %v2248_v51 = vld [vmem:[%s5523_s7 + $0xea8] sm:$0xff]  ;;  %v2468_v42 = vld [vmem:[%s5523_s7 + $0x11a0] sm:$0xff] }
 0x2ff   :  { %2349 = vmatpush.msrb.mxu1 %v2206_v19  ;;  %2514 = vmatpush.msra.mxu0 %v2418_v37  ;;  %v2461_v19 = vld [vmem:[%s5523_s7 + $0x1168] sm:$0xff]  ;;  %v2423_v37 = vld [vmem:[%s5523_s7 + $0x1038] sm:$0xff] }
 0x300   :  { %2561 = vmatpush.msrb.mxu3 %v2445_v41  ;;  %2290 = vmatpush.msrb.mxu2 %v2203_v3  ;;  %v2246_v41 = vld [vmem:[%s5523_s7 + $0xe98] sm:$0xff]  ;;  %v2466_v3 = vld [vmem:[%s5523_s7 + $0x1190] sm:$0xff] }
 0x301   :  { %2350 = vmatpush.msrb.mxu1 %v2204_v40  ;;  %2515 = vmatpush.msra.mxu0 %v2416_v21  ;;  %v2459_v40 = vld [vmem:[%s5523_s7 + $0x1158] sm:$0xff]  ;;  %v2421_v21 = vld [vmem:[%s5523_s7 + $0x1028] sm:$0xff] }
 0x302   :  { %2562 = vmatpush.msrb.mxu3 %v2443_v6  ;;  %2516 = vmatmul.f32.vlgmr.msra.gmra.mxu0 %v1260_v39  ;;  %v2244_v6 = vld [vmem:[%s5523_s7 + $0xe88] sm:$0xff] }
 0x303   :  { %2580 = vmatpush.msrb.mxu0 %v2479_v16  ;;  %2291 = vmatpush.msrb.mxu2 %v2201_v48  ;;  %v2464_v16 = vld [vmem:[%s5523_s7 + $0x1180] sm:$0xff]  ;;  %v2457_v48 = vld [vmem:[%s5523_s7 + $0x1148] sm:$0xff] }
 0x304   :  { %2351 = vmatpush.msrb.mxu1 %v2202_v55  ;;  %2563 = vmatpush.msrb.mxu3 %v2441_v57  ;;  %v2419_v55 = vld [vmem:[%s5523_s7 + $0x1018] sm:$0xff] }
 0x305   :  { %2581 = vmatpush.msrb.mxu0 %v2477_v63  ;;  %2292 = vmatpush.msrb.mxu2 %v2199_v46  ;;  %v2242_v57 = vld [vmem:[%s5523_s7 + $0xe78] sm:$0xff]  ;;  %v2462_v63 = vld [vmem:[%s5523_s7 + $0x1170] sm:$0xff] }
 0x306   :  { %2352 = vmatpush.msrb.mxu1 %v2200_v44  ;;  %2564 = vmatpush.msrb.mxu3 %v2439_v50  ;;  %v1675_v38 = vpop.f32.mrf.mxu2  ;;  %v2455_v46 = vld [vmem:[%s5523_s7 + $0x1138] sm:$0xff]  ;;  %v2417_v44 = vld [vmem:[%s5523_s7 + $0x1008] sm:$0xff] }
 0x307   :  { %2582 = vmatpush.msrb.mxu0 %v2475_v12  ;;  %2293 = vmatpush.msrb.mxu2 %v2197_v45  ;;  %v1676_v62 = vadd.f32 %v1675_v38, %v5006_v60  ;;  %v2471_v60 = vld [vmem:[%s5523_s7 + $0x11b8] sm:$0xff]  ;;  %v2240_v50 = vld [vmem:[%s5523_s7 + $0xe68] sm:$0xff]  ;;  %v2460_v12 = vld [vmem:[%s5523_s7 + $0x1160] sm:$0xff] }
 0x308   :  { %2353 = vmatpush.msrb.mxu1 %v2198_v53  ;;  %2565 = vmatpush.msrb.mxu3 %v2437_v59  ;;  %v2453_v45 = vld [vmem:[%s5523_s7 + $0x1128] sm:$0xff]  ;;  %v2238_v53 = vld [vmem:[%s5523_s7 + $0xe58] sm:$0xff]  ;;  %v2458_v59 = vld [vmem:[%s5523_s7 + $0x1150] sm:$0xff] }
 0x309   :  { %2583 = vmatpush.msrb.mxu0 %v2473_v61  ;;  %2294 = vmatpush.msrb.mxu2 %v2195_v34  ;;  %v1696_v8 = vadd.f32 %v1695_v15, %v1676_v62  ;;  %v2451_v61 = vld [vmem:[%s5523_s7 + $0x1118] sm:$0xff]  ;;  %v2236_v34 = vld [vmem:[%s5523_s7 + $0xe48] sm:$0xff]  ;;  %v2456_v38 = vld [vmem:[%s5523_s7 + $0x1140] sm:$0xff] }
 0x30a   :  { %2354 = vmatpush.msrb.mxu1 %v2196_v0  ;;  %2566 = vmatpush.msrb.mxu3 %v2435_v2  ;;  %v2449_v0 = vld [vmem:[%s5523_s7 + $0x1108] sm:$0xff]  ;;  %v2454_v2 = vld [vmem:[%s5523_s7 + $0x1130] sm:$0xff]  ;;  %v2452_v15 = vld [vmem:[%s5523_s7 + $0x1120] sm:$0xff] }
 0x30b   :  { %2295 = vmatmul.f32.vlgmr.msrb.gmra.mxu2 %v1257_v58  ;;  %2355 = vmatmul.f32.vlgmr.msrb.gmra.mxu1 %v1257_v58  ;;  %v5190_v54 = vadd.f32 %v1715_v23, %v1696_v8  ;;  %v2232_v62 = vld [vmem:[%s5523_s7 + $0xe28] sm:$0xff]  ;;  %v2450_v58 = vld [vmem:[%s5523_s7 + $0x1110] sm:$0xff]  ;;  %v2415_v8 = vld [vmem:[%s5523_s7 + $0xff8] sm:$0xff] }
 0x30c   :  { %2359 = vmatpush.msra.mxu2 %v2258_v7  ;;  %2520 = vmatpush.msra.mxu1 %v2478_v49  ;;  %v2228_v7 = vld [vmem:[%s5523_s7 + $0xe08] sm:$0xff]  ;;  %v2448_v49 = vld [vmem:[%s5523_s7 + $0x1100] sm:$0xff] }
 0x30d   :  { %2584 = vmatpush.msrb.mxu0 %v2471_v60  ;;  %2567 = vmatpush.msrb.mxu3 %v2433_v22  ;;  %v2413_v23 = vld [vmem:[%s5523_s7 + $0xfe8] sm:$0xff]  ;;  %v2411_v60 = vld [vmem:[%s5523_s7 + $0xfd8] sm:$0xff] }
 0x30e   :  { %2360 = vmatpush.msra.mxu2 %v2256_v52  ;;  %2521 = vmatpush.msra.mxu1 %v2476_v25  ;;  %v2409_v22 = vld [vmem:[%s5523_s7 + $0xfc8] sm:$0xff]  ;;  %v2403_v52 = vld [vmem:[%s5523_s7 + $0xf98] sm:$0xff]  ;;  %v5359_v25 = vpop.f32.mrf.mxu1 }
 0x30f   :  { %2585 = vmatpush.msrb.mxu0 %v2469_v36  ;;  %2568 = vmatpush.msrb.mxu3 %v2431_v31  ;;  %v2401_v36 = vld [vmem:[%s5523_s7 + $0xf88] sm:$0xff]  ;;  %v2399_v31 = vld [vmem:[%s5523_s7 + $0xf78] sm:$0xff] }
 0x310   :  { %2361 = vmatpush.msra.mxu2 %v2254_v56  ;;  %2522 = vmatpush.msra.mxu1 %v2474_v20  ;;  %v2397_v56 = vld [vmem:[%s5523_s7 + $0xf68] sm:$0xff]  ;;  %v2395_v20 = vld [vmem:[%s5523_s7 + $0xf58] sm:$0xff] }
 0x311   :  { %2586 = vmatpush.msrb.mxu0 %v2467_v24  ;;  %2569 = vmatpush.msrb.mxu3 %v2429_v43  ;;  %v2393_v43 = vld [vmem:[%s5523_s7 + $0xf48] sm:$0xff] }
 0x312   :  { %2362 = vmatpush.msra.mxu2 %v2252_v27  ;;  %2523 = vmatpush.msra.mxu1 %v2472_v28  ;;  %v2391_v27 = vld [vmem:[%s5523_s7 + $0xf38] sm:$0xff] }
 0x313   :  { %2587 = vmatpush.msrb.mxu0 %v2465_v29  ;;  %2570 = vmatpush.msrb.mxu3 %v2427_v11  ;;  %v2389_v29 = vld [vmem:[%s5523_s7 + $0xf28] sm:$0xff]  ;;  %v2387_v11 = vld [vmem:[%s5523_s7 + $0xf18] sm:$0xff] }
 0x314   :  { %2363 = vmatpush.msra.mxu2 %v2250_v30  ;;  %2524 = vmatpush.msra.mxu1 %v2470_v33  ;;  %v2385_v33 = vld [vmem:[%s5523_s7 + $0xf08] sm:$0xff] }
 0x315   :  { %2588 = vmatpush.msrb.mxu0 %v2463_v9  ;;  %2571 = vmatpush.msrb.mxu3 %v2425_v47  ;;  %v1894_v9 = vpop.f32.mrf.mxu0 }
 0x316   :  { %2364 = vmatpush.msra.mxu2 %v2248_v51  ;;  %2525 = vmatpush.msra.mxu1 %v2468_v42  ;;  %v5373_v24 = vpop.f32.mrf.mxu1 }
 0x317   :  { %2589 = vmatpush.msrb.mxu0 %v2461_v19  ;;  %2572 = vmatpush.msrb.mxu3 %v2423_v37  ;;  %v2627_v37 = vld [vmem:[%s5525_s9 + $0x78] sm:$0xff] }
 0x318   :  { %2365 = vmatpush.msra.mxu2 %v2246_v41  ;;  %2526 = vmatpush.msra.mxu1 %v2466_v3  ;;  %v2626_v41 = vld [vmem:[%s5525_s9 + $0x70] sm:$0xff]  ;;  %v2625_v3 = vld [vmem:[%s5525_s9 + $0x68] sm:$0xff] }
 0x319   :  { %2590 = vmatpush.msrb.mxu0 %v2459_v40  ;;  %2573 = vmatpush.msrb.mxu3 %v2421_v21  ;;  %v2621_v40 = vld [vmem:[%s5525_s9 + $0x48] sm:$0xff]  ;;  %v2620_v21 = vld [vmem:[%s5525_s9 + $0x40] sm:$0xff] }
 0x31a   :  { %2366 = vmatpush.msra.mxu2 %v2244_v6  ;;  %2527 = vmatpush.msra.mxu1 %v2464_v16  ;;  %v2619_v6 = vld [vmem:[%s5525_s9 + $0x38] sm:$0xff]  ;;  %v2618_v16 = vld [vmem:[%s5525_s9 + $0x30] sm:$0xff] }
 0x31b   :  { %2591 = vmatpush.msrb.mxu0 %v2457_v48  ;;  %2574 = vmatpush.msrb.mxu3 %v2419_v55  ;;  %v2617_v48 = vld [vmem:[%s5525_s9 + $0x28] sm:$0xff]  ;;  %v1874_v55 = vpop.f32.mrf.mxu3 }
 0x31c   :  { %2367 = vmatpush.msra.mxu2 %v2242_v57  ;;  %2528 = vmatpush.msra.mxu1 %v2462_v63  ;;  %v2616_v57 = vld [vmem:[%s5525_s9 + $0x20] sm:$0xff]  ;;  %v2615_v63 = vld [vmem:[%s5525_s9 + $0x18] sm:$0xff] }
 0x31d   :  { %2592 = vmatpush.msrb.mxu0 %v2455_v46  ;;  %2575 = vmatpush.msrb.mxu3 %v2417_v44  ;;  %v2614_v46 = vld [vmem:[%s5525_s9 + $0x10] sm:$0xff]  ;;  %v2075_v44 = vpop.f32.mrf.mxu0 }
 0x31e   :  { %2368 = vmatpush.msra.mxu2 %v2240_v50  ;;  %2529 = vmatpush.msra.mxu1 %v2460_v12  ;;  %v2613_v12 = vld [vmem:[%s5525_s9 + $0x8] sm:$0xff] }
 0x31f   :  { %2576 = vmatmul.f32.vlgmr.msrb.gmra.mxu3 %v1260_v39  ;;  %2593 = vmatpush.msrb.mxu0 %v2453_v45  ;;  %v1261_v39 = vmax.f32 %v4091_v35, 0.0  ;;  %v2230_v35 = vld [vmem:[%s5523_s7 + $0xe18] sm:$0xff]  ;;  %v2612_v45 = vld [vmem:[%s5525_s9] sm:$0xff] }
 0x320   :  { %2369 = vmatpush.msra.mxu2 %v2238_v53  ;;  %2530 = vmatpush.msra.mxu1 %v2458_v59  ;;  %v2643_v59 = vld [vmem:[%s5525_s9 + $0xf8] sm:$0xff] }
 0x321   :  { %2594 = vmatpush.msrb.mxu0 %v2451_v61  ;;  %v2642_v61 = vld [vmem:[%s5525_s9 + $0xf0] sm:$0xff] }
 0x322   :  { %2370 = vmatpush.msra.mxu2 %v2236_v34  ;;  %2531 = vmatpush.msra.mxu1 %v2456_v38  ;;  %v1914_v30 = vpop.f32.mrf.mxu1  ;;  %v1516_v34 = vadd.f32 %v4942_v4, %v4886_v17  ;;  %v2641_v38 = vld [vmem:[%s5525_s9 + $0xe8] sm:$0xff]  ;;  %v2638_v4 = vld [vmem:[%s5525_s9 + $0xd0] sm:$0xff] }
 0x323   :  { %2595 = vmatpush.msrb.mxu0 %v2449_v0  ;;  %v1915_v47 = vadd.f32 %v1914_v30, %v1894_v9  ;;  %v2055_v50 = vpop.f32.mrf.mxu3 }
 0x324   :  { %2596 = vmatmul.f32.vlgmr.msrb.gmra.mxu0 %v1261_v39  ;;  %2371 = vmatpush.msra.mxu2 %v2234_v32 }
 0x325   :  { %2532 = vmatpush.msra.mxu1 %v2454_v2 }
 0x326   :  { %2372 = vmatpush.msra.mxu2 %v2232_v62  ;;  %v1536_v62 = vadd.f32 %v5056_v26, %v1516_v34  ;;  %v2840_v34 = vld [vmem:[%s5526_s10] ss:$0 sm:$0xff] }
 0x327   :  { %2533 = vmatpush.msra.mxu1 %v2452_v15  ;;  %v2639_v15 = vld [vmem:[%s5525_s9 + $0xd8] sm:$0xff] }
 0x328   :  { %2373 = vmatpush.msra.mxu2 %v2230_v35  ;;  %v5381_v28 = vpop.f32.mrf.mxu2  ;;  %v1616_v35 = vadd.f32 %v5116_v5, %v1536_v62  ;;  %v2635_v5 = vld [vmem:[%s5525_s9 + $0xb8] sm:$0xff] }
 0x329   :  { %2534 = vmatpush.msra.mxu1 %v2450_v58  ;;  %v2637_v58 = vld [vmem:[%s5525_s9 + $0xc8] sm:$0xff]  ;;  %v1855_v26 = vadd.f32 %v5381_v28, %v5373_v24 }
 0x32a   :  { %2374 = vmatpush.msra.mxu2 %v2228_v7 }
 0x32b   :  { %2535 = vmatpush.msra.mxu1 %v2448_v49  ;;  %2375 = vmatmul.f32.vlgmr.msra.gmra.mxu2 %v1258_v13  ;;  %v2405_v13 = vld [vmem:[%s5523_s7 + $0xfa8] sm:$0xff] }
 0x32c   :  { %2536 = vmatmul.f32.vlgmr.msra.gmra.mxu1 %v1261_v39  ;;  %2540 = vmatpush.msrb.mxu2 %v2415_v8  ;;  %v2640_v39 = vld [vmem:[%s5525_s9 + $0xe0] sm:$0xff] }
 0x32d   :  { %2648 = vmatpush.msrb.mxu1 %v2627_v37  ;;  %v2636_v8 = vld [vmem:[%s5525_s9 + $0xc0] sm:$0xff] }
 0x32e   :  { %2541 = vmatpush.msrb.mxu2 %v2413_v23 }
 0x32f   :  { %2649 = vmatpush.msrb.mxu1 %v2626_v41  ;;  %v2631_v41 = vld [vmem:[%s5525_s9 + $0x98] sm:$0xff] }
 0x330   :  { %2542 = vmatpush.msrb.mxu2 %v2411_v60  ;;  %v1636_v60 = vadd.f32 %v5118_v10, %v1616_v35 }
 0x331   :  { %2650 = vmatpush.msrb.mxu1 %v2625_v3  ;;  %v2630_v3 = vld [vmem:[%s5525_s9 + $0x90] sm:$0xff] }
 0x332   :  { %2543 = vmatpush.msrb.mxu2 %v2409_v22 }
 0x333   :  { %2651 = vmatpush.msrb.mxu1 %v2624_v1  ;;  %v2629_v1 = vld [vmem:[%s5525_s9 + $0x88] sm:$0xff] }
 0x334   :  { %2544 = vmatpush.msrb.mxu2 %v2407_v14  ;;  %v2076_v14 = vadd.f32 %v2075_v44, %v2055_v50 }
 0x336   :  { %2545 = vmatpush.msrb.mxu2 %v2405_v13  ;;  %v1875_v13 = vadd.f32 %v1874_v55, %v1855_v26 }
 0x338   :  { %2546 = vmatpush.msrb.mxu2 %v2403_v52 }
 0x33a   :  { %2547 = vmatpush.msrb.mxu2 %v2401_v36  ;;  %v2634_v36 = vld [vmem:[%s5525_s9 + $0xb0] sm:$0xff] }
 0x33b   :  { %v2155_v0 = vpop.f32.mrf.mxu0 }
 0x33c   :  { %2548 = vmatpush.msrb.mxu2 %v2399_v31  ;;  %v2135_v32 = vpop.f32.mrf.mxu3  ;;  %v1656_v31 = vadd.f32 %v5359_v25, %v1636_v60  ;;  %v2633_v25 = vld [vmem:[%s5525_s9 + $0xa8] sm:$0xff] }
 0x33e   :  { %2549 = vmatpush.msrb.mxu2 %v2397_v56  ;;  %v1937_v10 = vadd.f32 %v1875_v13, %v1656_v31 }
 0x340   :  { %2550 = vmatpush.msrb.mxu2 %v2395_v20 }
 0x342   :  { %2551 = vmatpush.msrb.mxu2 %v2393_v43 }
 0x344   :  { %2552 = vmatpush.msrb.mxu2 %v2391_v27  ;;  %v2095_v53 = vpop.f32.mrf.mxu1  ;;  %v2602_v27 = vld [vmem:[%s5524_s8] sm:$0x3] }
 0x345   :  { %v2096_v56 = vadd.f32 %v2095_v53, %v2076_v14  ;;  %v2604_v9 = vperm.slane %v2602_v27, 0 }
 0x346   :  { %2553 = vmatpush.msrb.mxu2 %v2389_v29 }
 0x347   :  { %v2158_v28 = vadd.f32 %v2096_v56, %v1937_v10 }
 0x348   :  { %2554 = vmatpush.msrb.mxu2 %v2387_v11 }
 0x34a   :  { %2555 = vmatpush.msrb.mxu2 %v2385_v33  ;;  %v1934_v51 = vpop.f32.mrf.mxu2 }
 0x34b   :  { %2556 = vmatmul.f32.vlgmr.msrb.gmra.mxu2 %v1259_v18  ;;  %v1935_v42 = vadd.f32 %v1934_v51, %v1915_v47  ;;  %v2623_v18 = vld [vmem:[%s5525_s9 + $0x58] sm:$0xff] }
 0x34c   :  { %2652 = vmatpush.msrb.mxu1 %v2623_v18  ;;  %2668 = vmatpush.msra.mxu2 %v2643_v59  ;;  %v2628_v18 = vld [vmem:[%s5525_s9 + $0x80] sm:$0xff] }
 0x34d   :  { %v5395_v19 = vadd.f32 %v1935_v42, %v5190_v54  ;;  %v2622_v54 = vld [vmem:[%s5525_s9 + $0x50] sm:$0xff]  ;;  %v2632_v42 = vld [vmem:[%s5525_s9 + $0xa0] sm:$0xff] }
 0x34e   :  { %2653 = vmatpush.msrb.mxu1 %v2622_v54  ;;  %2669 = vmatpush.msra.mxu2 %v2642_v61  ;;  %v2688_v61 = vlaneseq }
 0x350   :  { %2654 = vmatpush.msrb.mxu1 %v2621_v40  ;;  %2670 = vmatpush.msra.mxu2 %v2641_v38 }
 0x352   :  { %2655 = vmatpush.msrb.mxu1 %v2620_v21  ;;  %2671 = vmatpush.msra.mxu2 %v2640_v39 }
 0x354   :  { %2656 = vmatpush.msrb.mxu1 %v2619_v6  ;;  %2672 = vmatpush.msra.mxu2 %v2639_v15 }
 0x356   :  { %2657 = vmatpush.msrb.mxu1 %v2618_v16  ;;  %2673 = vmatpush.msra.mxu2 %v2638_v4 }
 0x358   :  { %2658 = vmatpush.msrb.mxu1 %v2617_v48  ;;  %2674 = vmatpush.msra.mxu2 %v2637_v58 }
 0x35a   :  { %2659 = vmatpush.msrb.mxu1 %v2616_v57  ;;  %2675 = vmatpush.msra.mxu2 %v2636_v8 }
 0x35c   :  { %2660 = vmatpush.msrb.mxu1 %v2615_v63  ;;  %2676 = vmatpush.msra.mxu2 %v2635_v5 }
 0x35d   :  { %v2336_v7 = vpop.f32.mrf.mxu0 }
 0x35e   :  { %2661 = vmatpush.msrb.mxu1 %v2614_v46  ;;  %v2316_v49 = vpop.f32.mrf.mxu3  ;;  %2677 = vmatpush.msra.mxu2 %v2634_v36 }
 0x360   :  { %2662 = vmatpush.msrb.mxu1 %v2613_v12  ;;  %2678 = vmatpush.msra.mxu2 %v2633_v25  ;;  %v2605_v12 = vperm.slane %v2602_v27, 1 }
 0x362   :  { %2663 = vmatpush.msrb.mxu1 %v2612_v45  ;;  %2679 = vmatpush.msra.mxu2 %v2632_v42 }
 0x364   :  { %2680 = vmatpush.msra.mxu2 %v2631_v41 }
 0x366   :  { %v2276_v17 = vpop.f32.mrf.mxu1  ;;  %2681 = vmatpush.msra.mxu2 %v2630_v3 }
 0x368   :  { %2682 = vmatpush.msra.mxu2 %v2629_v1 }
 0x36a   :  { %2683 = vmatpush.msra.mxu2 %v2628_v18 }
 0x36c   :  { %v2115_v2 = vpop.f32.mrf.mxu2 }
 0x36d   :  { %v2136_v40 = vadd.f32 %v2135_v32, %v2115_v2 }
 0x36f   :  { %v2156_v21 = vadd.f32 %v2155_v0, %v2136_v40  ;;  %v2689_v0 = vand.u32 127, %v2688_v61 }
 0x371   :  { %v2159_v57 = vadd.f32 %v2156_v21, %v5395_v19  ;;  %vm2690_vm2 = vcmp.lt.s32.totalorder %v2689_v0, 8 }
 0x37f   :  { %v2517_v20 = vpop.f32.mrf.mxu0 }
 0x380   :  { %v2497_v24 = vpop.f32.mrf.mxu3 }
 0x381   :  { %v2518_v29 = vadd.f32 %v2517_v20, %v2497_v24 }
 0x388   :  { %v2356_v22 = vpop.f32.mrf.mxu1 }
 0x389   :  { %v2357_v6 = vadd.f32 %v2356_v22, %v2336_v7 }
 0x38e   :  { %v2296_v23 = vpop.f32.mrf.mxu2 }
 0x38f   :  { %v2297_v52 = vadd.f32 %v2296_v23, %v2276_v17 }
 0x391   :  { %v2317_v43 = vadd.f32 %v2316_v49, %v2297_v52 }
 0x393   :  { %v2379_v30 = vadd.f32 %v2317_v43, %v2158_v28 }
 0x3a1   :  { %v2597_v46 = vpop.f32.mrf.mxu0 }
 0x3a2   :  { %v2577_v48 = vpop.f32.mrf.mxu3 }
 0x3a9   :  { %v2537_v11 = vpop.f32.mrf.mxu1 }
 0x3aa   :  { %v2538_v33 = vadd.f32 %v2537_v11, %v2518_v29 }
 0x3ac   :  { %v2600_v47 = vadd.f32 %v2538_v33, %v2379_v30 }
 0x3ae   :  { %v2608_v51 = vadd.f32 %v2604_v9, %v2600_v47  ;;  %v2376_v54 = vpop.f32.mrf.mxu2 }
 0x3af   :  { %v2377_v16 = vadd.f32 %v2376_v54, %v2357_v6 }
 0x3b0   :  { %v2610_v37 = vmax.f32 %v2608_v51, 0.0 }
 0x3b1   :  { %v2380_v44 = vadd.f32 %v2377_v16, %v2159_v57 }
 0x3b2   :  { %2664 = vmatmul.f32.vlgmr.msrb.gmra.mxu1 %v2610_v37 }
 0x3ce   :  { %v2557_v55 = vpop.f32.mrf.mxu2 }
 0x3cf   :  { %v2578_v63 = vadd.f32 %v2577_v48, %v2557_v55 }
 0x3d1   :  { %v2598_v50 = vadd.f32 %v2597_v46, %v2578_v63 }
 0x3d3   :  { %v2601_v45 = vadd.f32 %v2598_v50, %v2380_v44 }
 0x3d5   :  { %v2609_v53 = vadd.f32 %v2605_v12, %v2601_v45 }
 0x3d7   :  { %v2611_v59 = vmax.f32 %v2609_v53, 0.0 }
 0x3d9   :  { %2684 = vmatmul.f32.vlgmr.msra.gmra.mxu2 %v2611_v59 }
 0x42f   :  { %v2665_v38 = vpop.f32.mrf.mxu1 }
 0x430   :  { %v2666_v32 = vadd.f32 %v2840_v34, %v2665_v38 }
 0x45c   :  { %v2685_v39 = vpop.f32.mrf.mxu2 }
 0x45d   :  { %v2686_v19 = vadd.f32 %v2685_v39, %v2666_v32 }
 0x45f   :  { %v2691_v2 = vsel %vm2690_vm2, %v2686_v19, -1e+30 }
 0x460   :  { %v2693_v62 = vsel %vm2692_vm3, %v2691_v2, -inf }
 0x461   :  { %2694 = vmax.xlane.f32.xlu0 %v2693_v62 }
 0x4d4   :  { %v2695_v15 = vpop.xlane.xlu0 %2694 }
 0x4d5   :  { %v2696_v17 = vsub.f32 %v2691_v2, %v2695_v15 }
 0x4d7   :  { %v2697_v4 = vmul.f32 1.442695, %v2696_v17 }
 0x4d9   :  { %2841 = vpow2.f32 %v2697_v4 }
 0x4df   :  { %v2842_v35 = vpop.eup %2841 }
 0x4e0   :  { %v2699_v58 = vsel %vm2692_vm3, %v2842_v35, 0.0 }
 0x4e1   :  { %2700 = vadd.xlane.f32.xlu0 %v2699_v58 }
 0x554   :  { %v2701_v7 = vpop.xlane.xlu0 %2700 }
 0x555   :  { %2843 = vrcp.f32 %v2701_v7  ;;  %v2713_v23 = vand.u32 2147483648, %v2701_v7  ;;  %v2711_v5 = vand.u32 2147483647, %v2701_v7  ;;  %vm2707_vm5 = vweird.f32 %v2701_v7 }
 0x557   :  { %v2714_v14 = vor.u32 1.1754944e-38, %v2713_v23  ;;  %vm2712_vm7 = vcmp.eq.f32.partialorder %v2711_v5, 8.507059e+37 }
 0x55b   :  { %v2844_v49 = vpop.eup %2843 }
 0x55c   :  { %v2703_v26 = vmul.f32 %v2844_v49, %v2701_v7  ;;  %vm2708_vm4 = vweird.f32 %v2844_v49 }
 0x55d   :  { %vm2709_vm6 = vmor %vm2707_vm5, %vm2708_vm4 }
 0x55e   :  { %v2704_v8 = vsub.f32 1.0, %v2703_v26 }
 0x560   :  { %v2705_v60 = vmul.f32 %v2844_v49, %v2704_v8 }
 0x562   :  { %v2706_v22 = vadd.f32 %v2844_v49, %v2705_v60 }
 0x564   :  { %v2710_v13 = vsel %vm2709_vm6, %v2844_v49, %v2706_v22 }
 0x565   :  { %v2715_v52 = vsel %vm2712_vm7, %v2714_v14, %v2710_v13 }
 0x566   :  { %v2716_v36 = vmul.f32 %v2842_v35, %v2715_v52 }
 0x568   :  { %v2717_v31 = vsel %vm2690_vm2, %v2716_v36, %v2686_v19 }
 0x569   :  { %2718 = vst.msk [vmem:[%s5527_s11] sm:$0xff] %vm2692_vm3, %v2717_v31 }
 0x56a   :  { %2723 = vsyncpa [#allocation6], 1 }

</bundles_post_ra>
